<compile_context>
chip_gen: v7x
topology: tpu7x:2x2x1
jax: 0.10.0
libtpu: 0.0.40
codegen_flags: <defaults>
</compile_context>

<pallas_src>
import functools

import jax
import jax.numpy as jnp
import numpy as np
from jax import lax
from jax.experimental import pallas as pl
from jax.experimental.pallas import tpu as pltpu


def _attention_kernel(x_ref, wqkv_ref, wout_ref, bout_ref, o_ref,
                      *, heads, dim_head, scale):
    """One batch element per grid step; all tensors stay resident in VMEM."""
    hidden = heads * dim_head
    C, N = x_ref.shape

    x = x_ref[...]                        # (C, N)
    wqkv = wqkv_ref[...]                  # (3*hidden, C)
    wout = wout_ref[...]                  # (C, hidden)

    # 1x1 conv == matmul over channels; q, k, v produced in a single MXU pass.
    qkv = jnp.dot(wqkv, x, preferred_element_type=jnp.float32)    # (3*hidden, N)
    q = qkv[0:hidden]                     # (hidden, N)
    k = qkv[hidden:2 * hidden]            # (hidden, N)
    v = qkv[2 * hidden:3 * hidden]        # (hidden, N)

    # l2norm over the spatial axis (PyTorch F.normalize(dim=-1), eps=1e-12),
    # applied once to the whole slabs; the attention scale is folded into the
    # cheap per-row q multiplier instead of scaling (N, N) similarities.
    eps = 1e-12
    q_norm = jnp.sqrt(jnp.sum(q * q, axis=1, keepdims=True))       # (hidden, 1)
    k_norm = jnp.sqrt(jnp.sum(k * k, axis=1, keepdims=True))       # (hidden, 1)
    qn = q * (scale / jnp.maximum(q_norm, eps))
    kn = k * (1.0 / jnp.maximum(k_norm, eps))

    y = jnp.zeros((C, N), jnp.float32)
    for h in range(heads):                # heads = 4, static unroll
        sl = slice(h * dim_head, (h + 1) * dim_head)
        q_h = qn[sl]                      # (d, N_i)   scale already folded in
        k_h = kn[sl]                      # (d, N_j)
        v_h = v[sl]                       # (d, N_j)

        # sim^T[j, i] = sum_d k[d, j] * q[d, i] * scale
        sim_t = lax.dot_general(k_h, q_h, (((0,), (0,)), ((), ())),
                                preferred_element_type=jnp.float32)   # (N_j, N_i)

        # softmax over j (sublane axis); 1/denom folded into the (C, N) result.
        m = jnp.max(sim_t, axis=0, keepdims=True)                     # (1, N_i)
        p = jnp.exp(sim_t - m)                                        # (N_j, N_i)
        denom = jnp.sum(p, axis=0, keepdims=True)                     # (1, N_i)

        # Reassociated epilogue: y[c, i] += sum_j (W_out_h @ v_h)[c, j] attn[i, j]
        vp_h = jnp.dot(wout[:, sl], v_h,
                       preferred_element_type=jnp.float32)            # (C, N_j)
        y = y + jnp.dot(vp_h, p, preferred_element_type=jnp.float32) / denom

    o_ref[...] = y + bout_ref[...]                                    # (C, N)


def attention_pallas(x, w_qkv, w_out, b_out, *, heads, dim_head, scale):
    B, C, H, W = x.shape
    N = H * W
    hidden = heads * dim_head
    xf = x.reshape(B, C, N).astype(jnp.float32)

    kernel = functools.partial(_attention_kernel,
                               heads=heads, dim_head=dim_head, scale=scale)

    out_flat = pl.pallas_call(
        kernel,
        out_shape=jax.ShapeDtypeStruct((B, C, N), jnp.float32),
        grid_spec=pltpu.PrefetchScalarGridSpec(
            num_scalar_prefetch=0,
            grid=(B,),
            in_specs=[
                pl.BlockSpec((None, C, N), lambda b: (b, 0, 0)),      # x (batch squeezed)
                pl.BlockSpec((3 * hidden, C), lambda b: (0, 0)),      # W_qkv
                pl.BlockSpec((C, hidden), lambda b: (0, 0)),          # W_out
                pl.BlockSpec((C, 1), lambda b: (0, 0)),               # b_out
            ],
            out_specs=pl.BlockSpec((None, C, N), lambda b: (b, 0, 0)),
        ),
        compiler_params=pltpu.CompilerParams(
            dimension_semantics=("parallel",)),
    )(xf,
      w_qkv.astype(jnp.float32),
      w_out.astype(jnp.float32),
      b_out.astype(jnp.float32))

    return out_flat.reshape(B, C, H, W)


def attention_reference(x, w_qkv, w_out, b_out, *, heads, dim_head, scale):
    """Pure-JAX reference mirroring the PyTorch forward."""
    B, C, H, W = x.shape
    N = H * W
    hidden = heads * dim_head
    xf = x.reshape(B, C, N)
    qkv = jnp.einsum('oc,bcn->bon', w_qkv, xf)                       # (B, 3*hidden, N)
    q, k, v = qkv[:, :hidden], qkv[:, hidden:2 * hidden], qkv[:, 2 * hidden:]
    rh = lambda t: t.reshape(B, heads, dim_head, N)
    q, k, v = rh(q), rh(k), rh(v)
    l2n = lambda t: t / jnp.maximum(
        jnp.sqrt(jnp.sum(t * t, axis=-1, keepdims=True)), 1e-12)     # F.normalize(dim=-1)
    q, k = l2n(q), l2n(k)
    sim = jnp.einsum('bhdi,bhdj->bhij', q, k) * scale
    attn = jax.nn.softmax(sim, axis=-1)
    out = jnp.einsum('bhij,bhdj->bhid', attn, v)                     # (B, h, N, d)
    out = jnp.transpose(out, (0, 1, 3, 2)).reshape(B, hidden, N)     # b (h d) (x y)
    y = jnp.einsum('ch,bhn->bcn', w_out, out) + b_out.reshape(1, C, 1)
    return y.reshape(B, C, H, W)


if __name__ == "__main__":
    # Module config: dim=4, heads=4, dim_head=32, scale=10 -> hidden_dim=128
    DIM, HEADS, DIM_HEAD, SCALE = 4, 4, 32, 10.0
    HIDDEN = HEADS * DIM_HEAD
    B, H, W = 2, 16, 16

    key = jax.random.PRNGKey(0)
    k_x, k_qkv, k_out, k_b = jax.random.split(key, 4)

    x = jax.random.normal(k_x, (B, DIM, H, W), dtype=jnp.float32)

    # Synthetic parameters with shapes matching the nn.Module __init__:
    #   to_qkv: Conv2d(dim, 3*hidden, 1, bias=False) -> weight (3*hidden, dim)
    #   to_out: Conv2d(hidden, dim, 1)               -> weight (dim, hidden), bias (dim,)
    w_qkv = 0.05 * jax.random.normal(k_qkv, (3 * HIDDEN, DIM), dtype=jnp.float32)
    w_out = 0.05 * jax.random.normal(k_out, (DIM, HIDDEN), dtype=jnp.float32)
    b_out = 0.01 * jax.random.normal(k_b, (DIM,), dtype=jnp.float32)

    out = attention_pallas(x, w_qkv, w_out, b_out.reshape(DIM, 1),
                           heads=HEADS, dim_head=DIM_HEAD, scale=SCALE)
    out = jax.block_until_ready(out)

    ref = attention_reference(x, w_qkv, w_out, b_out,
                              heads=HEADS, dim_head=DIM_HEAD, scale=SCALE)
    ref = jax.block_until_ready(ref)

    np.testing.assert_allclose(np.asarray(out), np.asarray(ref),
                               rtol=1e-4, atol=1e-5)
    print("KERNEL_OK")
</pallas_src>

<mosaic_0001>
module attributes {stable_mosaic.version = 11 : i64} {
  func.func @_attention_kernel(%arg0: i32, %arg1: memref<1x4x256xf32, #tpu.memory_space<vmem>>, %arg2: memref<384x4xf32, #tpu.memory_space<vmem>>, %arg3: memref<4x128xf32, #tpu.memory_space<vmem>>, %arg4: memref<4x1xf32, #tpu.memory_space<vmem>>, %arg5: memref<1x4x256xf32, #tpu.memory_space<vmem>>) attributes {dimension_semantics = [#tpu.dimension_semantics<parallel>], iteration_bounds = array<i64: 2>, scalar_prefetch = 0 : i64, scratch_operands = 0 : i64, tpu.core_type = #tpu.core_type<tc>, window_params = [{transform_indices = @transform_0, window_bounds = array<i64: 1, 4, 256>}, {pipeline_mode = #tpu.pipeline_mode<synchronous>, transform_indices = @transform_1, window_bounds = array<i64: 384, 4>}, {pipeline_mode = #tpu.pipeline_mode<synchronous>, transform_indices = @transform_2, window_bounds = array<i64: 4, 128>}, {pipeline_mode = #tpu.pipeline_mode<synchronous>, transform_indices = @transform_3, window_bounds = array<i64: 4, 1>}, {transform_indices = @transform_4, window_bounds = array<i64: 1, 4, 256>}]} {
    %c0 = arith.constant 0 : index
    %c0_0 = arith.constant 0 : index
    %c0_1 = arith.constant 0 : index
    %0 = vector.load %arg1[%c0, %c0_0, %c0_1] : memref<1x4x256xf32, #tpu.memory_space<vmem>>, vector<1x4x256xf32>
    %1 = vector.shape_cast %0 : vector<1x4x256xf32> to vector<4x256xf32>
    %c0_2 = arith.constant 0 : index
    %c0_3 = arith.constant 0 : index
    %2 = vector.load %arg2[%c0_2, %c0_3] : memref<384x4xf32, #tpu.memory_space<vmem>>, vector<384x4xf32>
    %c0_4 = arith.constant 0 : index
    %c0_5 = arith.constant 0 : index
    %3 = vector.load %arg3[%c0_4, %c0_5] : memref<4x128xf32, #tpu.memory_space<vmem>>, vector<4x128xf32>
    %cst = arith.constant dense<0.000000e+00> : vector<384x256xf32>
    %4 = tpu.matmul %2, %1, %cst {dimension_numbers = #tpu.dot_dimension_numbers<[1], [0], [0], [1], [0, 0, 1, 1], [], []>} : vector<384x4xf32>, vector<4x256xf32>, vector<384x256xf32> -> vector<384x256xf32>
    %5 = vector.extract_strided_slice %4 {offsets = [0, 0], sizes = [128, 256], strides = [1, 1]} : vector<384x256xf32> to vector<128x256xf32>
    %6 = vector.extract_strided_slice %4 {offsets = [128, 0], sizes = [128, 256], strides = [1, 1]} : vector<384x256xf32> to vector<128x256xf32>
    %7 = vector.extract_strided_slice %4 {offsets = [256, 0], sizes = [128, 256], strides = [1, 1]} : vector<384x256xf32> to vector<128x256xf32>
    %8 = arith.mulf %5, %5 : vector<128x256xf32>
    %cst_6 = arith.constant dense<0.000000e+00> : vector<128xf32>
    %9 = vector.multi_reduction <add>, %8, %cst_6 [1] : vector<128x256xf32> to vector<128xf32>
    %10 = vector.shape_cast %9 : vector<128xf32> to vector<128x1xf32>
    %11 = math.sqrt %10 : vector<128x1xf32>
    %12 = arith.mulf %6, %6 : vector<128x256xf32>
    %cst_7 = arith.constant dense<0.000000e+00> : vector<128xf32>
    %13 = vector.multi_reduction <add>, %12, %cst_7 [1] : vector<128x256xf32> to vector<128xf32>
    %14 = vector.shape_cast %13 : vector<128xf32> to vector<128x1xf32>
    %15 = math.sqrt %14 : vector<128x1xf32>
    %cst_8 = arith.constant 9.99999996E-13 : f32
    %16 = vector.broadcast %cst_8 : f32 to vector<128x1xf32>
    %17 = arith.maximumf %11, %16 : vector<128x1xf32>
    %cst_9 = arith.constant 1.000000e+01 : f32
    %18 = vector.broadcast %cst_9 : f32 to vector<128x1xf32>
    %19 = arith.divf %18, %17 : vector<128x1xf32>
    %20 = vector.broadcast %19 : vector<128x1xf32> to vector<128x256xf32>
    %21 = arith.mulf %5, %20 : vector<128x256xf32>
    %cst_10 = arith.constant 9.99999996E-13 : f32
    %22 = vector.broadcast %cst_10 : f32 to vector<128x1xf32>
    %23 = arith.maximumf %15, %22 : vector<128x1xf32>
    %cst_11 = arith.constant 1.000000e+00 : f32
    %24 = vector.broadcast %cst_11 : f32 to vector<128x1xf32>
    %25 = arith.divf %24, %23 : vector<128x1xf32>
    %26 = vector.broadcast %25 : vector<128x1xf32> to vector<128x256xf32>
    %27 = arith.mulf %6, %26 : vector<128x256xf32>
    %cst_12 = arith.constant 0.000000e+00 : f32
    %28 = vector.broadcast %cst_12 : f32 to vector<4x256xf32>
    %29 = vector.extract_strided_slice %21 {offsets = [0, 0], sizes = [32, 256], strides = [1, 1]} : vector<128x256xf32> to vector<32x256xf32>
    %30 = vector.extract_strided_slice %27 {offsets = [0, 0], sizes = [32, 256], strides = [1, 1]} : vector<128x256xf32> to vector<32x256xf32>
    %31 = vector.extract_strided_slice %7 {offsets = [0, 0], sizes = [32, 256], strides = [1, 1]} : vector<128x256xf32> to vector<32x256xf32>
    %cst_13 = arith.constant dense<0.000000e+00> : vector<256x256xf32>
    %32 = tpu.matmul %30, %29, %cst_13 {dimension_numbers = #tpu.dot_dimension_numbers<[0], [0], [1], [1], [0, 1, 1, 1], [], []>} : vector<32x256xf32>, vector<32x256xf32>, vector<256x256xf32> -> vector<256x256xf32>
    %cst_14 = arith.constant dense<0xFF800000> : vector<256xf32>
    %33 = vector.multi_reduction <maximumf>, %32, %cst_14 [0] : vector<256x256xf32> to vector<256xf32>
    %34 = vector.shape_cast %33 : vector<256xf32> to vector<1x256xf32>
    %35 = vector.broadcast %34 : vector<1x256xf32> to vector<256x256xf32>
    %36 = arith.subf %32, %35 : vector<256x256xf32>
    %37 = math.exp %36 : vector<256x256xf32>
    %cst_15 = arith.constant dense<0.000000e+00> : vector<256xf32>
    %38 = vector.multi_reduction <add>, %37, %cst_15 [0] : vector<256x256xf32> to vector<256xf32>
    %39 = vector.shape_cast %38 : vector<256xf32> to vector<1x256xf32>
    %40 = vector.extract_strided_slice %3 {offsets = [0, 0], sizes = [4, 32], strides = [1, 1]} : vector<4x128xf32> to vector<4x32xf32>
    %cst_16 = arith.constant dense<0.000000e+00> : vector<4x256xf32>
    %41 = tpu.matmul %40, %31, %cst_16 {dimension_numbers = #tpu.dot_dimension_numbers<[1], [0], [0], [1], [0, 0, 1, 1], [], []>} : vector<4x32xf32>, vector<32x256xf32>, vector<4x256xf32> -> vector<4x256xf32>
    %cst_17 = arith.constant dense<0.000000e+00> : vector<4x256xf32>
    %42 = tpu.matmul %41, %37, %cst_17 {dimension_numbers = #tpu.dot_dimension_numbers<[1], [0], [0], [1], [0, 0, 1, 1], [], []>} : vector<4x256xf32>, vector<256x256xf32>, vector<4x256xf32> -> vector<4x256xf32>
    %43 = vector.broadcast %39 : vector<1x256xf32> to vector<4x256xf32>
    %44 = arith.divf %42, %43 : vector<4x256xf32>
    %45 = arith.addf %28, %44 : vector<4x256xf32>
    %46 = vector.extract_strided_slice %21 {offsets = [32, 0], sizes = [32, 256], strides = [1, 1]} : vector<128x256xf32> to vector<32x256xf32>
    %47 = vector.extract_strided_slice %27 {offsets = [32, 0], sizes = [32, 256], strides = [1, 1]} : vector<128x256xf32> to vector<32x256xf32>
    %48 = vector.extract_strided_slice %7 {offsets = [32, 0], sizes = [32, 256], strides = [1, 1]} : vector<128x256xf32> to vector<32x256xf32>
    %cst_18 = arith.constant dense<0.000000e+00> : vector<256x256xf32>
    %49 = tpu.matmul %47, %46, %cst_18 {dimension_numbers = #tpu.dot_dimension_numbers<[0], [0], [1], [1], [0, 1, 1, 1], [], []>} : vector<32x256xf32>, vector<32x256xf32>, vector<256x256xf32> -> vector<256x256xf32>
    %cst_19 = arith.constant dense<0xFF800000> : vector<256xf32>
    %50 = vector.multi_reduction <maximumf>, %49, %cst_19 [0] : vector<256x256xf32> to vector<256xf32>
    %51 = vector.shape_cast %50 : vector<256xf32> to vector<1x256xf32>
    %52 = vector.broadcast %51 : vector<1x256xf32> to vector<256x256xf32>
    %53 = arith.subf %49, %52 : vector<256x256xf32>
    %54 = math.exp %53 : vector<256x256xf32>
    %cst_20 = arith.constant dense<0.000000e+00> : vector<256xf32>
    %55 = vector.multi_reduction <add>, %54, %cst_20 [0] : vector<256x256xf32> to vector<256xf32>
    %56 = vector.shape_cast %55 : vector<256xf32> to vector<1x256xf32>
    %57 = vector.extract_strided_slice %3 {offsets = [0, 32], sizes = [4, 32], strides = [1, 1]} : vector<4x128xf32> to vector<4x32xf32>
    %cst_21 = arith.constant dense<0.000000e+00> : vector<4x256xf32>
    %58 = tpu.matmul %57, %48, %cst_21 {dimension_numbers = #tpu.dot_dimension_numbers<[1], [0], [0], [1], [0, 0, 1, 1], [], []>} : vector<4x32xf32>, vector<32x256xf32>, vector<4x256xf32> -> vector<4x256xf32>
    %cst_22 = arith.constant dense<0.000000e+00> : vector<4x256xf32>
    %59 = tpu.matmul %58, %54, %cst_22 {dimension_numbers = #tpu.dot_dimension_numbers<[1], [0], [0], [1], [0, 0, 1, 1], [], []>} : vector<4x256xf32>, vector<256x256xf32>, vector<4x256xf32> -> vector<4x256xf32>
    %60 = vector.broadcast %56 : vector<1x256xf32> to vector<4x256xf32>
    %61 = arith.divf %59, %60 : vector<4x256xf32>
    %62 = arith.addf %45, %61 : vector<4x256xf32>
    %63 = vector.extract_strided_slice %21 {offsets = [64, 0], sizes = [32, 256], strides = [1, 1]} : vector<128x256xf32> to vector<32x256xf32>
    %64 = vector.extract_strided_slice %27 {offsets = [64, 0], sizes = [32, 256], strides = [1, 1]} : vector<128x256xf32> to vector<32x256xf32>
    %65 = vector.extract_strided_slice %7 {offsets = [64, 0], sizes = [32, 256], strides = [1, 1]} : vector<128x256xf32> to vector<32x256xf32>
    %cst_23 = arith.constant dense<0.000000e+00> : vector<256x256xf32>
    %66 = tpu.matmul %64, %63, %cst_23 {dimension_numbers = #tpu.dot_dimension_numbers<[0], [0], [1], [1], [0, 1, 1, 1], [], []>} : vector<32x256xf32>, vector<32x256xf32>, vector<256x256xf32> -> vector<256x256xf32>
    %cst_24 = arith.constant dense<0xFF800000> : vector<256xf32>
    %67 = vector.multi_reduction <maximumf>, %66, %cst_24 [0] : vector<256x256xf32> to vector<256xf32>
    %68 = vector.shape_cast %67 : vector<256xf32> to vector<1x256xf32>
    %69 = vector.broadcast %68 : vector<1x256xf32> to vector<256x256xf32>
    %70 = arith.subf %66, %69 : vector<256x256xf32>
    %71 = math.exp %70 : vector<256x256xf32>
    %cst_25 = arith.constant dense<0.000000e+00> : vector<256xf32>
    %72 = vector.multi_reduction <add>, %71, %cst_25 [0] : vector<256x256xf32> to vector<256xf32>
    %73 = vector.shape_cast %72 : vector<256xf32> to vector<1x256xf32>
    %74 = vector.extract_strided_slice %3 {offsets = [0, 64], sizes = [4, 32], strides = [1, 1]} : vector<4x128xf32> to vector<4x32xf32>
    %cst_26 = arith.constant dense<0.000000e+00> : vector<4x256xf32>
    %75 = tpu.matmul %74, %65, %cst_26 {dimension_numbers = #tpu.dot_dimension_numbers<[1], [0], [0], [1], [0, 0, 1, 1], [], []>} : vector<4x32xf32>, vector<32x256xf32>, vector<4x256xf32> -> vector<4x256xf32>
    %cst_27 = arith.constant dense<0.000000e+00> : vector<4x256xf32>
    %76 = tpu.matmul %75, %71, %cst_27 {dimension_numbers = #tpu.dot_dimension_numbers<[1], [0], [0], [1], [0, 0, 1, 1], [], []>} : vector<4x256xf32>, vector<256x256xf32>, vector<4x256xf32> -> vector<4x256xf32>
    %77 = vector.broadcast %73 : vector<1x256xf32> to vector<4x256xf32>
    %78 = arith.divf %76, %77 : vector<4x256xf32>
    %79 = arith.addf %62, %78 : vector<4x256xf32>
    %80 = vector.extract_strided_slice %21 {offsets = [96, 0], sizes = [32, 256], strides = [1, 1]} : vector<128x256xf32> to vector<32x256xf32>
    %81 = vector.extract_strided_slice %27 {offsets = [96, 0], sizes = [32, 256], strides = [1, 1]} : vector<128x256xf32> to vector<32x256xf32>
    %82 = vector.extract_strided_slice %7 {offsets = [96, 0], sizes = [32, 256], strides = [1, 1]} : vector<128x256xf32> to vector<32x256xf32>
    %cst_28 = arith.constant dense<0.000000e+00> : vector<256x256xf32>
    %83 = tpu.matmul %81, %80, %cst_28 {dimension_numbers = #tpu.dot_dimension_numbers<[0], [0], [1], [1], [0, 1, 1, 1], [], []>} : vector<32x256xf32>, vector<32x256xf32>, vector<256x256xf32> -> vector<256x256xf32>
    %cst_29 = arith.constant dense<0xFF800000> : vector<256xf32>
    %84 = vector.multi_reduction <maximumf>, %83, %cst_29 [0] : vector<256x256xf32> to vector<256xf32>
    %85 = vector.shape_cast %84 : vector<256xf32> to vector<1x256xf32>
    %86 = vector.broadcast %85 : vector<1x256xf32> to vector<256x256xf32>
    %87 = arith.subf %83, %86 : vector<256x256xf32>
    %88 = math.exp %87 : vector<256x256xf32>
    %cst_30 = arith.constant dense<0.000000e+00> : vector<256xf32>
    %89 = vector.multi_reduction <add>, %88, %cst_30 [0] : vector<256x256xf32> to vector<256xf32>
    %90 = vector.shape_cast %89 : vector<256xf32> to vector<1x256xf32>
    %91 = vector.extract_strided_slice %3 {offsets = [0, 96], sizes = [4, 32], strides = [1, 1]} : vector<4x128xf32> to vector<4x32xf32>
    %cst_31 = arith.constant dense<0.000000e+00> : vector<4x256xf32>
    %92 = tpu.matmul %91, %82, %cst_31 {dimension_numbers = #tpu.dot_dimension_numbers<[1], [0], [0], [1], [0, 0, 1, 1], [], []>} : vector<4x32xf32>, vector<32x256xf32>, vector<4x256xf32> -> vector<4x256xf32>
    %cst_32 = arith.constant dense<0.000000e+00> : vector<4x256xf32>
    %93 = tpu.matmul %92, %88, %cst_32 {dimension_numbers = #tpu.dot_dimension_numbers<[1], [0], [0], [1], [0, 0, 1, 1], [], []>} : vector<4x256xf32>, vector<256x256xf32>, vector<4x256xf32> -> vector<4x256xf32>
    %94 = vector.broadcast %90 : vector<1x256xf32> to vector<4x256xf32>
    %95 = arith.divf %93, %94 : vector<4x256xf32>
    %96 = arith.addf %79, %95 : vector<4x256xf32>
    %c0_33 = arith.constant 0 : index
    %c0_34 = arith.constant 0 : index
    %97 = vector.load %arg4[%c0_33, %c0_34] : memref<4x1xf32, #tpu.memory_space<vmem>>, vector<4x1xf32>
    %98 = vector.broadcast %97 : vector<4x1xf32> to vector<4x256xf32>
    %99 = arith.addf %96, %98 : vector<4x256xf32>
    %c0_35 = arith.constant 0 : index
    %c0_36 = arith.constant 0 : index
    %c0_37 = arith.constant 0 : index
    %100 = vector.load %arg5[%c0_35, %c0_36, %c0_37] : memref<1x4x256xf32, #tpu.memory_space<vmem>>, vector<1x4x256xf32>
    %101 = vector.shape_cast %100 : vector<1x4x256xf32> to vector<4x256xf32>
    %102 = vector.shape_cast %99 : vector<4x256xf32> to vector<1x4x256xf32>
    tpu.vector_store %arg5[%c0_35, %c0_36, %c0_37], %102 {strides = array<i32>} : memref<1x4x256xf32, #tpu.memory_space<vmem>>, vector<1x4x256xf32>,
    return
  }
  func.func @transform_0(%arg0: i32) -> (i32, i32, i32) {
    %c0_i32 = arith.constant 0 : i32
    %c0_i32_0 = arith.constant 0 : i32
    %c0_i32_1 = arith.constant 0 : i32
    return %arg0, %c0_i32, %c0_i32_0 : i32, i32, i32
  }
  func.func @transform_1(%arg0: i32) -> (i32, i32) {
    %c0_i32 = arith.constant 0 : i32
    %c0_i32_0 = arith.constant 0 : i32
    %c0_i32_1 = arith.constant 0 : i32
    return %c0_i32, %c0_i32_0 : i32, i32
  }
  func.func @transform_2(%arg0: i32) -> (i32, i32) {
    %c0_i32 = arith.constant 0 : i32
    %c0_i32_0 = arith.constant 0 : i32
    %c0_i32_1 = arith.constant 0 : i32
    return %c0_i32, %c0_i32_0 : i32, i32
  }
  func.func @transform_3(%arg0: i32) -> (i32, i32) {
    %c0_i32 = arith.constant 0 : i32
    %c0_i32_0 = arith.constant 0 : i32
    %c0_i32_1 = arith.constant 0 : i32
    return %c0_i32, %c0_i32_0 : i32, i32
  }
  func.func @transform_4(%arg0: i32) -> (i32, i32, i32) {
    %c0_i32 = arith.constant 0 : i32
    %c0_i32_0 = arith.constant 0 : i32
    %c0_i32_1 = arith.constant 0 : i32
    return %arg0, %c0_i32, %c0_i32_0 : i32, i32, i32
  }
}

</mosaic_0001>

<bundles_post_ra>
// kernel: tpu_custom_call.1
= control target key start
LH: loop header
LB: loop body
LE: loop exit
PB: predicated region body
PF: predicated region fallthrough
CT: control target
= control target key end

     0   :  { %9 = vsyncpa [#allocation3], 0  ;;  %s10587_s0 = inlined_call_operand.vmem [shape: f32[2,4,256], index: 0, kind: input, shape index: {}]   ;;  %s10588_s1 = inlined_call_operand.vmem [shape: f32[384,4], index: 1, kind: input, shape index: {}]   ;;  %s10589_s2 = inlined_call_operand.vmem [shape: f32[4,128], index: 2, kind: input, shape index: {}]   ;;  %s10590_s3 = inlined_call_operand.vmem [shape: f32[4,1], index: 3, kind: input, shape index: {}]   ;;  %s10591_s4 = inlined_call_operand.hbm [shape: f32[2,4,256], index: 4, kind: output, shape index: {}]  }
   0x1   :  { %11 = vsyncpa [#allocation3 + $0x1], 0  ;;  %s6334_s15 = smov 0   ;;  %s6336_s16 = smov 0  }
   0x2   :  { %s6338_s17 = smov 0   ;;  %s6340_s18 = smov 0  }
   0x3 LB: > { %s6355_s19 = sadd.s32 4294967295, %s6301_s18   ;;  %s5018_s20 = sadd.s32 4294967294, %s6301_s18   ;;  %s6301_s18 = sphi %s6340_s18, %s11530_s18   ;;  %s6297_s17 = sphi %s6338_s17, %s11529_s17   ;;  %s6293_s16 = sphi %s6336_s16, %s11528_s16   ;;  %s6289_s15 = sphi %s6334_s15, %s11527_s15  }
   0x4   : > { %s6359_s21 = sadd.s32 1, %s6301_s18   ;;  %s113_s22 = sadd.s32 1, %s6297_s17 }
   0x5   : > { %s110_s23 = ssub.s32 %s6301_s18, %s6359_s21  ;;  %p123_p0 = scmp.ne.s32.totalorder %s6297_s17, %s6293_s16 }
   0x6   : > { %p111_p1 = scmp.eq.s32.totalorder %s110_s23, 0  ;;  %p124_p2 = scmp.eq.s32.totalorder %s6355_s19, 1 }
   0x7   : > { %p129_p3 = scmp.ne.s32.totalorder %s6293_s16, %s6289_s15  ;;  %p130_p4 = scmp.eq.s32.totalorder %s5018_s20, 1 }
   0x8   : > { %s6370_s24 = scalar_select %p111_p1, %s6297_s17, %s113_s22  }
   0x9   : > { %p6372_p5 = por %p124_p2, %p123_p0  ;;  %p6376_p6 = por %p130_p4, %p129_p3 }
   0xa   : > { %p5021_p7 = scmp.ge.s32.totalorder %s6301_s18, 1  ;;  %p165_p8 = scmp.lt.s32.totalorder %s6301_s18, 3 }
   0xc   : > { %p166_p9 = pnand %p5021_p7, %p165_p8 }
   0xe   : > { %169 = sbr.rel (%p166_p9) target bundleno = 2394 (0x95a), region = 36 }
  0x15   : > { %p191_p10 = scmp.lt.s32.totalorder %s6355_s19, 1  ;;  %v10592_v0 = vmov 0.0   ;;  %vm393_vm0 = vcmask 1043456   ;;  %v197_v3 = vld [vmem:[%s10588_s1] sm:$0xff]  ;;  %vm248_vm1 = vcmask 31744   ;;  %v198_v4 = vld [vmem:[%s10588_s1 + $0x8] sm:$0xff] }
  0x16   : > { %462 = vmatprep.mubr.f32.mxu0 %v10592_v0  ;;  %1520 = vmatprep.mubr.f32.mxu1 %v10592_v0  ;;  %v199_v5 = vld [vmem:[%s10588_s1 + $0x10] sm:$0xff]  ;;  %v200_v6 = vld [vmem:[%s10588_s1 + $0x18] sm:$0xff]  ;;  %v201_v7 = vld [vmem:[%s10588_s1 + $0x20] sm:$0xff]  ;;  %s6304_s29 = smov 96   ;;  %s6306_s8 = smov 32  }
  0x17   : > { %s192_s27 = scalar_select %p191_p10, %s6355_s19, 1  ;;  %v202_v8 = vld [vmem:[%s10588_s1 + $0x28] sm:$0xff]  ;;  %v203_v9 = vld [vmem:[%s10588_s1 + $0x30] sm:$0xff]  ;;  %v204_v10 = vld [vmem:[%s10588_s1 + $0x38] sm:$0xff] }
  0x18   : > { %v205_v11 = vld [vmem:[%s10588_s1 + $0x40] sm:$0xff]  ;;  %v206_v12 = vld [vmem:[%s10588_s1 + $0x48] sm:$0xff]  ;;  %v207_v13 = vld [vmem:[%s10588_s1 + $0x50] sm:$0xff]  ;;  %s188_s11 = sand.u32 1, %s6293_s16   ;;  %s5213_s13 = sshll.u32 %s6355_s19, 7 }
  0x19   : > { %s5212_s28 = sshll.u32 %s192_s27, 3  ;;  %v208_v14 = vld [vmem:[%s10588_s1 + $0x58] sm:$0xff]  ;;  %v209_v15 = vld [vmem:[%s10588_s1 + $0x60] sm:$0xff]  ;;  %v210_v16 = vld [vmem:[%s10588_s1 + $0x68] sm:$0xff]  ;;  %s5022_s12 = sshll.u32 %s188_s11, 3 }
  0x1a   : > { %s195_s5 = scalar_lea.vmem %s10587_s0, %s5212_s28  ;;  %v211_v17 = vld [vmem:[%s10588_s1 + $0x70] sm:$0xff]  ;;  %v212_v18 = vld [vmem:[%s10588_s1 + $0x78] sm:$0xff]  ;;  %v213_v19 = vld [vmem:[%s10588_s1 + $0x80] sm:$0xff]  ;;  %s190_s14 = scalar_lea.vmem [#allocation2], %s5022_s12 }
  0x1b   : > { %v196_v1 = vld [vmem:[%s195_s5] sm:$0xff]  ;;  %v214_v20 = vld [vmem:[%s10588_s1 + $0x88] sm:$0xff]  ;;  %v215_v21 = vld [vmem:[%s10588_s1 + $0x90] sm:$0xff]  ;;  %s6305_s5 = smov 64   ;;  %s4959_s20 = sshll.u32 %s190_s14, 4  ;;  %s10547_s20 = int_to_ptr.vmem [resolvable:$true] %s4959_s20 }
  0x1c   : > { %v247_v2 = vcombine.high %v196_v1, %v196_v1  ;;  %v216_v22 = vld [vmem:[%s10588_s1 + $0x98] sm:$0xff]  ;;  %v217_v23 = vld [vmem:[%s10588_s1 + $0xa0] sm:$0xff]  ;;  %v218_v24 = vld [vmem:[%s10588_s1 + $0xa8] sm:$0xff]  ;;  %s10545_s27 = scalar_lea.hbm %s10591_s4, %s5213_s13  ;;  %s4945_s28 = scalar_lea.sflag [#allocation3], %s188_s11 }
  0x1d   : > { %v219_v25 = vld [vmem:[%s10588_s1 + $0xb0] sm:$0xff]  ;;  %v220_v26 = vld [vmem:[%s10588_s1 + $0xb8] sm:$0xff]  ;;  %v221_v27 = vld [vmem:[%s10588_s1 + $0xc0] sm:$0xff]  ;;  %s6308_s19 = smov [#allocation2]  }
  0x1e   : > { %5025 = vmatprep.subr.msk.mxu0 %vm393_vm0, %v247_v2  ;;  %v222_v28 = vld [vmem:[%s10588_s1 + $0xc8] sm:$0xff]  ;;  %v223_v29 = vld [vmem:[%s10588_s1 + $0xd0] sm:$0xff]  ;;  %v224_v30 = vld [vmem:[%s10588_s1 + $0xd8] sm:$0xff]  ;;  %s6243_s30 = sshll.u32 %s6308_s19, 4  ;;  %s6244_s30 = int_to_ptr.vmem [resolvable:$false] %s6243_s30 }
  0x1f   : > { %5026 = vmatpush1.msk.msra.mxu0 %vm393_vm0, %v196_v1  ;;  %p6246_p0 = scmp.lt.s32.totalorder %s10547_s20, %s6244_s30 }
  0x20   : > { %5027 = vmatmul.mubr.msk.f32.vlgmr.msra.gmra.mrb[0].mxu0 %vm248_vm1, %v197_v3 }
  0x21   : > { %468 = vmatprep.mubr.f32.mxu0 %v10592_v0 }
  0x24   : > { %5028 = vmatmul.mubr.msk.f32.gmra.mrb[2].mxu0 %vm248_vm1, %v198_v4 }
  0x25   : > { %474 = vmatprep.mubr.f32.mxu0 %v10592_v0 }
  0x28   : > { %5029 = vmatmul.mubr.msk.f32.gmra.mrb[4].mxu0 %vm248_vm1, %v199_v5 }
  0x29   : > { %480 = vmatprep.mubr.f32.mxu0 %v10592_v0 }
  0x2c   : > { %5030 = vmatmul.mubr.msk.f32.gmra.mrb[6].mxu0 %vm248_vm1, %v200_v6 }
  0x2d   : > { %486 = vmatprep.mubr.f32.mxu0 %v10592_v0 }
  0x30   : > { %5031 = vmatmul.mubr.msk.f32.gmra.mrb[8].mxu0 %vm248_vm1, %v201_v7 }
  0x31   : > { %492 = vmatprep.mubr.f32.mxu0 %v10592_v0 }
  0x34   : > { %5032 = vmatmul.mubr.msk.f32.gmra.mrb[10].mxu0 %vm248_vm1, %v202_v8 }
  0x35   : > { %498 = vmatprep.mubr.f32.mxu0 %v10592_v0 }
  0x38   : > { %5033 = vmatmul.mubr.msk.f32.gmra.mrb[12].mxu0 %vm248_vm1, %v203_v9 }
  0x39   : > { %504 = vmatprep.mubr.f32.mxu0 %v10592_v0 }
  0x3c   : > { %5034 = vmatmul.mubr.msk.f32.gmra.mrb[14].mxu0 %vm248_vm1, %v204_v10 }
  0x3d   : > { %510 = vmatprep.mubr.f32.mxu0 %v10592_v0 }
  0x40   : > { %5035 = vmatmul.mubr.msk.f32.gmra.mrb[16].mxu0 %vm248_vm1, %v205_v11 }
  0x41   : > { %516 = vmatprep.mubr.f32.mxu0 %v10592_v0 }
  0x44   : > { %5036 = vmatmul.mubr.msk.f32.gmra.mrb[18].mxu0 %vm248_vm1, %v206_v12 }
  0x45   : > { %522 = vmatprep.mubr.f32.mxu0 %v10592_v0 }
  0x48   : > { %5037 = vmatmul.mubr.msk.f32.gmra.mrb[20].mxu0 %vm248_vm1, %v207_v13 }
  0x49   : > { %528 = vmatprep.mubr.f32.mxu0 %v10592_v0 }
  0x4c   : > { %5038 = vmatmul.mubr.msk.f32.gmra.mrb[22].mxu0 %vm248_vm1, %v208_v14 }
  0x4d   : > { %534 = vmatprep.mubr.f32.mxu0 %v10592_v0 }
  0x50   : > { %5039 = vmatmul.mubr.msk.f32.gmra.mrb[24].mxu0 %vm248_vm1, %v209_v15 }
  0x51   : > { %540 = vmatprep.mubr.f32.mxu0 %v10592_v0 }
  0x54   : > { %5040 = vmatmul.mubr.msk.f32.gmra.mrb[26].mxu0 %vm248_vm1, %v210_v16 }
  0x55   : > { %546 = vmatprep.mubr.f32.mxu0 %v10592_v0 }
  0x58   : > { %5041 = vmatmul.mubr.msk.f32.gmra.mrb[28].mxu0 %vm248_vm1, %v211_v17 }
  0x59   : > { %552 = vmatprep.mubr.f32.mxu0 %v10592_v0 }
  0x5c   : > { %5042 = vmatmul.mubr.msk.f32.gmra.mrb[30].mxu0 %vm248_vm1, %v212_v18 }
  0x5d   : > { %558 = vmatprep.mubr.f32.mxu0 %v10592_v0 }
  0x60   : > { %5043 = vmatmul.mubr.msk.f32.gmra.mrb[32].mxu0 %vm248_vm1, %v213_v19 }
  0x61   : > { %564 = vmatprep.mubr.f32.mxu0 %v10592_v0 }
  0x64   : > { %5044 = vmatmul.mubr.msk.f32.gmra.mrb[34].mxu0 %vm248_vm1, %v214_v20 }
  0x65   : > { %570 = vmatprep.mubr.f32.mxu0 %v10592_v0 }
  0x68   : > { %5045 = vmatmul.mubr.msk.f32.gmra.mrb[36].mxu0 %vm248_vm1, %v215_v21 }
  0x69   : > { %576 = vmatprep.mubr.f32.mxu0 %v10592_v0 }
  0x6c   : > { %5046 = vmatmul.mubr.msk.f32.gmra.mrb[38].mxu0 %vm248_vm1, %v216_v22 }
  0x6d   : > { %582 = vmatprep.mubr.f32.mxu0 %v10592_v0 }
  0x70   : > { %5047 = vmatmul.mubr.msk.f32.gmra.mrb[40].mxu0 %vm248_vm1, %v217_v23 }
  0x71   : > { %588 = vmatprep.mubr.f32.mxu0 %v10592_v0 }
  0x74   : > { %5048 = vmatmul.mubr.msk.f32.gmra.mrb[42].mxu0 %vm248_vm1, %v218_v24 }
  0x75   : > { %594 = vmatprep.mubr.f32.mxu0 %v10592_v0 }
  0x78   : > { %5049 = vmatmul.mubr.msk.f32.gmra.mrb[44].mxu0 %vm248_vm1, %v219_v25 }
  0x79   : > { %600 = vmatprep.mubr.f32.mxu0 %v10592_v0 }
  0x7c   : > { %5050 = vmatmul.mubr.msk.f32.gmra.mrb[46].mxu0 %vm248_vm1, %v220_v26 }
  0x7d   : > { %606 = vmatprep.mubr.f32.mxu0 %v10592_v0 }
  0x80   : > { %5051 = vmatmul.mubr.msk.f32.gmra.mrb[48].mxu0 %vm248_vm1, %v221_v27 }
  0x81   : > { %612 = vmatprep.mubr.f32.mxu0 %v10592_v0 }
  0x84   : > { %5052 = vmatmul.mubr.msk.f32.gmra.mrb[50].mxu0 %vm248_vm1, %v222_v28 }
  0x85   : > { %618 = vmatprep.mubr.f32.mxu0 %v10592_v0 }
  0x88   : > { %5053 = vmatmul.mubr.msk.f32.gmra.mrb[52].mxu0 %vm248_vm1, %v223_v29 }
  0x89   : > { %624 = vmatprep.mubr.f32.mxu0 %v10592_v0 }
  0x8c   : > { %5054 = vmatmul.mubr.msk.f32.gmra.mrb[54].mxu0 %vm248_vm1, %v224_v30 }
  0x8d   : > { %630 = vmatprep.mubr.f32.mxu0 %v10592_v0 }
  0xf3   : > { %v6529_v31 = vpop.f32.mrb[0].mxu0 }
  0xf4   : > { %v751_v32 = vmul.f32 %v6529_v31, %v6529_v31  ;;  %v6533_v33 = vpop.f32.mrb[1].mxu0 }
  0xf5   : > { %v752_v34 = vmul.f32 %v6533_v33, %v6533_v33 }
  0xf7   : > { %v6537_v35 = vpop.f32.mrb[2].mxu0  ;;  %v6539_v36 = vadd.f32 %v752_v34, %v751_v32 }
  0xf8   : > { %v753_v37 = vmul.f32 %v6537_v35, %v6537_v35  ;;  %v6543_v38 = vpop.f32.mrb[3].mxu0 }
  0xf9   : > { %v754_v39 = vmul.f32 %v6543_v38, %v6543_v38 }
  0xfb   : > { %v6547_v40 = vpop.f32.mrb[4].mxu0  ;;  %v6549_v41 = vadd.f32 %v754_v39, %v753_v37 }
  0xfc   : > { %v755_v42 = vmul.f32 %v6547_v40, %v6547_v40  ;;  %v6553_v43 = vpop.f32.mrb[5].mxu0 }
  0xfd   : > { %v756_v44 = vmul.f32 %v6553_v43, %v6553_v43 }
  0xff   : > { %v6557_v45 = vpop.f32.mrb[6].mxu0  ;;  %v6559_v46 = vadd.f32 %v756_v44, %v755_v42 }
 0x100   : > { %v757_v47 = vmul.f32 %v6557_v45, %v6557_v45  ;;  %v6563_v48 = vpop.f32.mrb[7].mxu0 }
 0x101   : > { %v758_v49 = vmul.f32 %v6563_v48, %v6563_v48 }
 0x103   : > { %v6567_v50 = vpop.f32.mrb[8].mxu0  ;;  %v6569_v51 = vadd.f32 %v758_v49, %v757_v47 }
 0x104   : > { %10869 = vst [vmem:[#allocation5_spill] sm:$0xff] %v6567_v50  ;;  %v759_v52 = vmul.f32 %v6567_v50, %v6567_v50  ;;  %v6573_v53 = vpop.f32.mrb[9].mxu0 }
 0x105   : > { %10870 = vst [vmem:[#allocation6_spill] sm:$0xff] %v6573_v53  ;;  %v760_v54 = vmul.f32 %v6573_v53, %v6573_v53 }
 0x107   : > { %v6577_v55 = vpop.f32.mrb[10].mxu0  ;;  %v6579_v56 = vadd.f32 %v760_v54, %v759_v52 }
 0x108   : > { %10871 = vst [vmem:[#allocation7_spill] sm:$0xff] %v6577_v55  ;;  %v761_v57 = vmul.f32 %v6577_v55, %v6577_v55  ;;  %v6583_v58 = vpop.f32.mrb[11].mxu0 }
 0x109   : > { %10872 = vst [vmem:[#allocation8_spill] sm:$0xff] %v6583_v58  ;;  %v762_v59 = vmul.f32 %v6583_v58, %v6583_v58 }
 0x10b   : > { %v6587_v60 = vpop.f32.mrb[12].mxu0  ;;  %v6589_v61 = vadd.f32 %v762_v59, %v761_v57 }
 0x10c   : > { %10873 = vst [vmem:[#allocation9_spill] sm:$0xff] %v6587_v60  ;;  %v763_v62 = vmul.f32 %v6587_v60, %v6587_v60  ;;  %v6593_v63 = vpop.f32.mrb[13].mxu0 }
 0x10d   : > { %10874 = vst [vmem:[#allocation10_spill] sm:$0xff] %v6593_v63  ;;  %v764_v1 = vmul.f32 %v6593_v63, %v6593_v63 }
 0x10f   : > { %v6597_v2 = vpop.f32.mrb[14].mxu0  ;;  %v6599_v3 = vadd.f32 %v764_v1, %v763_v62 }
 0x110   : > { %10875 = vst [vmem:[#allocation11_spill] sm:$0xff] %v6597_v2  ;;  %v765_v4 = vmul.f32 %v6597_v2, %v6597_v2  ;;  %v6603_v5 = vpop.f32.mrb[15].mxu0 }
 0x111   : > { %10876 = vst [vmem:[#allocation12_spill] sm:$0xff] %v6603_v5  ;;  %v766_v6 = vmul.f32 %v6603_v5, %v6603_v5 }
 0x113   : > { %v6607_v7 = vpop.f32.mrb[16].mxu0  ;;  %v6609_v8 = vadd.f32 %v766_v6, %v765_v4 }
 0x114   : > { %10877 = vst [vmem:[#allocation13_spill] sm:$0xff] %v6607_v7  ;;  %v767_v9 = vmul.f32 %v6607_v7, %v6607_v7  ;;  %v6613_v10 = vpop.f32.mrb[17].mxu0 }
 0x115   : > { %10878 = vst [vmem:[#allocation14_spill] sm:$0xff] %v6613_v10  ;;  %v768_v11 = vmul.f32 %v6613_v10, %v6613_v10 }
 0x117   : > { %v6617_v12 = vpop.f32.mrb[18].mxu0  ;;  %v6619_v13 = vadd.f32 %v768_v11, %v767_v9 }
 0x118   : > { %10879 = vst [vmem:[#allocation15_spill] sm:$0xff] %v6617_v12  ;;  %v769_v14 = vmul.f32 %v6617_v12, %v6617_v12  ;;  %v6623_v15 = vpop.f32.mrb[19].mxu0 }
 0x119   : > { %10880 = vst [vmem:[#allocation16_spill] sm:$0xff] %v6619_v13  ;;  %10881 = vst [vmem:[#allocation17_spill] sm:$0xff] %v6623_v15  ;;  %v770_v16 = vmul.f32 %v6623_v15, %v6623_v15 }
 0x11b   : > { %v6627_v17 = vpop.f32.mrb[20].mxu0  ;;  %v6629_v18 = vadd.f32 %v770_v16, %v769_v14 }
 0x11c   : > { %10882 = vst [vmem:[#allocation18_spill] sm:$0xff] %v6627_v17  ;;  %v771_v19 = vmul.f32 %v6627_v17, %v6627_v17  ;;  %v6633_v20 = vpop.f32.mrb[21].mxu0 }
 0x11d   : > { %10883 = vst [vmem:[#allocation19_spill] sm:$0xff] %v6633_v20  ;;  %v772_v21 = vmul.f32 %v6633_v20, %v6633_v20 }
 0x11f   : > { %v6637_v22 = vpop.f32.mrb[22].mxu0  ;;  %v6639_v23 = vadd.f32 %v772_v21, %v771_v19 }
 0x120   : > { %10884 = vst [vmem:[#allocation20_spill] sm:$0xff] %v6637_v22  ;;  %v773_v24 = vmul.f32 %v6637_v22, %v6637_v22  ;;  %v6643_v25 = vpop.f32.mrb[23].mxu0 }
 0x121   : > { %10885 = vst [vmem:[#allocation21_spill] sm:$0xff] %v6639_v23  ;;  %10886 = vst [vmem:[#allocation22_spill] sm:$0xff] %v6643_v25  ;;  %v774_v26 = vmul.f32 %v6643_v25, %v6643_v25 }
 0x123   : > { %v6647_v27 = vpop.f32.mrb[24].mxu0  ;;  %v6649_v28 = vadd.f32 %v774_v26, %v773_v24 }
 0x124   : > { %10887 = vst [vmem:[#allocation23_spill] sm:$0xff] %v6647_v27  ;;  %v775_v29 = vmul.f32 %v6647_v27, %v6647_v27  ;;  %v6653_v30 = vpop.f32.mrb[25].mxu0 }
 0x125   : > { %10888 = vst [vmem:[#allocation24_spill] sm:$0xff] %v6649_v28  ;;  %10889 = vst [vmem:[#allocation25_spill] sm:$0xff] %v6653_v30  ;;  %v776_v32 = vmul.f32 %v6653_v30, %v6653_v30 }
 0x127   : > { %v6657_v34 = vadd.f32 %v776_v32, %v775_v29  ;;  %v6659_v37 = vpop.f32.mrb[26].mxu0 }
 0x128   : > { %10891 = vst [vmem:[#allocation27_spill] sm:$0xff] %v6659_v37  ;;  %v777_v39 = vmul.f32 %v6659_v37, %v6659_v37  ;;  %v6663_v42 = vpop.f32.mrb[27].mxu0 }
 0x129   : > { %10890 = vst [vmem:[#allocation26_spill] sm:$0xff] %v6657_v34  ;;  %10892 = vst [vmem:[#allocation28_spill] sm:$0xff] %v6663_v42  ;;  %v778_v44 = vmul.f32 %v6663_v42, %v6663_v42 }
 0x12b   : > { %v6667_v47 = vadd.f32 %v778_v44, %v777_v39  ;;  %v6669_v49 = vpop.f32.mrb[28].mxu0 }
 0x12c   : > { %10894 = vst [vmem:[#allocation30_spill] sm:$0xff] %v6669_v49  ;;  %v779_v52 = vmul.f32 %v6669_v49, %v6669_v49  ;;  %v6673_v54 = vpop.f32.mrb[29].mxu0 }
 0x12d   : > { %10893 = vst [vmem:[#allocation29_spill] sm:$0xff] %v6667_v47  ;;  %10895 = vst [vmem:[#allocation31_spill] sm:$0xff] %v6673_v54  ;;  %v780_v57 = vmul.f32 %v6673_v54, %v6673_v54 }
 0x12f   : > { %v6677_v59 = vadd.f32 %v780_v57, %v779_v52  ;;  %v6679_v62 = vpop.f32.mrb[30].mxu0 }
 0x130   : > { %10897 = vst [vmem:[#allocation33_spill] sm:$0xff] %v6679_v62  ;;  %v781_v1 = vmul.f32 %v6679_v62, %v6679_v62  ;;  %v6683_v4 = vpop.f32.mrb[31].mxu0 }
 0x131   : > { %10896 = vst [vmem:[#allocation32_spill] sm:$0xff] %v6677_v59  ;;  %10898 = vst [vmem:[#allocation34_spill] sm:$0xff] %v6683_v4  ;;  %v782_v6 = vmul.f32 %v6683_v4, %v6683_v4 }
 0x133   : > { %v6687_v9 = vadd.f32 %v782_v6, %v781_v1  ;;  %v6689_v11 = vpop.f32.mrb[32].mxu0 }
 0x134   : > { %v943_v14 = vmul.f32 %v6689_v11, %v6689_v11  ;;  %v6693_v16 = vpop.f32.mrb[33].mxu0 }
 0x135   : > { %10899 = vst [vmem:[#allocation35_spill] sm:$0xff] %v6687_v9  ;;  %v944_v19 = vmul.f32 %v6693_v16, %v6693_v16 }
 0x137   : > { %v6697_v21 = vpop.f32.mrb[34].mxu0  ;;  %v975_v24 = vadd.f32 %v944_v19, %v943_v14 }
 0x138   : > { %v945_v26 = vmul.f32 %v6697_v21, %v6697_v21  ;;  %v6701_v29 = vpop.f32.mrb[35].mxu0 }
 0x139   : > { %v946_v32 = vmul.f32 %v6701_v29, %v6701_v29  ;;  %976 = vadd.xlane.f32.xlu0 %v975_v24 }
 0x13b   : > { %v6705_v39 = vpop.f32.mrb[36].mxu0  ;;  %v978_v44 = vadd.f32 %v946_v32, %v945_v26 }
 0x13c   : > { %v947_v52 = vmul.f32 %v6705_v39, %v6705_v39  ;;  %v6709_v57 = vpop.f32.mrb[37].mxu0 }
 0x13d   : > { %v948_v1 = vmul.f32 %v6709_v57, %v6709_v57  ;;  %979 = vadd.xlane.f32.xlu0 %v978_v44 }
 0x13f   : > { %v6713_v6 = vpop.f32.mrb[38].mxu0  ;;  %v981_v14 = vadd.f32 %v948_v1, %v947_v52 }
 0x140   : > { %v949_v19 = vmul.f32 %v6713_v6, %v6713_v6  ;;  %v6717_v0 = vpop.f32.mrb[39].mxu0 }
 0x141   : > { %v950_v24 = vmul.f32 %v6717_v0, %v6717_v0  ;;  %784 = vadd.xlane.f32.xlu0 %v6539_v36  ;;  %982 = vadd.xlane.f32.xlu1 %v981_v14 }
 0x143   : > { %v984_v26 = vadd.f32 %v950_v24, %v949_v19  ;;  %v6722_v32 = vpop.f32.mrb[40].mxu0 }
 0x144   : > { %v6724_v62 = vpop.f32.mrb[41].mxu0 }
 0x145   : > { %790 = vadd.xlane.f32.xlu0 %v6559_v46  ;;  %985 = vadd.xlane.f32.xlu1 %v984_v26  ;;  %v952_v37 = vmul.f32 %v6724_v62, %v6724_v62 }
 0x147   : > { %v6727_v44 = vpop.f32.mrb[42].mxu0 }
 0x148   : > { %v953_v52 = vmul.f32 %v6727_v44, %v6727_v44  ;;  %v6731_v1 = vpop.f32.mrb[43].mxu0 }
 0x149   : > { %787 = vadd.xlane.f32.xlu1 %v6549_v41  ;;  %v954_v36 = vmul.f32 %v6731_v1, %v6731_v1 }
 0x14b   : > { %v6736_v14 = vpop.f32.mrb[44].mxu0  ;;  %v990_v19 = vadd.f32 %v954_v36, %v953_v52  ;;  %v225_v52 = vld [vmem:[%s10588_s1 + $0xe0] sm:$0xff]  ;;  %v226_v36 = vld [vmem:[%s10588_s1 + $0xe8] sm:$0xff] }
 0x14c   : > { %v6738_v24 = vpop.f32.mrb[45].mxu0  ;;  %5055 = vmatmul.mubr.msk.f32.gmra.mrb[56].mxu0 %vm248_vm1, %v225_v52  ;;  %v232_v52 = vld [vmem:[%s10588_s1 + $0x118] sm:$0xff]  ;;  %v955_v47 = vmul.f32 %v6736_v14, %v6736_v14 }
 0x14d   : > { %793 = vadd.xlane.f32.xlu1 %v6569_v51  ;;  %v10900_v51 = vmov 0.0   ;;  %v956_v22 = vmul.f32 %v6738_v24, %v6738_v24 }
 0x14e   : > { %636 = vmatprep.mubr.f32.mxu0 %v10900_v51 }
 0x14f   : > { %v6741_v46 = vpop.f32.mrb[46].mxu0  ;;  %v6828_v10 = vadd.f32 %v956_v22, %v955_v47 }
 0x150   : > { %v957_v26 = vmul.f32 %v6741_v46, %v6741_v46  ;;  %v6745_v49 = vpop.f32.mrb[47].mxu0  ;;  %5056 = vmatmul.mubr.msk.f32.gmra.mrb[58].mxu0 %vm248_vm1, %v226_v36 }
 0x151   : > { %v958_v41 = vmul.f32 %v6745_v49, %v6745_v49  ;;  %991 = vadd.xlane.f32.xlu1 %v990_v19  ;;  %642 = vmatprep.mubr.f32.mxu0 %v10900_v51  ;;  %v229_v19 = vld [vmem:[%s10588_s1 + $0x100] sm:$0xff] }
 0x153   : > { %v996_v4 = vadd.f32 %v958_v41, %v957_v26  ;;  %v230_v26 = vld [vmem:[%s10588_s1 + $0x108] sm:$0xff]  ;;  %v231_v41 = vld [vmem:[%s10588_s1 + $0x110] sm:$0xff]  ;;  %v6790_v36 = vpop.f32.mrb[48].mxu0 }
 0x154   : > { %10901 = vst [vmem:[#allocation36_spill] sm:$0xff] %v6790_v36 }
 0x155   : > { %997 = vadd.xlane.f32.xlu1 %v996_v4  ;;  %v228_v4 = vld [vmem:[%s10588_s1 + $0xf8] sm:$0xff] }
 0x159   : > { %799 = vadd.xlane.f32.xlu1 %v6589_v61  ;;  %v227_v61 = vld [vmem:[%s10588_s1 + $0xf0] sm:$0xff] }
 0x15a   : > { %5057 = vmatmul.mubr.msk.f32.gmra.mrb[60].mxu0 %vm248_vm1, %v227_v61  ;;  %v6792_v61 = vpop.f32.mrb[49].mxu0 }
 0x15b   : > { %648 = vmatprep.mubr.f32.mxu0 %v10900_v51  ;;  %10902 = vst [vmem:[#allocation37_spill] sm:$0xff] %v6792_v61 }
 0x15e   : > { %5058 = vmatmul.mubr.msk.f32.gmra.mrb[62].mxu0 %vm248_vm1, %v228_v4  ;;  %v6794_v4 = vpop.f32.mrb[50].mxu0 }
 0x15f   : > { %654 = vmatprep.mubr.f32.mxu0 %v10900_v51 }
 0x162   : > { %5059 = vmatmul.mubr.msk.f32.gmra.mrb[64].mxu0 %vm248_vm1, %v229_v19  ;;  %v6796_v19 = vpop.f32.mrb[51].mxu0 }
 0x163   : > { %660 = vmatprep.mubr.f32.mxu0 %v10900_v51  ;;  %v6806_v27 = vpop.f32.mrb[52].mxu0 }
 0x164   : > { %10903 = vst [vmem:[#allocation38_spill] sm:$0xff] %v6806_v27  ;;  %v6810_v9 = vpop.f32.mrb[53].mxu0 }
 0x165   : > { %10904 = vst [vmem:[#allocation39_spill] sm:$0xff] %v6810_v9  ;;  %v6812_v59 = vpop.f32.mrb[54].mxu0 }
 0x166   : > { %5060 = vmatmul.mubr.msk.f32.gmra.mrb[66].mxu0 %vm248_vm1, %v230_v26  ;;  %v961_v26 = vmul.f32 %v6794_v4, %v6794_v4  ;;  %v6816_v34 = vpop.f32.mrb[55].mxu0  ;;  %v965_v17 = vmul.f32 %v6812_v59, %v6812_v59 }
 0x167   : > { %666 = vmatprep.mubr.f32.mxu0 %v10900_v51 }
 0x16a   : > { %5061 = vmatmul.mubr.msk.f32.gmra.mrb[68].mxu0 %vm248_vm1, %v231_v41  ;;  %v962_v41 = vmul.f32 %v6796_v19, %v6796_v19 }
 0x16b   : > { %672 = vmatprep.mubr.f32.mxu0 %v10900_v51 }
 0x16c   : > { %v6808_v42 = vadd.f32 %v962_v41, %v961_v26  ;;  %v966_v26 = vmul.f32 %v6816_v34, %v6816_v34 }
 0x16e   : > { %5062 = vmatmul.mubr.msk.f32.gmra.mrb[70].mxu0 %vm248_vm1, %v232_v52  ;;  %v951_v52 = vmul.f32 %v6722_v32, %v6722_v32  ;;  %v6826_v7 = vadd.f32 %v966_v26, %v965_v17 }
 0x16f   : > { %678 = vmatprep.mubr.f32.mxu0 %v10900_v51 }
 0x170   : > { %v6824_v41 = vadd.f32 %v952_v37, %v951_v52 }
 0x1c6   : > { %v977_v54 = vpop.xlane.xlu0 %976 }
 0x1c7   : > { %5581 = vrsqrt.f32 %v977_v54  ;;  %vm1025_vm2 = vcmp.eq.f32.partialorder %v977_v54, inf  ;;  %v1028_v28 = vand.u32 2147483648, %v977_v54  ;;  %vm1027_vm3 = vcmp.eq.f32.partialorder %v977_v54, 0.0 }
 0x1ca   : > { %v980_v30 = vpop.xlane.xlu0 %979 }
 0x1cb   : > { %5583 = vrsqrt.f32 %v980_v30  ;;  %vm1032_vm4 = vcmp.eq.f32.partialorder %v980_v30, inf  ;;  %v1035_v17 = vand.u32 2147483648, %v980_v30  ;;  %vm1034_vm5 = vcmp.eq.f32.partialorder %v980_v30, 0.0 }
 0x1ce   : > { %v785_v20 = vpop.xlane.xlu0 %784  ;;  %v983_v25 = vpop.xlane.xlu1 %982 }
 0x1cf   : > { %5585 = vrsqrt.f32 %v785_v20  ;;  %vm833_vm6 = vcmp.eq.f32.partialorder %v785_v20, inf  ;;  %vm1039_vm7 = vcmp.eq.f32.partialorder %v983_v25, inf  ;;  %vm835_vm8 = vcmp.eq.f32.partialorder %v785_v20, 0.0 }
 0x1d0   : > { %5587 = vrsqrt.f32 %v983_v25  ;;  %vm1041_vm9 = vcmp.eq.f32.partialorder %v983_v25, 0.0 }
 0x1d1   : > { %v5582_v12 = vpop.eup %5581 }
 0x1d2   : > { %v1024_v15 = vmul.f32 %v5582_v12, %v977_v54  ;;  %v791_v23 = vpop.xlane.xlu0 %790  ;;  %v986_v13 = vpop.xlane.xlu1 %985 }
 0x1d3   : > { %5589 = vrsqrt.f32 %v791_v23  ;;  %vm847_vm10 = vcmp.eq.f32.partialorder %v791_v23, inf  ;;  %vm849_vm11 = vcmp.eq.f32.partialorder %v791_v23, 0.0  ;;  %vm1046_vm12 = vcmp.eq.f32.partialorder %v986_v13, inf }
 0x1d4   : > { %v1026_v2 = vsel %vm1025_vm2, %v977_v54, %v1024_v15  ;;  %5591 = vrsqrt.f32 %v986_v13  ;;  %vm1048_vm13 = vcmp.eq.f32.partialorder %v986_v13, 0.0 }
 0x1d5   : > { %v5584_v37 = vpop.eup %5583  ;;  %v1029_v52 = vsel %vm1027_vm3, %v1028_v28, %v1026_v2  ;;  %v836_v2 = vand.u32 2147483648, %v785_v20 }
 0x1d6   : > { %v1031_v60 = vmul.f32 %v5584_v37, %v980_v30  ;;  %v6830_v63 = vpop.xlane.xlu1 %787  ;;  %v1215_v5 = vmax.f32 %v1029_v52, 1e-12  ;;  %v1042_v37 = vand.u32 2147483648, %v983_v25 }
 0x1d7   : > { %5593 = vrsqrt.f32 %v6830_v63  ;;  %vm840_vm14 = vcmp.eq.f32.partialorder %v6830_v63, inf  ;;  %vm842_vm15 = vcmp.eq.f32.partialorder %v6830_v63, 0.0 }
 0x1d8   : > { %v1033_v22 = vsel %vm1032_vm4, %v980_v30, %v1031_v60  ;;  %5595 = vrcp.f32 %v1215_v5 }
 0x1d9   : > { %v5586_v12 = vpop.eup %5585  ;;  %v1036_v47 = vsel %vm1034_vm5, %v1035_v17, %v1033_v22 }
 0x1da   : > { %v5588_v26 = vpop.eup %5587  ;;  %v1216_v55 = vmax.f32 %v1036_v47, 1e-12  ;;  %v832_v15 = vmul.f32 %v5586_v12, %v785_v20  ;;  %v6833_v54 = vpop.xlane.xlu1 %793 }
 0x1db   : > { %v1038_v28 = vmul.f32 %v5588_v26, %v983_v25  ;;  %5597 = vrsqrt.f32 %v6833_v54  ;;  %v850_v26 = vand.u32 2147483648, %v791_v23  ;;  %vm854_vm0 = vcmp.eq.f32.partialorder %v6833_v54, inf }
 0x1dc   : > { %5599 = vrcp.f32 %v1216_v55  ;;  %v834_v52 = vsel %vm833_vm6, %v785_v20, %v832_v15  ;;  %v1049_v20 = vand.u32 2147483648, %v986_v13  ;;  %vm856_vm2 = vcmp.eq.f32.partialorder %v6833_v54, 0.0 }
 0x1dd   : > { %v5590_v60 = vpop.eup %5589  ;;  %v1040_v30 = vsel %vm1039_vm7, %v983_v25, %v1038_v28  ;;  %v837_v5 = vsel %vm835_vm8, %v836_v2, %v834_v52  ;;  %vm1359_vm7 = vcmask 261120  }
 0x1de   : > { %v5592_v17 = vpop.eup %5591  ;;  %v1043_v22 = vsel %vm1041_vm9, %v1042_v37, %v1040_v30  ;;  %v846_v47 = vmul.f32 %v5590_v60, %v791_v23  ;;  %v6836_v12 = vpop.xlane.xlu1 %991  ;;  %v1135_v50 = vmax.f32 %v837_v5, 1e-12  ;;  %v843_v5 = vand.u32 2147483648, %v6830_v63 }
 0x1df   : > { %v1217_v53 = vmax.f32 %v1043_v22, 1e-12  ;;  %v1045_v58 = vmul.f32 %v5592_v17, %v986_v13  ;;  %5601 = vrsqrt.f32 %v6836_v12  ;;  %vm1060_vm3 = vcmp.eq.f32.partialorder %v6836_v12, inf }
 0x1e0   : > { %v848_v55 = vsel %vm847_vm10, %v791_v23, %v846_v47  ;;  %vm1062_vm4 = vcmp.eq.f32.partialorder %v6836_v12, 0.0 }
 0x1e1   : > { %v5594_v15 = vpop.eup %5593  ;;  %5603 = vrcp.f32 %v1217_v53  ;;  %v1047_v25 = vsel %vm1046_vm12, %v986_v13, %v1045_v58  ;;  %v851_v2 = vsel %vm849_vm11, %v850_v26, %v848_v55 }
 0x1e2   : > { %v5596_v28 = vpop.eup %5595  ;;  %v1050_v37 = vsel %vm1048_vm13, %v1049_v20, %v1047_v25  ;;  %v839_v52 = vmul.f32 %v5594_v15, %v6830_v63  ;;  %v998_v60 = vpop.xlane.xlu1 %997  ;;  %5605 = vrcp.f32 %v1135_v50  ;;  %v1137_v23 = vmax.f32 %v851_v2, 1e-12 }
 0x1e3   : > { %v1218_v30 = vmax.f32 %v1050_v37, 1e-12  ;;  %5607 = vrsqrt.f32 %v998_v60  ;;  %v1263_v17 = vmul.f32 %v5596_v28, %v6689_v11  ;;  %v1264_v53 = vmul.f32 %v5596_v28, %v6693_v16 }
 0x1e4   : > { %v841_v58 = vsel %vm840_vm14, %v6830_v63, %v839_v52  ;;  %v857_v11 = vand.u32 2147483648, %v6833_v54  ;;  %v1063_v15 = vand.u32 2147483648, %v6836_v12  ;;  %vm1074_vm5 = vcmp.eq.f32.partialorder %v998_v60, inf }
 0x1e5   : > { %v5598_v13 = vpop.eup %5597  ;;  %5609 = vrcp.f32 %v1218_v30  ;;  %v844_v22 = vsel %vm842_vm15, %v843_v5, %v841_v58  ;;  %1295 = vxpose.xlu0.b32.start [1/4] (short) %v1263_v17, 128  ;;  %1327 = vxpose.xlu1.b32.start [1/4] (short) %v1264_v53, 128  ;;  %vm1076_vm6 = vcmp.eq.f32.partialorder %v998_v60, 0.0 }
 0x1e6   : > { %v5600_v47 = vpop.eup %5599  ;;  %v853_v26 = vmul.f32 %v5598_v13, %v6833_v54  ;;  %v1136_v50 = vmax.f32 %v844_v22, 1e-12  ;;  %5611 = vrcp.f32 %v1137_v23  ;;  %v1077_v23 = vand.u32 2147483648, %v998_v60 }
 0x1e7   : > { %v1265_v63 = vmul.f32 %v5600_v47, %v6697_v21  ;;  %v1266_v55 = vmul.f32 %v5600_v47, %v6701_v29 }
 0x1e8   : > { %v855_v16 = vsel %vm854_vm0, %v6833_v54, %v853_v26  ;;  %5613 = vrcp.f32 %v1136_v50 }
 0x1e9   : > { %v5602_v20 = vpop.eup %5601  ;;  %v858_v25 = vsel %vm856_vm2, %v857_v11, %v855_v16  ;;  %1296 = vxpose.xlu0.b32.cont [2/4] (short) %v1265_v63, 128  ;;  %1328 = vxpose.xlu1.b32.cont [2/4] (short) %v1266_v55, 128 }
 0x1ea   : > { %v1059_v2 = vmul.f32 %v5602_v20, %v6836_v12  ;;  %v1138_v28 = vmax.f32 %v858_v25, 1e-12 }
 0x1eb   : > { %v5604_v37 = vpop.eup %5603 }
 0x1ec   : > { %v5606_v54 = vpop.eup %5605  ;;  %v1061_v21 = vsel %vm1060_vm3, %v6836_v12, %v1059_v2  ;;  %v1267_v29 = vmul.f32 %v5604_v37, %v6705_v39  ;;  %v1268_v52 = vmul.f32 %v5604_v37, %v6709_v57  ;;  %5615 = vrcp.f32 %v1138_v28 }
 0x1ed   : > { %v5608_v30 = vpop.eup %5607  ;;  %v1064_v5 = vsel %vm1062_vm4, %v1063_v15, %v1061_v21  ;;  %v1152_v13 = vmul.f32 10.0, %v5606_v54 }
 0x1ee   : > { %v1220_v17 = vmax.f32 %v1064_v5, 1e-12  ;;  %v1073_v53 = vmul.f32 %v5608_v30, %v998_v60  ;;  %1297 = vxpose.xlu0.b32.cont [3/4] (short) %v1267_v29, 128  ;;  %1329 = vxpose.xlu1.b32.cont [3/4] (short) %v1268_v52, 128 }
 0x1ef   : > { %v5610_v58 = vpop.eup %5609  ;;  %v1184_v16 = vmul.f32 %v1152_v13, %v6533_v33  ;;  %v1183_v55 = vmul.f32 %v1152_v13, %v6529_v31 }
 0x1f0   : > { %5617 = vrcp.f32 %v1220_v17  ;;  %v1075_v22 = vsel %vm1074_vm5, %v998_v60, %v1073_v53  ;;  %v1269_v12 = vmul.f32 %v5610_v58, %v6713_v6  ;;  %v1270_v39 = vmul.f32 %v5610_v58, %v6717_v0  ;;  %v5612_v47 = vpop.eup %5611 }
 0x1f1   : > { %v1078_v57 = vsel %vm1076_vm6, %v1077_v23, %v1075_v22  ;;  %v1156_v20 = vmul.f32 10.0, %v5612_v47 }
 0x1f2   : > { %v5614_v26 = vpop.eup %5613  ;;  %v1222_v50 = vmax.f32 %v1078_v57, 1e-12  ;;  %1298 = vxpose.xlu0.b32.end [4/4] (short) %v1269_v12, 128  ;;  %1330 = vxpose.xlu1.b32.end [4/4] (short) %v1270_v39, 128 }
 0x1f3   : > { %v1154_v11 = vmul.f32 10.0, %v5614_v26  ;;  %v1188_v2 = vmul.f32 %v1156_v20, %v6553_v43  ;;  %v1187_v37 = vmul.f32 %v1156_v20, %v6547_v40 }
 0x1f4   : > { %5619 = vrcp.f32 %v1222_v50 }
 0x1f5   : > { %v1186_v63 = vmul.f32 %v1154_v11, %v6543_v38  ;;  %v1185_v60 = vmul.f32 %v1154_v11, %v6537_v35 }
 0x1f6   : > { %v5616_v6 = vpop.eup %5615 }
 0x1f7   : > { %v5214_v15 = vpack.c.bf16 %v1186_v63, %v1184_v16  ;;  %v5216_v0 = vpack.c.bf16 %v1185_v60, %v1183_v55  ;;  %v1158_v25 = vmul.f32 10.0, %v5616_v6 }
 0x1f9   : > { %5215 = vmatprep.subr.bf16.mxu1 %v5214_v15  ;;  %v1190_v28 = vmul.f32 %v1158_v25, %v6563_v48  ;;  %v1189_v33 = vmul.f32 %v1158_v25, %v6557_v45 }
 0x1fa   : > { %v5618_v54 = vpop.eup %5617  ;;  %5217 = vmatpush1.bf16.msra.mxu1 %v5216_v0 }
 0x1fb   : > { %v5218_v38 = vpack.c.bf16 %v1190_v28, %v1188_v2  ;;  %v5220_v31 = vpack.c.bf16 %v1189_v33, %v1187_v37  ;;  %v6871_v35 = vmul.f32 %v5618_v54, %v6727_v44  ;;  %v6874_v21 = vmul.f32 %v5618_v54, %v6731_v1 }
 0x1fd   : > { %5219 = vmatprep.subr.bf16.mxu1 %v5218_v38 }
 0x1fe   : > { %v5620_v29 = vpop.eup %5619  ;;  %5221 = vmatpush1.bf16.msra.mxu1 %v5220_v31 }
 0x1ff   : > { %v6877_v43 = vmul.f32 %v5620_v29, %v6741_v46  ;;  %v6880_v40 = vmul.f32 %v5620_v29, %v6745_v49 }
 0x249   : > { %805 = vadd.xlane.f32.xlu1 %v6609_v8  ;;  %v6896_v8 = vpop.xlane.xlu1 %799 }
 0x24a   : > { %5621 = vrsqrt.f32 %v6896_v8  ;;  %vm868_vm8 = vcmp.eq.f32.partialorder %v6896_v8, inf  ;;  %vm870_vm9 = vcmp.eq.f32.partialorder %v6896_v8, 0.0 }
 0x24d   : > { %1003 = vadd.xlane.f32.xlu1 %v6808_v42 }
 0x24f   : > { %988 = vadd.xlane.f32.xlu0 %v6824_v41 }
 0x251   : > { %1009 = vadd.xlane.f32.xlu1 %v6826_v7 }
 0x253   : > { %994 = vadd.xlane.f32.xlu0 %v6828_v10 }
 0x255   : > { %811 = vadd.xlane.f32.xlu1 %v6629_v18 }
 0x257   : > { %796 = vadd.xlane.f32.xlu0 %v6579_v56 }
 0x25b   : > { %802 = vadd.xlane.f32.xlu0 %v6599_v3  ;;  %v6899_v3 = vpop.f32.mrb[56].mxu0 }
 0x25c   : > { %10905 = vst [vmem:[#allocation40_spill] sm:$0xff] %v6899_v3  ;;  %v6902_v10 = vpop.f32.mrb[57].mxu0  ;;  %v967_v44 = vmul.f32 %v6899_v3, %v6899_v3 }
 0x25d   : > { %10906 = vst [vmem:[#allocation41_spill] sm:$0xff] %v6902_v10  ;;  %v6904_v18 = vpop.f32.mrb[58].mxu0  ;;  %v968_v1 = vmul.f32 %v6902_v10, %v6902_v10 }
 0x25e   : > { %10907 = vst [vmem:[#allocation42_spill] sm:$0xff] %v6904_v18  ;;  %v969_v46 = vmul.f32 %v6904_v18, %v6904_v18  ;;  %v6915_v41 = vpop.f32.mrb[59].mxu0 }
 0x25f   : > { %10908 = vst [vmem:[#allocation43_spill] sm:$0xff] %v6915_v41  ;;  %v6918_v52 = vadd.f32 %v968_v1, %v967_v44  ;;  %v970_v30 = vmul.f32 %v6915_v41, %v6915_v41  ;;  %v6922_v5 = vpop.f32.mrb[60].mxu0 }
 0x260   : > { %10910 = vst [vmem:[#allocation45_spill] sm:$0xff] %v6922_v5  ;;  %v971_v23 = vmul.f32 %v6922_v5, %v6922_v5  ;;  %v6926_v17 = vpop.f32.mrb[61].mxu0 }
 0x261   : > { %10909 = vst [vmem:[#allocation44_spill] sm:$0xff] %v6918_v52  ;;  %10911 = vst [vmem:[#allocation46_spill] sm:$0xff] %v6926_v17  ;;  %v6928_v58 = vadd.f32 %v970_v30, %v969_v46  ;;  %v972_v13 = vmul.f32 %v6926_v17, %v6926_v17  ;;  %v6933_v22 = vpop.f32.mrb[62].mxu0 }
 0x262   : > { %10913 = vst [vmem:[#allocation48_spill] sm:$0xff] %v6933_v22  ;;  %v973_v47 = vmul.f32 %v6933_v22, %v6933_v22  ;;  %v6940_v57 = vpop.f32.mrb[63].mxu0 }
 0x263   : > { %10912 = vst [vmem:[#allocation47_spill] sm:$0xff] %v6928_v58  ;;  %v6936_v39 = vadd.f32 %v972_v13, %v971_v23  ;;  %10915 = vst [vmem:[#allocation50_spill] sm:$0xff] %v6940_v57  ;;  %v974_v26 = vmul.f32 %v6940_v57, %v6940_v57  ;;  %v656_v50 = vpop.f32.mrb[64].mxu0  ;;  %v959_v13 = vmul.f32 %v6790_v36, %v6790_v36 }
 0x264   : > { %v658_v63 = vpop.f32.mrb[65].mxu0 }
 0x265   : > { %10914 = vst [vmem:[#allocation49_spill] sm:$0xff] %v6936_v39  ;;  %v6945_v16 = vadd.f32 %v974_v26, %v973_v47  ;;  %v662_v55 = vpop.f32.mrb[66].mxu0  ;;  %v960_v47 = vmul.f32 %v6792_v61, %v6792_v61 }
 0x266   : > { %v1311_v45 = vpop.trf.xlu0  ;;  %v6906_v49 = vpop.trf.xlu1  ;;  %v5224_v60 = vpack.c.bf16 %v662_v55, %v656_v50 }
 0x267   : > { %5075 = vmatmul.mubr.msk.f32.vlgmr.msra.gmra.mrb[0].mxu1 %vm1359_vm7, %v1311_v45  ;;  %10916 = vst [vmem:[#allocation51_spill] sm:$0xff] %v6945_v16  ;;  %v664_v20 = vpop.f32.mrb[67].mxu0  ;;  %v6977_v50 = vadd.f32 %v960_v47, %v959_v13 }
 0x268   : > { %1526 = vmatprep.mubr.f32.mxu1 %v10900_v51  ;;  %v5222_v0 = vpack.c.bf16 %v664_v20, %v658_v63  ;;  %v668_v25 = vpop.f32.mrb[68].mxu0 }
 0x269   : > { %v670_v2 = vpop.f32.mrb[69].mxu0 }
 0x26a   : > { %v1312_v48 = vpop.trf.xlu0  ;;  %v1344_v12 = vpop.trf.xlu1  ;;  %5223 = vmatprep.subr.bf16.mxu1 %v5222_v0 }
 0x26b   : > { %5076 = vmatmul.mubr.msk.f32.gmra.mrb[2].mxu1 %vm1359_vm7, %v1312_v48  ;;  %v674_v28 = vpop.f32.mrb[70].mxu0 }
 0x26c   : > { %1532 = vmatprep.mubr.f32.mxu1 %v10900_v51  ;;  %5225 = vmatpush1.bf16.msra.mxu1 %v5224_v60  ;;  %v5228_v33 = vpack.c.bf16 %v674_v28, %v668_v25  ;;  %v676_v54 = vpop.f32.mrb[71].mxu0  ;;  %v5622_v25 = vpop.eup %5621 }
 0x26d   : > { %v5226_v31 = vpack.c.bf16 %v676_v54, %v670_v2 }
 0x26e   : > { %v1313_v7 = vpop.trf.xlu0  ;;  %v1345_v15 = vpop.trf.xlu1 }
 0x26f   : > { %5077 = vmatmul.mubr.msk.f32.gmra.mrb[4].mxu1 %vm1359_vm7, %v1313_v7  ;;  %5227 = vmatprep.subr.bf16.mxu1 %v5226_v31  ;;  %v871_v31 = vand.u32 2147483648, %v6896_v8 }
 0x270   : > { %1538 = vmatprep.mubr.f32.mxu1 %v10900_v51  ;;  %5229 = vmatpush1.bf16.msra.mxu1 %v5228_v33 }
 0x272   : > { %v1314_v56 = vpop.trf.xlu0  ;;  %v1346_v38 = vpop.trf.xlu1 }
 0x273   : > { %5078 = vmatmul.mubr.msk.f32.gmra.mrb[6].mxu1 %vm1359_vm7, %v1314_v56 }
 0x274   : > { %1544 = vmatprep.mubr.f32.mxu1 %v10900_v51 }
 0x276   : > { %v1315_v42 = vpop.trf.xlu0  ;;  %v1347_v48 = vpop.trf.xlu1 }
 0x277   : > { %5079 = vmatmul.mubr.msk.f32.gmra.mrb[8].mxu1 %vm1359_vm7, %v1315_v42 }
 0x278   : > { %1550 = vmatprep.mubr.f32.mxu1 %v10900_v51 }
 0x27a   : > { %v1316_v53 = vpop.trf.xlu0  ;;  %v1348_v56 = vpop.trf.xlu1 }
 0x27b   : > { %5080 = vmatmul.mubr.msk.f32.gmra.mrb[10].mxu1 %vm1359_vm7, %v1316_v53 }
 0x27c   : > { %1556 = vmatprep.mubr.f32.mxu1 %v10900_v51 }
 0x27e   : > { %v1317_v11 = vpop.trf.xlu0  ;;  %v1349_v1 = vpop.trf.xlu1 }
 0x27f   : > { %5081 = vmatmul.mubr.msk.f32.gmra.mrb[12].mxu1 %vm1359_vm7, %v1317_v11  ;;  %v964_v11 = vmul.f32 %v6810_v9, %v6810_v9 }
 0x280   : > { %1562 = vmatprep.mubr.f32.mxu1 %v10900_v51 }
 0x282   : > { %v1318_v6 = vpop.trf.xlu0  ;;  %v1350_v30 = vpop.trf.xlu1 }
 0x283   : > { %5082 = vmatmul.mubr.msk.f32.gmra.mrb[14].mxu1 %vm1359_vm7, %v1318_v6 }
 0x284   : > { %1568 = vmatprep.mubr.f32.mxu1 %v10900_v51 }
 0x286   : > { %v1319_v37 = vpop.trf.xlu0  ;;  %v1351_v53 = vpop.trf.xlu1 }
 0x287   : > { %5083 = vmatmul.mubr.msk.f32.gmra.mrb[16].mxu1 %vm1359_vm7, %v1319_v37  ;;  %v867_v37 = vmul.f32 %v5622_v25, %v6896_v8 }
 0x288   : > { %1574 = vmatprep.mubr.f32.mxu1 %v10900_v51 }
 0x28a   : > { %v1320_v29 = vpop.trf.xlu0  ;;  %v1352_v26 = vpop.trf.xlu1 }
 0x28b   : > { %5084 = vmatmul.mubr.msk.f32.gmra.mrb[18].mxu1 %vm1359_vm7, %v1320_v29 }
 0x28c   : > { %1580 = vmatprep.mubr.f32.mxu1 %v10900_v51 }
 0x28e   : > { %v1321_v45 = vpop.trf.xlu0 }
 0x28f   : > { %5085 = vmatmul.mubr.msk.f32.gmra.mrb[20].mxu1 %vm1359_vm7, %v1321_v45 }
 0x290   : > { %1586 = vmatprep.mubr.f32.mxu1 %v10900_v51 }
 0x292   : > { %v1322_v7 = vpop.trf.xlu0 }
 0x293   : > { %5086 = vmatmul.mubr.msk.f32.gmra.mrb[22].mxu1 %vm1359_vm7, %v1322_v7  ;;  %v7025_v7 = vld [vmem:[%s10589_s2] sm:$0xf] }
 0x294   : > { %1592 = vmatprep.mubr.f32.mxu1 %v10900_v51 }
 0x296   : > { %v1323_v42 = vpop.trf.xlu0 }
 0x297   : > { %5087 = vmatmul.mubr.msk.f32.gmra.mrb[24].mxu1 %vm1359_vm7, %v1323_v42 }
 0x298   : > { %1598 = vmatprep.mubr.f32.mxu1 %v10900_v51 }
 0x29a   : > { %v1324_v44 = vpop.trf.xlu0 }
 0x29b   : > { %5088 = vmatmul.mubr.msk.f32.gmra.mrb[26].mxu1 %vm1359_vm7, %v1324_v44 }
 0x29c   : > { %1604 = vmatprep.mubr.f32.mxu1 %v10900_v51 }
 0x29e   : > { %v1325_v46 = vpop.trf.xlu0 }
 0x29f   : > { %5089 = vmatmul.mubr.msk.f32.gmra.mrb[28].mxu1 %vm1359_vm7, %v1325_v46 }
 0x2a0   : > { %1610 = vmatprep.mubr.f32.mxu1 %v10900_v51 }
 0x2a2   : > { %v1326_v23 = vpop.trf.xlu0 }
 0x2a3   : > { %5090 = vmatmul.mubr.msk.f32.gmra.mrb[30].mxu1 %vm1359_vm7, %v1326_v23 }
 0x2a4   : > { %1616 = vmatprep.mubr.f32.mxu1 %v10900_v51 }
 0x2a7   : > { %5091 = vmatmul.mubr.msk.f32.gmra.mrb[32].mxu1 %vm1359_vm7, %v6906_v49  ;;  %v1353_v49 = vpop.trf.xlu1 }
 0x2a8   : > { %1622 = vmatprep.mubr.f32.mxu1 %v10900_v51 }
 0x2ab   : > { %5092 = vmatmul.mubr.msk.f32.gmra.mrb[34].mxu1 %vm1359_vm7, %v1344_v12  ;;  %v963_v12 = vmul.f32 %v6806_v27, %v6806_v27  ;;  %v1354_v63 = vpop.trf.xlu1 }
 0x2ac   : > { %1628 = vmatprep.mubr.f32.mxu1 %v10900_v51 }
 0x2ad   : > { %v6987_v55 = vadd.f32 %v964_v11, %v963_v12 }
 0x2af   : > { %5093 = vmatmul.mubr.msk.f32.gmra.mrb[36].mxu1 %vm1359_vm7, %v1345_v15  ;;  %v1355_v60 = vpop.trf.xlu1 }
 0x2b0   : > { %1634 = vmatprep.mubr.f32.mxu1 %v10900_v51 }
 0x2b3   : > { %5094 = vmatmul.mubr.msk.f32.gmra.mrb[38].mxu1 %vm1359_vm7, %v1346_v38  ;;  %v1356_v20 = vpop.trf.xlu1  ;;  %v869_v38 = vsel %vm868_vm8, %v6896_v8, %v867_v37 }
 0x2b4   : > { %1640 = vmatprep.mubr.f32.mxu1 %v10900_v51 }
 0x2b7   : > { %5095 = vmatmul.mubr.msk.f32.gmra.mrb[40].mxu1 %vm1359_vm7, %v1347_v48  ;;  %v1357_v6 = vpop.trf.xlu1  ;;  %v872_v48 = vsel %vm870_vm9, %v871_v31, %v869_v38 }
 0x2b8   : > { %1646 = vmatprep.mubr.f32.mxu1 %v10900_v51  ;;  %v1140_v46 = vmax.f32 %v872_v48, 1e-12 }
 0x2bb   : > { %5096 = vmatmul.mubr.msk.f32.gmra.mrb[42].mxu1 %vm1359_vm7, %v1348_v56  ;;  %v1358_v15 = vpop.trf.xlu1 }
 0x2bc   : > { %1652 = vmatprep.mubr.f32.mxu1 %v10900_v51 }
 0x2bf   : > { %5097 = vmatmul.mubr.msk.f32.gmra.mrb[44].mxu1 %vm1359_vm7, %v1349_v1 }
 0x2c0   : > { %1658 = vmatprep.mubr.f32.mxu1 %v10900_v51 }
 0x2c3   : > { %5098 = vmatmul.mubr.msk.f32.gmra.mrb[46].mxu1 %vm1359_vm7, %v1350_v30 }
 0x2c4   : > { %1664 = vmatprep.mubr.f32.mxu1 %v10900_v51 }
 0x2c7   : > { %5099 = vmatmul.mubr.msk.f32.gmra.mrb[48].mxu1 %vm1359_vm7, %v1351_v53 }
 0x2c8   : > { %1670 = vmatprep.mubr.f32.mxu1 %v10900_v51 }
 0x2cb   : > { %5100 = vmatmul.mubr.msk.f32.gmra.mrb[50].mxu1 %vm1359_vm7, %v1352_v26 }
 0x2cc   : > { %1676 = vmatprep.mubr.f32.mxu1 %v10900_v51 }
 0x2cf   : > { %5101 = vmatmul.mubr.msk.f32.gmra.mrb[52].mxu1 %vm1359_vm7, %v1353_v49 }
 0x2d0   : > { %1682 = vmatprep.mubr.f32.mxu1 %v10900_v51 }
 0x2d3   : > { %5102 = vmatmul.mubr.msk.f32.gmra.mrb[54].mxu1 %vm1359_vm7, %v1354_v63 }
 0x2d4   : > { %1688 = vmatprep.mubr.f32.mxu1 %v10900_v51 }
 0x2d6   : > { %v7004_v0 = vpop.xlane.xlu1 %805 }
 0x2d7   : > { %5103 = vmatmul.mubr.msk.f32.gmra.mrb[56].mxu1 %vm1359_vm7, %v1355_v60  ;;  %5623 = vrsqrt.f32 %v7004_v0  ;;  %vm882_vm12 = vcmp.eq.f32.partialorder %v7004_v0, inf  ;;  %vm884_vm2 = vcmp.eq.f32.partialorder %v7004_v0, 0.0 }
 0x2d8   : > { %1694 = vmatprep.mubr.f32.mxu1 %v10900_v51 }
 0x2da   : > { %v1004_v2 = vpop.xlane.xlu1 %1003 }
 0x2db   : > { %5625 = vrsqrt.f32 %v1004_v2  ;;  %5104 = vmatmul.mubr.msk.f32.gmra.mrb[58].mxu1 %vm1359_vm7, %v1356_v20  ;;  %vm1088_vm10 = vcmp.eq.f32.partialorder %v1004_v2, inf  ;;  %v1091_v42 = vand.u32 2147483648, %v1004_v2  ;;  %vm1090_vm11 = vcmp.eq.f32.partialorder %v1004_v2, 0.0 }
 0x2dc   : > { %v989_v28 = vpop.xlane.xlu0 %988  ;;  %1700 = vmatprep.mubr.f32.mxu1 %v10900_v51 }
 0x2dd   : > { %5627 = vrsqrt.f32 %v989_v28  ;;  %vm1053_vm13 = vcmp.eq.f32.partialorder %v989_v28, inf  ;;  %vm1055_vm14 = vcmp.eq.f32.partialorder %v989_v28, 0.0  ;;  %v1056_v53 = vand.u32 2147483648, %v989_v28 }
 0x2de   : > { %v1010_v33 = vpop.xlane.xlu1 %1009 }
 0x2df   : > { %5629 = vrsqrt.f32 %v1010_v33  ;;  %5105 = vmatmul.mubr.msk.f32.gmra.mrb[60].mxu1 %vm1359_vm7, %v1357_v6  ;;  %vm1102_vm15 = vcmp.eq.f32.partialorder %v1010_v33, inf  ;;  %v1105_v49 = vand.u32 2147483648, %v1010_v33  ;;  %vm1104_vm0 = vcmp.eq.f32.partialorder %v1010_v33, 0.0 }
 0x2e0   : > { %v995_v54 = vpop.xlane.xlu0 %994  ;;  %1706 = vmatprep.mubr.f32.mxu1 %v10900_v51  ;;  %v885_v6 = vand.u32 2147483648, %v7004_v0 }
 0x2e1   : > { %5631 = vrsqrt.f32 %v995_v54  ;;  %v5624_v29 = vpop.eup %5623  ;;  %vm1067_vm3 = vcmp.eq.f32.partialorder %v995_v54, inf  ;;  %vm1069_vm4 = vcmp.eq.f32.partialorder %v995_v54, 0.0  ;;  %v1070_v31 = vand.u32 2147483648, %v995_v54 }
 0x2e2   : > { %v881_v1 = vmul.f32 %v5624_v29, %v7004_v0  ;;  %v7254_v9 = vpop.xlane.xlu1 %811 }
 0x2e3   : > { %5106 = vmatmul.mubr.msk.f32.gmra.mrb[62].mxu1 %vm1359_vm7, %v1358_v15  ;;  %10945 = vst [vmem:[#allocation58_spill] sm:$0xff] %v7254_v9 }
 0x2e4   : > { %v7019_v45 = vpop.xlane.xlu0 %796  ;;  %2120 = vmatprep.mubr.f32.mxu1 %v10900_v51  ;;  %v883_v20 = vsel %vm882_vm12, %v7004_v0, %v881_v1 }
 0x2e5   : > { %v5626_v56 = vpop.eup %5625  ;;  %5633 = vrsqrt.f32 %v7019_v45  ;;  %vm861_vm5 = vcmp.eq.f32.partialorder %v7019_v45, inf  ;;  %vm863_vm6 = vcmp.eq.f32.partialorder %v7019_v45, 0.0 }
 0x2e6   : > { %v1087_v44 = vmul.f32 %v5626_v56, %v1004_v2  ;;  %v886_v56 = vsel %vm884_vm2, %v885_v6, %v883_v20  ;;  %v235_v6 = vld [vmem:[%s10588_s1 + $0x130] sm:$0xff] }
 0x2e7   : > { %v5628_v8 = vpop.eup %5627  ;;  %5107 = vmatmul.mubr.msk.f32.vlgmr.msra.gmra.mrb[64].mxu1 %vm1359_vm7, %v7025_v7  ;;  %v1142_v1 = vmax.f32 %v886_v56, 1e-12 }
 0x2e8   : > { %v1089_v30 = vsel %vm1088_vm10, %v1004_v2, %v1087_v44  ;;  %v1052_v23 = vmul.f32 %v5628_v8, %v989_v28  ;;  %v803_v13 = vpop.xlane.xlu0 %802  ;;  %2428 = vmatprep.mubr.f32.mxu1 %v10900_v51 }
 0x2e9   : > { %v5630_v47 = vpop.eup %5629  ;;  %v1092_v26 = vsel %vm1090_vm11, %v1091_v42, %v1089_v30  ;;  %5635 = vrsqrt.f32 %v803_v13  ;;  %vm875_vm8 = vcmp.eq.f32.partialorder %v803_v13, inf  ;;  %vm877_vm9 = vcmp.eq.f32.partialorder %v803_v13, 0.0 }
 0x2ea   : > { %v1224_v12 = vmax.f32 %v1092_v26, 1e-12  ;;  %v1054_v11 = vsel %vm1053_vm13, %v989_v28, %v1052_v23  ;;  %v1101_v63 = vmul.f32 %v5630_v47, %v1010_v33  ;;  %v233_v28 = vld [vmem:[%s10588_s1 + $0x120] sm:$0xff]  ;;  %v234_v26 = vld [vmem:[%s10588_s1 + $0x128] sm:$0xff] }
 0x2eb   : > { %v5632_v60 = vpop.eup %5631  ;;  %v1057_v15 = vsel %vm1055_vm14, %v1056_v53, %v1054_v11  ;;  %5063 = vmatmul.mubr.msk.f32.gmra.mrb[72].mxu0 %vm248_vm1, %v233_v28 }
 0x2ec   : > { %5637 = vrcp.f32 %v1224_v12  ;;  %v1219_v25 = vmax.f32 %v1057_v15, 1e-12  ;;  %v1103_v2 = vsel %vm1102_vm15, %v1010_v33, %v1101_v63  ;;  %v1066_v37 = vmul.f32 %v5632_v60, %v995_v54  ;;  %684 = vmatprep.mubr.f32.mxu0 %v10900_v51 }
 0x2ed   : > { %v1106_v38 = vsel %vm1104_vm0, %v1105_v49, %v1103_v2  ;;  %v864_v33 = vand.u32 2147483648, %v7019_v45 }
 0x2ee   : > { %5639 = vrcp.f32 %v1219_v25  ;;  %v1226_v29 = vmax.f32 %v1106_v38, 1e-12  ;;  %v1068_v48 = vsel %vm1067_vm3, %v995_v54, %v1066_v37 }
 0x2ef   : > { %v5634_v42 = vpop.eup %5633  ;;  %v1071_v44 = vsel %vm1069_vm4, %v1070_v31, %v1068_v48  ;;  %5064 = vmatmul.mubr.msk.f32.gmra.mrb[74].mxu0 %vm248_vm1, %v234_v26  ;;  %v10921_v48 = vld [vmem:[#allocation8_spill] sm:$0xff] }
 0x2f0   : > { %5641 = vrcp.f32 %v1226_v29  ;;  %v1221_v8 = vmax.f32 %v1071_v44, 1e-12  ;;  %v860_v0 = vmul.f32 %v5634_v42, %v7019_v45  ;;  %690 = vmatprep.mubr.f32.mxu0 %v10900_v51  ;;  %v10922_v44 = vld [vmem:[#allocation6_spill] sm:$0xff] }
 0x2f1   : > { %5643 = vrcp.f32 %v1140_v46  ;;  %v878_v46 = vand.u32 2147483648, %v803_v13 }
 0x2f2   : > { %v862_v54 = vsel %vm861_vm5, %v7019_v45, %v860_v0  ;;  %5645 = vrcp.f32 %v1221_v8  ;;  %v10923_v0 = vld [vmem:[#allocation5_spill] sm:$0xff] }
 0x2f3   : > { %v5636_v30 = vpop.eup %5635  ;;  %v865_v23 = vsel %vm863_vm6, %v864_v33, %v862_v54  ;;  %5647 = vrcp.f32 %v1142_v1  ;;  %5065 = vmatmul.mubr.msk.f32.gmra.mrb[76].mxu0 %vm248_vm1, %v235_v6  ;;  %v10924_v33 = vld [vmem:[#allocation7_spill] sm:$0xff] }
 0x2f4   : > { %v874_v53 = vmul.f32 %v5636_v30, %v803_v13  ;;  %v1139_v47 = vmax.f32 %v865_v23, 1e-12  ;;  %696 = vmatprep.mubr.f32.mxu0 %v10900_v51  ;;  %v10925_v23 = vld [vmem:[#allocation12_spill] sm:$0xff] }
 0x2f6   : > { %v5638_v49 = vpop.eup %5637  ;;  %v876_v12 = vsel %vm875_vm8, %v803_v13, %v874_v53  ;;  %5649 = vrcp.f32 %v1139_v47  ;;  %v10927_v47 = vld [vmem:[#allocation9_spill] sm:$0xff] }
 0x2f7   : > { %v879_v45 = vsel %vm877_vm9, %v878_v46, %v876_v12  ;;  %v7055_v11 = vmul.f32 %v5638_v49, %v6796_v19  ;;  %v7058_v63 = vmul.f32 %v5638_v49, %v6794_v4  ;;  %v10928_v46 = vld [vmem:[#allocation11_spill] sm:$0xff] }
 0x2f8   : > { %v5640_v60 = vpop.eup %5639  ;;  %v1141_v20 = vmax.f32 %v879_v45, 1e-12 }
 0x2f9   : > { %10917 = vst [vmem:[#allocation52_spill] sm:$0xff] %v7055_v11  ;;  %10918 = vst [vmem:[#allocation53_spill] sm:$0xff] %v7058_v63  ;;  %v1271_v15 = vmul.f32 %v5640_v60, %v6722_v32  ;;  %v1272_v13 = vmul.f32 %v5640_v60, %v6724_v62  ;;  %v236_v32 = vld [vmem:[%s10588_s1 + $0x138] sm:$0xff] }
 0x2fa   : > { %v5642_v25 = vpop.eup %5641  ;;  %5651 = vrcp.f32 %v1141_v20  ;;  %5066 = vmatmul.mubr.msk.f32.gmra.mrb[78].mxu0 %vm248_vm1, %v236_v32 }
 0x2fb   : > { %v5644_v19 = vpop.eup %5643  ;;  %2204 = vxpose.xlu0.b32.start [1/4] (short) %v1271_v15, 128  ;;  %2236 = vxpose.xlu1.b32.start [1/4] (short) %v1272_v13, 128  ;;  %v7068_v4 = vmul.f32 %v5642_v25, %v6816_v34  ;;  %v7071_v2 = vmul.f32 %v5642_v25, %v6812_v59  ;;  %5653 = vrsqrt.f32 %v7254_v9 }
 0x2fc   : > { %v5646_v62 = vpop.eup %5645  ;;  %v1162_v37 = vmul.f32 10.0, %v5644_v19  ;;  %702 = vmatprep.mubr.f32.mxu0 %v10900_v51 }
 0x2fd   : > { %10919 = vst [vmem:[#allocation54_spill] sm:$0xff] %v7068_v4  ;;  %10920 = vst [vmem:[#allocation55_spill] sm:$0xff] %v7071_v2  ;;  %v5648_v38 = vpop.eup %5647  ;;  %v1275_v31 = vmul.f32 %v5646_v62, %v6736_v14  ;;  %v1276_v59 = vmul.f32 %v5646_v62, %v6738_v24  ;;  %v10926_v24 = vld [vmem:[#allocation10_spill] sm:$0xff] }
 0x2fe   : > { %v1194_v56 = vmul.f32 %v1162_v37, %v10921_v48  ;;  %v1166_v42 = vmul.f32 10.0, %v5648_v38  ;;  %v1193_v1 = vmul.f32 %v1162_v37, %v10924_v33 }
 0x2ff   : > { %2205 = vxpose.xlu0.b32.cont [2/4] (short) %v6871_v35, 128  ;;  %2237 = vxpose.xlu1.b32.cont [2/4] (short) %v6874_v21, 128 }
 0x300   : > { %v5650_v34 = vpop.eup %5649  ;;  %v1198_v14 = vmul.f32 %v1166_v42, %v10925_v23  ;;  %v1197_v49 = vmul.f32 %v1166_v42, %v10928_v46 }
 0x301   : > { %v1160_v29 = vmul.f32 10.0, %v5650_v34 }
 0x303   : > { %2206 = vxpose.xlu0.b32.cont [3/4] (short) %v1275_v31, 128  ;;  %2238 = vxpose.xlu1.b32.cont [3/4] (short) %v1276_v59, 128  ;;  %v1192_v8 = vmul.f32 %v1160_v29, %v10922_v44  ;;  %v1191_v28 = vmul.f32 %v1160_v29, %v10923_v0 }
 0x304   : > { %v5652_v35 = vpop.eup %5651 }
 0x305   : > { %v5294_v54 = vpack.c.bf16 %v1194_v56, %v1192_v8  ;;  %v5296_v21 = vpack.c.bf16 %v1193_v1, %v1191_v28  ;;  %v1164_v30 = vmul.f32 10.0, %v5652_v35 }
 0x307   : > { %2207 = vxpose.xlu0.b32.end [4/4] (short) %v6877_v43, 128  ;;  %2239 = vxpose.xlu1.b32.end [4/4] (short) %v6880_v40, 128  ;;  %v1196_v53 = vmul.f32 %v1164_v30, %v10926_v24  ;;  %v1195_v26 = vmul.f32 %v1164_v30, %v10927_v47 }
 0x308   : > { %5295 = vmatprep.subr.bf16.mxu1 %v5294_v54 }
 0x309   : > { %5297 = vmatpush1.bf16.msra.mxu1 %v5296_v21  ;;  %v5298_v12 = vpack.c.bf16 %v1198_v14, %v1196_v53  ;;  %v5300_v45 = vpack.c.bf16 %v1197_v49, %v1195_v26  ;;  %v10929_v53 = vld [vmem:[#allocation24_spill] sm:$0xff] }
 0x30b   : > { %5299 = vmatprep.subr.bf16.mxu1 %v5298_v12 }
 0x30d   : > { %5301 = vmatpush1.bf16.msra.mxu1 %v5300_v45 }
 0x33a   : > { %v7092_v60 = vpop.f32.mrb[0].mxu1 }
 0x33b   : > { %v7094_v20 = vpop.f32.mrb[1].mxu1 }
 0x33e   : > { %v7096_v6 = vpop.f32.mrb[2].mxu1 }
 0x33f   : > { %v7098_v43 = vpop.f32.mrb[3].mxu1 }
 0x342   : > { %v7100_v40 = vpop.f32.mrb[4].mxu1 }
 0x343   : > { %v1713_v15 = vmax.f32 %v7092_v60, %v7100_v40  ;;  %v7104_v13 = vpop.f32.mrb[5].mxu1 }
 0x344   : > { %v1750_v25 = vmax.f32 %v7094_v20, %v7104_v13 }
 0x346   : > { %v7108_v19 = vpop.f32.mrb[6].mxu1 }
 0x347   : > { %v1714_v32 = vmax.f32 %v7096_v6, %v7108_v19  ;;  %v7112_v62 = vpop.f32.mrb[7].mxu1 }
 0x348   : > { %v1751_v37 = vmax.f32 %v7098_v43, %v7112_v62 }
 0x34a   : > { %v7116_v38 = vpop.f32.mrb[8].mxu1 }
 0x34b   : > { %v1715_v34 = vmax.f32 %v1713_v15, %v7116_v38  ;;  %v7119_v31 = vpop.f32.mrb[9].mxu1 }
 0x34c   : > { %v1752_v59 = vmax.f32 %v1750_v25, %v7119_v31 }
 0x34e   : > { %v7122_v29 = vpop.f32.mrb[10].mxu1 }
 0x34f   : > { %v1716_v48 = vmax.f32 %v1714_v32, %v7122_v29  ;;  %v7125_v56 = vpop.f32.mrb[11].mxu1 }
 0x350   : > { %v1753_v42 = vmax.f32 %v1751_v37, %v7125_v56 }
 0x352   : > { %v7128_v44 = vpop.f32.mrb[12].mxu1 }
 0x353   : > { %v1717_v8 = vmax.f32 %v1715_v34, %v7128_v44  ;;  %v7131_v0 = vpop.f32.mrb[13].mxu1 }
 0x354   : > { %v1754_v28 = vmax.f32 %v1752_v59, %v7131_v0 }
 0x356   : > { %v7134_v33 = vpop.f32.mrb[14].mxu1 }
 0x357   : > { %v1718_v1 = vmax.f32 %v1716_v48, %v7134_v33  ;;  %v7137_v35 = vpop.f32.mrb[15].mxu1 }
 0x358   : > { %v1755_v54 = vmax.f32 %v1753_v42, %v7137_v35 }
 0x35a   : > { %v7140_v21 = vpop.f32.mrb[16].mxu1 }
 0x35b   : > { %v1719_v30 = vmax.f32 %v1717_v8, %v7140_v21  ;;  %v7143_v23 = vpop.f32.mrb[17].mxu1 }
 0x35c   : > { %v1756_v14 = vmax.f32 %v1754_v28, %v7143_v23  ;;  %v10932_v28 = vld [vmem:[#allocation16_spill] sm:$0xff] }
 0x35e   : > { %v7146_v24 = vpop.f32.mrb[18].mxu1  ;;  %817 = vadd.xlane.f32.xlu1 %v10929_v53 }
 0x35f   : > { %v1720_v47 = vmax.f32 %v1718_v1, %v7146_v24  ;;  %v7150_v26 = vpop.f32.mrb[19].mxu1 }
 0x360   : > { %v1757_v46 = vmax.f32 %v1755_v54, %v7150_v26 }
 0x362   : > { %v7153_v49 = vpop.f32.mrb[20].mxu1 }
 0x363   : > { %v1721_v12 = vmax.f32 %v1719_v30, %v7153_v49  ;;  %v7156_v45 = vpop.f32.mrb[21].mxu1 }
 0x364   : > { %v1758_v15 = vmax.f32 %v1756_v14, %v7156_v45  ;;  %1000 = vadd.xlane.f32.xlu0 %v6977_v50  ;;  %v10934_v14 = vld [vmem:[#allocation21_spill] sm:$0xff] }
 0x366   : > { %v7160_v25 = vpop.f32.mrb[22].mxu1 }
 0x367   : > { %v1722_v32 = vmax.f32 %v1720_v47, %v7160_v25  ;;  %v7163_v37 = vpop.f32.mrb[23].mxu1 }
 0x368   : > { %10930 = vst [vmem:[#allocation8_spill] sm:$0xff] %v7163_v37  ;;  %v1759_v34 = vmax.f32 %v1757_v46, %v7163_v37  ;;  %1006 = vadd.xlane.f32.xlu0 %v6987_v55 }
 0x36a   : > { %v7167_v59 = vpop.f32.mrb[24].mxu1 }
 0x36b   : > { %v1723_v48 = vmax.f32 %v1721_v12, %v7167_v59  ;;  %v7170_v42 = vpop.f32.mrb[25].mxu1 }
 0x36c   : > { %10931 = vst [vmem:[#allocation6_spill] sm:$0xff] %v7170_v42  ;;  %v1760_v8 = vmax.f32 %v1758_v15, %v7170_v42  ;;  %808 = vadd.xlane.f32.xlu0 %v10932_v28 }
 0x36e   : > { %v7174_v50 = vpop.f32.mrb[26].mxu1 }
 0x36f   : > { %v1724_v1 = vmax.f32 %v1722_v32, %v7174_v50  ;;  %v7177_v54 = vpop.f32.mrb[27].mxu1 }
 0x370   : > { %10933 = vst [vmem:[#allocation5_spill] sm:$0xff] %v7177_v54  ;;  %v1761_v30 = vmax.f32 %v1759_v34, %v7177_v54  ;;  %814 = vadd.xlane.f32.xlu0 %v10934_v14 }
 0x372   : > { %v7181_v55 = vpop.f32.mrb[28].mxu1 }
 0x373   : > { %v1725_v53 = vmax.f32 %v1723_v48, %v7181_v55  ;;  %v7184_v47 = vpop.f32.mrb[29].mxu1 }
 0x374   : > { %10935 = vst [vmem:[#allocation7_spill] sm:$0xff] %v7184_v47  ;;  %v1762_v46 = vmax.f32 %v1760_v8, %v7184_v47 }
 0x376   : > { %v7187_v12 = vpop.f32.mrb[30].mxu1 }
 0x377   : > { %v1726_v15 = vmax.f32 %v1724_v1, %v7187_v12  ;;  %v7190_v28 = vpop.f32.mrb[31].mxu1 }
 0x378   : > { %10936 = vst [vmem:[#allocation12_spill] sm:$0xff] %v7190_v28  ;;  %v1763_v32 = vmax.f32 %v1761_v30, %v7190_v28 }
 0x37a   : > { %v7193_v22 = vpop.f32.mrb[32].mxu1 }
 0x37b   : > { %v1727_v34 = vmax.f32 %v1725_v53, %v7193_v22  ;;  %v2220_v14 = vpop.trf.xlu0  ;;  %v7196_v57 = vpop.f32.mrb[33].mxu1 }
 0x37c   : > { %10937 = vst [vmem:[#allocation10_spill] sm:$0xff] %v7196_v57  ;;  %v1764_v48 = vmax.f32 %v1762_v46, %v7196_v57  ;;  %5108 = vmatmul.mubr.msk.f32.vlgmr.msra.gmra.mrb[66].mxu1 %vm1359_vm7, %v2220_v14  ;;  %v2252_v36 = vpop.trf.xlu1 }
 0x37d   : > { %2434 = vmatprep.mubr.f32.mxu1 %v10900_v51 }
 0x37e   : > { %v7201_v8 = vpop.f32.mrb[34].mxu1 }
 0x37f   : > { %v1728_v1 = vmax.f32 %v1726_v15, %v7201_v8  ;;  %v2221_v17 = vpop.trf.xlu0  ;;  %v7204_v5 = vpop.f32.mrb[35].mxu1 }
 0x380   : > { %10938 = vst [vmem:[#allocation9_spill] sm:$0xff] %v7204_v5  ;;  %v1765_v30 = vmax.f32 %v1763_v32, %v7204_v5  ;;  %5109 = vmatmul.mubr.msk.f32.gmra.mrb[68].mxu1 %vm1359_vm7, %v2221_v17 }
 0x381   : > { %2440 = vmatprep.mubr.f32.mxu1 %v10900_v51 }
 0x382   : > { %v7209_v53 = vpop.f32.mrb[36].mxu1 }
 0x383   : > { %v1729_v46 = vmax.f32 %v1727_v34, %v7209_v53  ;;  %v2222_v14 = vpop.trf.xlu0  ;;  %v7212_v41 = vpop.f32.mrb[37].mxu1 }
 0x384   : > { %10939 = vst [vmem:[#allocation11_spill] sm:$0xff] %v7212_v41  ;;  %v1766_v18 = vmax.f32 %v1764_v48, %v7212_v41  ;;  %5110 = vmatmul.mubr.msk.f32.gmra.mrb[70].mxu1 %vm1359_vm7, %v2222_v14 }
 0x385   : > { %2446 = vmatprep.mubr.f32.mxu1 %v10900_v51 }
 0x386   : > { %v7217_v15 = vpop.f32.mrb[38].mxu1  ;;  %2961 = vrot.lane.b32.xlu0 %v7025_v7, %s6304_s29  ;;  %s6239_s29 = scalar_lea.vmem %s10547_s20, 128 }
 0x387   : > { %v1730_v32 = vmax.f32 %v1728_v1, %v7217_v15  ;;  %v2223_v17 = vpop.trf.xlu0  ;;  %v7220_v10 = vpop.f32.mrb[39].mxu1  ;;  %p6240_p11 = scmp.ne.s32.totalorder %s10547_s20, %s6239_s29 }
 0x388   : > { %10940 = vst [vmem:[#allocation24_spill] sm:$0xff] %v7220_v10  ;;  %v1767_v3 = vmax.f32 %v1765_v30, %v7220_v10  ;;  %5111 = vmatmul.mubr.msk.f32.gmra.mrb[72].mxu1 %vm1359_vm7, %v2223_v17 }
 0x389   : > { %2452 = vmatprep.mubr.f32.mxu1 %v10900_v51  ;;  %p6241_p12 = pnand %p6240_p11, %p6372_p5 }
 0x38a   : > { %v7225_v34 = vpop.f32.mrb[40].mxu1 }
 0x38b   : > { %v1731_v48 = vmax.f32 %v1729_v46, %v7225_v34  ;;  %v2224_v14 = vpop.trf.xlu0  ;;  %v7228_v58 = vpop.f32.mrb[41].mxu1  ;;  %p6242_p13 = pneg %p6241_p12 }
 0x38c   : > { %10941 = vst [vmem:[#allocation16_spill] sm:$0xff] %v7228_v58  ;;  %v1768_v16 = vmax.f32 %v1766_v18, %v7228_v58  ;;  %5112 = vmatmul.mubr.msk.f32.gmra.mrb[74].mxu1 %vm1359_vm7, %v2224_v14 }
 0x38d   : > { %2458 = vmatprep.mubr.f32.mxu1 %v10900_v51 }
 0x38e   : > { %v7233_v1 = vpop.f32.mrb[42].mxu1 }
 0x38f   : > { %v1732_v30 = vmax.f32 %v1730_v32, %v7233_v1  ;;  %v2225_v17 = vpop.trf.xlu0  ;;  %v7236_v39 = vpop.f32.mrb[43].mxu1 }
 0x390   : > { %10942 = vst [vmem:[#allocation21_spill] sm:$0xff] %v7236_v39  ;;  %v1769_v52 = vmax.f32 %v1767_v3, %v7236_v39  ;;  %5113 = vmatmul.mubr.msk.f32.gmra.mrb[76].mxu1 %vm1359_vm7, %v2225_v17 }
 0x391   : > { %2464 = vmatprep.mubr.f32.mxu1 %v10900_v51 }
 0x392   : > { %v7241_v46 = vpop.f32.mrb[44].mxu1 }
 0x393   : > { %v1733_v18 = vmax.f32 %v1731_v48, %v7241_v46  ;;  %v2226_v14 = vpop.trf.xlu0  ;;  %v7244_v2 = vpop.f32.mrb[45].mxu1 }
 0x394   : > { %10943 = vst [vmem:[#allocation56_spill] sm:$0xff] %v7244_v2  ;;  %v1770_v4 = vmax.f32 %v1768_v16, %v7244_v2  ;;  %5114 = vmatmul.mubr.msk.f32.gmra.mrb[78].mxu1 %vm1359_vm7, %v2226_v14 }
 0x395   : > { %2470 = vmatprep.mubr.f32.mxu1 %v10900_v51 }
 0x396   : > { %v7249_v32 = vpop.f32.mrb[46].mxu1 }
 0x397   : > { %v1734_v3 = vmax.f32 %v1732_v30, %v7249_v32  ;;  %v2227_v17 = vpop.trf.xlu0  ;;  %v7252_v27 = vpop.f32.mrb[47].mxu1 }
 0x398   : > { %10944 = vst [vmem:[#allocation57_spill] sm:$0xff] %v7252_v27  ;;  %v1771_v48 = vmax.f32 %v1769_v52, %v7252_v27  ;;  %5115 = vmatmul.mubr.msk.f32.gmra.mrb[80].mxu1 %vm1359_vm7, %v2227_v17 }
 0x399   : > { %2476 = vmatprep.mubr.f32.mxu1 %v10900_v51 }
 0x39a   : > { %v7259_v16 = vpop.f32.mrb[48].mxu1 }
 0x39b   : > { %v1735_v14 = vmax.f32 %v1733_v18, %v7259_v16  ;;  %v2228_v63 = vpop.trf.xlu0  ;;  %v7262_v11 = vpop.f32.mrb[49].mxu1 }
 0x39c   : > { %10946 = vst [vmem:[#allocation59_spill] sm:$0xff] %v7262_v11  ;;  %v1772_v30 = vmax.f32 %v1770_v4, %v7262_v11  ;;  %5116 = vmatmul.mubr.msk.f32.gmra.mrb[82].mxu1 %vm1359_vm7, %v2228_v63  ;;  %v7277_v4 = vpop.trf.xlu1 }
 0x39d   : > { %2482 = vmatprep.mubr.f32.mxu1 %v10900_v51 }
 0x39e   : > { %v7267_v61 = vpop.f32.mrb[50].mxu1 }
 0x39f   : > { %v1736_v52 = vmax.f32 %v1734_v3, %v7267_v61  ;;  %v2229_v17 = vpop.trf.xlu0  ;;  %v7270_v27 = vpop.f32.mrb[51].mxu1 }
 0x3a0   : > { %10947 = vst [vmem:[#allocation60_spill] sm:$0xff] %v7270_v27  ;;  %v1773_v2 = vmax.f32 %v1771_v48, %v7270_v27  ;;  %5117 = vmatmul.mubr.msk.f32.gmra.mrb[84].mxu1 %vm1359_vm7, %v2229_v17 }
 0x3a1   : > { %2488 = vmatprep.mubr.f32.mxu1 %v10900_v51 }
 0x3a2   : > { %v7275_v18 = vpop.f32.mrb[52].mxu1 }
 0x3a3   : > { %v1737_v63 = vmax.f32 %v1735_v14, %v7275_v18  ;;  %v2230_v11 = vpop.trf.xlu0  ;;  %v7280_v39 = vpop.f32.mrb[53].mxu1 }
 0x3a4   : > { %10948 = vst [vmem:[#allocation61_spill] sm:$0xff] %v7280_v39  ;;  %v1774_v3 = vmax.f32 %v1772_v30, %v7280_v39  ;;  %5118 = vmatmul.mubr.msk.f32.gmra.mrb[86].mxu1 %vm1359_vm7, %v2230_v11  ;;  %v2254_v14 = vpop.trf.xlu1 }
 0x3a5   : > { %2494 = vmatprep.mubr.f32.mxu1 %v10900_v51 }
 0x3a6   : > { %v7285_v48 = vpop.f32.mrb[54].mxu1 }
 0x3a7   : > { %v1738_v17 = vmax.f32 %v1736_v52, %v7285_v48  ;;  %v2231_v27 = vpop.trf.xlu0  ;;  %v7288_v58 = vpop.f32.mrb[55].mxu1 }
 0x3a8   : > { %10949 = vst [vmem:[#allocation62_spill] sm:$0xff] %v7288_v58  ;;  %v1775_v10 = vmax.f32 %v1773_v2, %v7288_v58  ;;  %5119 = vmatmul.mubr.msk.f32.gmra.mrb[88].mxu1 %vm1359_vm7, %v2231_v27  ;;  %v7304_v2 = vpop.trf.xlu1 }
 0x3a9   : > { %2500 = vmatprep.mubr.f32.mxu1 %v10900_v51 }
 0x3aa   : > { %v7294_v11 = vpop.f32.mrb[56].mxu1 }
 0x3ab   : > { %v1739_v30 = vmax.f32 %v1737_v63, %v7294_v11  ;;  %v2232_v39 = vpop.trf.xlu0  ;;  %v7297_v41 = vpop.f32.mrb[57].mxu1 }
 0x3ac   : > { %10950 = vst [vmem:[#allocation63_spill] sm:$0xff] %v7297_v41  ;;  %v1776_v52 = vmax.f32 %v1774_v3, %v7297_v41  ;;  %5120 = vmatmul.mubr.msk.f32.gmra.mrb[90].mxu1 %vm1359_vm7, %v2232_v39 }
 0x3ad   : > { %2506 = vmatprep.mubr.f32.mxu1 %v10900_v51 }
 0x3ae   : > { %v7302_v27 = vpop.f32.mrb[58].mxu1 }
 0x3af   : > { %v1740_v58 = vmax.f32 %v1738_v17, %v7302_v27  ;;  %v2233_v7 = vpop.trf.xlu0  ;;  %v7307_v5 = vpop.f32.mrb[59].mxu1 }
 0x3b0   : > { %10951 = vst [vmem:[#allocation64_spill] sm:$0xff] %v7307_v5  ;;  %v1777_v63 = vmax.f32 %v1775_v10, %v7307_v5  ;;  %5121 = vmatmul.mubr.msk.f32.gmra.mrb[92].mxu1 %vm1359_vm7, %v2233_v7  ;;  %v7320_v17 = vpop.trf.xlu1 }
 0x3b1   : > { %2512 = vmatprep.mubr.f32.mxu1 %v10900_v51 }
 0x3b2   : > { %v7312_v3 = vpop.f32.mrb[60].mxu1 }
 0x3b3   : > { %v1741_v39 = vmax.f32 %v1739_v30, %v7312_v3  ;;  %v2234_v41 = vpop.trf.xlu0  ;;  %v7315_v57 = vpop.f32.mrb[61].mxu1 }
 0x3b4   : > { %10952 = vst [vmem:[#allocation65_spill] sm:$0xff] %v7315_v57  ;;  %v1778_v28 = vmax.f32 %v1776_v52, %v7315_v57  ;;  %5122 = vmatmul.mubr.msk.f32.gmra.mrb[94].mxu1 %vm1359_vm7, %v2234_v41  ;;  %v7330_v57 = vpop.trf.xlu1 }
 0x3b5   : > { %2518 = vmatprep.mubr.f32.mxu1 %v10900_v51 }
 0x3b6   : > { %v7322_v10 = vpop.f32.mrb[62].mxu1 }
 0x3b7   : > { %v1742_v7 = vmax.f32 %v1740_v58, %v7322_v10  ;;  %v2235_v5 = vpop.trf.xlu0  ;;  %v7325_v47 = vpop.f32.mrb[63].mxu1  ;;  %v237_v58 = vld [vmem:[%s10588_s1 + $0x140] sm:$0xff] }
 0x3b8   : > { %10953 = vst [vmem:[#allocation66_spill] sm:$0xff] %v7325_v47  ;;  %v1779_v30 = vmax.f32 %v1777_v63, %v7325_v47  ;;  %5123 = vmatmul.mubr.msk.f32.gmra.mrb[96].mxu1 %vm1359_vm7, %v2235_v5  ;;  %5067 = vmatmul.mubr.msk.f32.gmra.mrb[80].mxu0 %vm248_vm1, %v237_v58 }
 0x3b9   : > { %v1743_v54 = vmax.f32 %v1741_v39, %v1742_v7  ;;  %2524 = vmatprep.mubr.f32.mxu1 %v10900_v51  ;;  %708 = vmatprep.mubr.f32.mxu0 %v10900_v51 }
 0x3ba   : > { %v1780_v52 = vmax.f32 %v1778_v28, %v1779_v30  ;;  %v7338_v5 = vpop.f32.mrb[64].mxu1  ;;  %v238_v28 = vld [vmem:[%s10588_s1 + $0x148] sm:$0xff]  ;;  %v7348_v30 = vpop.trf.xlu1 }
 0x3bb   : > { %v1744_v41 = vrot.slane %v1743_v54, 4  ;;  %10954 = vst [vmem:[#allocation67_spill] sm:$0xff] %v7338_v5  ;;  %v7344_v39 = vpop.f32.mrb[65].mxu1 }
 0x3bc   : > { %v1781_v42 = vrot.slane %v1780_v52, 4  ;;  %5124 = vmatmul.mubr.msk.f32.gmra.mrb[98].mxu1 %vm1359_vm7, %v2252_v36  ;;  %5068 = vmatmul.mubr.msk.f32.gmra.mrb[82].mxu0 %vm248_vm1, %v238_v28 }
 0x3bd   : > { %v1745_v37 = vmax.f32 %v1743_v54, %v1744_v41  ;;  %2530 = vmatprep.mubr.f32.mxu1 %v10900_v51  ;;  %714 = vmatprep.mubr.f32.mxu0 %v10900_v51 }
 0x3be   : > { %v1782_v63 = vmax.f32 %v1780_v52, %v1781_v42  ;;  %v239_v52 = vld [vmem:[%s10588_s1 + $0x150] sm:$0xff]  ;;  %v7357_v5 = vpop.f32.mrb[72].mxu0 }
 0x3bf   : > { %v1746_v36 = vrot.slane %v1745_v37, 2  ;;  %10955 = vst [vmem:[#allocation68_spill] sm:$0xff] %v7357_v5 }
 0x3c0   : > { %v1783_v7 = vrot.slane %v1782_v63, 2  ;;  %5125 = vmatmul.mubr.msk.f32.gmra.mrb[100].mxu1 %vm1359_vm7, %v7277_v4  ;;  %5069 = vmatmul.mubr.msk.f32.gmra.mrb[84].mxu0 %vm248_vm1, %v239_v52  ;;  %v7363_v4 = vpop.f32.mrb[73].mxu0 }
 0x3c1   : > { %v1747_v54 = vmax.f32 %v1745_v37, %v1746_v36  ;;  %2536 = vmatprep.mubr.f32.mxu1 %v10900_v51  ;;  %10956 = vst [vmem:[#allocation69_spill] sm:$0xff] %v7363_v4  ;;  %720 = vmatprep.mubr.f32.mxu0 %v10900_v51 }
 0x3c2   : > { %v1784_v42 = vmax.f32 %v1782_v63, %v1783_v7 }
 0x3c3   : > { %v1748_v41 = vrot.slane %v1747_v54, 1 }
 0x3c4   : > { %v1785_v58 = vrot.slane %v1784_v42, 1  ;;  %5126 = vmatmul.mubr.msk.f32.gmra.mrb[102].mxu1 %vm1359_vm7, %v2254_v14 }
 0x3c5   : > { %v7359_v37 = vmax.f32 %v1747_v54, %v1748_v41  ;;  %2542 = vmatprep.mubr.f32.mxu1 %v10900_v51  ;;  %v7376_v54 = vpop.trf.xlu1 }
 0x3c6   : > { %v7365_v63 = vmax.f32 %v1784_v42, %v1785_v58  ;;  %v240_v42 = vld [vmem:[%s10588_s1 + $0x158] sm:$0xff] }
 0x3c7   : > { %v1787_v28 = vsub.f32 %v7092_v60, %v7359_v37  ;;  %v1789_v14 = vsub.f32 %v7096_v6, %v7359_v37  ;;  %v1791_v36 = vsub.f32 %v7100_v40, %v7359_v37  ;;  %v1793_v7 = vsub.f32 %v7108_v19, %v7359_v37  ;;  %v7391_v19 = vpop.f32.mrb[74].mxu0  ;;  %5070 = vmatmul.mubr.msk.f32.gmra.mrb[86].mxu0 %vm248_vm1, %v240_v42 }
 0x3c8   : > { %v1795_v52 = vsub.f32 %v7116_v38, %v7359_v37  ;;  %v1797_v60 = vsub.f32 %v7122_v29, %v7359_v37  ;;  %v1799_v6 = vsub.f32 %v7128_v44, %v7359_v37  ;;  %v1801_v40 = vsub.f32 %v7134_v33, %v7359_v37  ;;  %5127 = vmatmul.mubr.msk.f32.gmra.mrb[104].mxu1 %vm1359_vm7, %v7304_v2  ;;  %v7402_v33 = vpop.f32.mrb[75].mxu0 }
 0x3c9   : > { %10957 = vst [vmem:[#allocation70_spill] sm:$0xff] %v7391_v19  ;;  %v1803_v41 = vsub.f32 %v7140_v21, %v7359_v37  ;;  %v1805_v38 = vsub.f32 %v7146_v24, %v7359_v37  ;;  %v1807_v29 = vsub.f32 %v7153_v49, %v7359_v37  ;;  %v1809_v44 = vsub.f32 %v7160_v25, %v7359_v37  ;;  %v7435_v42 = vpop.f32.mrb[76].mxu0 }
 0x3ca   : > { %2548 = vmatprep.mubr.f32.mxu1 %v10900_v51  ;;  %10958 = vst [vmem:[#allocation71_spill] sm:$0xff] %v7402_v33  ;;  %v1811_v2 = vsub.f32 %v7167_v59, %v7359_v37  ;;  %v1813_v58 = vsub.f32 %v7174_v50, %v7359_v37  ;;  %v1815_v21 = vsub.f32 %v7181_v55, %v7359_v37  ;;  %v241_v55 = vld [vmem:[%s10588_s1 + $0x160] sm:$0xff]  ;;  %10959 = vst [vmem:[#allocation72_spill] sm:$0xff] %v7435_v42  ;;  %v7445_v33 = vpop.trf.xlu1 }
 0x3cb   : > { %v1817_v24 = vsub.f32 %v7187_v12, %v7359_v37  ;;  %v1819_v49 = vsub.f32 %v7193_v22, %v7359_v37  ;;  %v1821_v25 = vsub.f32 %v7201_v8, %v7359_v37  ;;  %v1823_v59 = vsub.f32 %v7209_v53, %v7359_v37  ;;  %726 = vmatprep.mubr.f32.mxu0 %v10900_v51  ;;  %v7448_v53 = vpop.f32.mrb[77].mxu0  ;;  %v242_v8 = vld [vmem:[%s10588_s1 + $0x168] sm:$0xff] }
 0x3cc   : > { %v1827_v12 = vsub.f32 %v7225_v34, %v7359_v37  ;;  %v1829_v22 = vsub.f32 %v7233_v1, %v7359_v37  ;;  %5128 = vmatmul.mubr.msk.f32.gmra.mrb[106].mxu1 %vm1359_vm7, %v7320_v17  ;;  %10960 = vst [vmem:[#allocation73_spill] sm:$0xff] %v7448_v53  ;;  %5071 = vmatmul.mubr.msk.f32.gmra.mrb[88].mxu0 %vm248_vm1, %v241_v55  ;;  %v1851_v42 = vmul.f32 1.442695, %v1787_v28  ;;  %v1855_v53 = vmul.f32 1.442695, %v1789_v14 }
 0x3cd   : > { %2554 = vmatprep.mubr.f32.mxu1 %v10900_v51  ;;  %v1859_v4 = vmul.f32 1.442695, %v1791_v36  ;;  %732 = vmatprep.mubr.f32.mxu0 %v10900_v51  ;;  %v1863_v34 = vmul.f32 1.442695, %v1793_v7  ;;  %v1867_v55 = vmul.f32 1.442695, %v1795_v52 }
 0x3ce   : > { %5655 = vpow2.f32 %v1851_v42  ;;  %v1871_v28 = vmul.f32 1.442695, %v1797_v60  ;;  %v1875_v14 = vmul.f32 1.442695, %v1799_v6  ;;  %v7472_v36 = vpop.trf.xlu1  ;;  %v243_v7 = vld [vmem:[%s10588_s1 + $0x170] sm:$0xff]  ;;  %v244_v6 = vld [vmem:[%s10588_s1 + $0x178] sm:$0xff] }
 0x3cf   : > { %5657 = vpow2.f32 %v1855_v53  ;;  %v1883_v42 = vmul.f32 1.442695, %v1803_v41  ;;  %v1887_v52 = vmul.f32 1.442695, %v1805_v38  ;;  %v1891_v60 = vmul.f32 1.442695, %v1807_v29 }
 0x3d0   : > { %5129 = vmatmul.mubr.msk.f32.gmra.mrb[108].mxu1 %vm1359_vm7, %v7330_v57  ;;  %5072 = vmatmul.mubr.msk.f32.gmra.mrb[90].mxu0 %vm248_vm1, %v242_v8  ;;  %5659 = vpow2.f32 %v1859_v4  ;;  %v1879_v57 = vmul.f32 1.442695, %v1801_v40  ;;  %v1895_v8 = vmul.f32 1.442695, %v1809_v44  ;;  %v1899_v4 = vmul.f32 1.442695, %v1811_v2 }
 0x3d1   : > { %2560 = vmatprep.mubr.f32.mxu1 %v10900_v51  ;;  %738 = vmatprep.mubr.f32.mxu0 %v10900_v51  ;;  %5661 = vpow2.f32 %v1863_v34  ;;  %v1903_v53 = vmul.f32 1.442695, %v1813_v58  ;;  %v1907_v1 = vmul.f32 1.442695, %v1815_v21  ;;  %v1911_v34 = vmul.f32 1.442695, %v1817_v24 }
 0x3d2   : > { %5663 = vpow2.f32 %v1867_v55  ;;  %v1915_v40 = vmul.f32 1.442695, %v1819_v49  ;;  %v7485_v41 = vmul.f32 1.442695, %v1821_v25  ;;  %v10961_v38 = vsub.f32 %v7217_v15, %v7359_v37  ;;  %v7513_v25 = vpop.trf.xlu1 }
 0x3d3   : > { %5665 = vpow2.f32 %v1871_v28  ;;  %v7495_v44 = vmul.f32 1.442695, %v1827_v12  ;;  %v7497_v2 = vmul.f32 1.442695, %v1829_v22  ;;  %v10962_v58 = vsub.f32 %v7241_v46, %v7359_v37  ;;  %v10974_v46 = vld [vmem:[#allocation11_spill] sm:$0xff]  ;;  %v10976_v28 = vld [vmem:[#allocation16_spill] sm:$0xff] }
 0x3d4   : > { %5130 = vmatmul.mubr.msk.f32.gmra.mrb[110].mxu1 %vm1359_vm7, %v7348_v30  ;;  %5073 = vmatmul.mubr.msk.f32.gmra.mrb[92].mxu0 %vm248_vm1, %v243_v7  ;;  %5667 = vpow2.f32 %v1875_v14  ;;  %v7487_v30 = vmul.f32 1.442695, %v1823_v59  ;;  %v7493_v29 = vmul.f32 1.442695, %v10961_v38  ;;  %v10963_v24 = vsub.f32 %v7249_v32, %v7359_v37  ;;  %v7516_v59 = vpop.f32.mrb[78].mxu0  ;;  %v10971_v7 = vld [vmem:[#allocation12_spill] sm:$0xff] }
 0x3d5   : > { %2566 = vmatprep.mubr.f32.mxu1 %v10900_v51  ;;  %744 = vmatprep.mubr.f32.mxu0 %v10900_v51  ;;  %5669 = vpow2.f32 %v1879_v57  ;;  %v7504_v21 = vmul.f32 1.442695, %v10962_v58  ;;  %10964 = vst [vmem:[#allocation74_spill] sm:$0xff] %v7516_v59  ;;  %v7527_v22 = vpop.f32.mrb[79].mxu0  ;;  %v10972_v14 = vld [vmem:[#allocation10_spill] sm:$0xff]  ;;  %v10987_v32 = vsub.f32 %v7259_v16, %v7359_v37  ;;  %v10989_v16 = vsub.f32 %v7275_v18, %v7359_v37 }
 0x3d6   : > { %5671 = vpow2.f32 %v1883_v42  ;;  %v7509_v49 = vmul.f32 1.442695, %v10963_v24  ;;  %10966 = vst [vmem:[#allocation76_spill] sm:$0xff] %v7527_v22  ;;  %v10969_v24 = vld [vmem:[#allocation5_spill] sm:$0xff]  ;;  %v2263_v15 = vpop.trf.xlu1  ;;  %v10981_v22 = vld [vmem:[#allocation60_spill] sm:$0xff] }
 0x3d7   : > { %5673 = vpow2.f32 %v1887_v52  ;;  %v10973_v42 = vld [vmem:[#allocation9_spill] sm:$0xff] }
 0x3d8   : > { %5131 = vmatmul.mubr.msk.f32.gmra.mrb[112].mxu1 %vm1359_vm7, %v7376_v54  ;;  %v7518_v54 = vpop.eup %5653  ;;  %5074 = vmatmul.mubr.msk.f32.gmra.mrb[94].mxu0 %vm248_vm1, %v244_v6  ;;  %5675 = vpow2.f32 %v1891_v60  ;;  %v10967_v60 = vld [vmem:[#allocation8_spill] sm:$0xff]  ;;  %v10970_v6 = vld [vmem:[#allocation7_spill] sm:$0xff] }
 0x3d9   : > { %2572 = vmatprep.mubr.f32.mxu1 %v10900_v51  ;;  %10965 = vst [vmem:[#allocation75_spill] sm:$0xff] %v7518_v54  ;;  %v7529_v55 = vpop.eup %5655  ;;  %2191 = vmatprep.mubr.f32.mxu0 %v7344_v39  ;;  %5677 = vpow2.f32 %v1895_v8  ;;  %v10968_v8 = vld [vmem:[#allocation6_spill] sm:$0xff]  ;;  %v10980_v54 = vld [vmem:[#allocation59_spill] sm:$0xff] }
 0x3da   : > { %v7538_v57 = vpop.eup %5657  ;;  %5679 = vpow2.f32 %v1899_v4  ;;  %v10975_v4 = vld [vmem:[#allocation24_spill] sm:$0xff] }
 0x3db   : > { %v7548_v38 = vpop.eup %5659  ;;  %v1979_v39 = vadd.f32 %v7538_v57, %v7529_v55  ;;  %5681 = vpow2.f32 %v1903_v53 }
 0x3dc   : > { %5132 = vmatmul.mubr.msk.f32.gmra.mrb[114].mxu1 %vm1359_vm7, %v7445_v33  ;;  %v7557_v52 = vpop.eup %5661  ;;  %5683 = vpow2.f32 %v1907_v1 }
 0x3dd   : > { %2578 = vmatprep.mubr.f32.mxu1 %v10900_v51  ;;  %v7565_v12 = vpop.eup %5663  ;;  %v1980_v58 = vadd.f32 %v7548_v38, %v1979_v39  ;;  %5685 = vpow2.f32 %v1911_v34  ;;  %v10983_v34 = vld [vmem:[#allocation62_spill] sm:$0xff] }
 0x3de   : > { %v7572_v17 = vpop.eup %5665  ;;  %5687 = vpow2.f32 %v1915_v40  ;;  %v10985_v40 = vld [vmem:[#allocation64_spill] sm:$0xff] }
 0x3df   : > { %v7582_v39 = vpop.eup %5667  ;;  %v1981_v53 = vadd.f32 %v7557_v52, %v1980_v58  ;;  %5689 = vpow2.f32 %v7485_v41  ;;  %v10984_v41 = vld [vmem:[#allocation63_spill] sm:$0xff] }
 0x3e0   : > { %5133 = vmatmul.mubr.msk.f32.gmra.mrb[116].mxu1 %vm1359_vm7, %v7472_v36  ;;  %v7590_v50 = vpop.eup %5669  ;;  %5691 = vpow2.f32 %v7487_v30  ;;  %v2264_v36 = vpop.trf.xlu1 }
 0x3e1   : > { %2584 = vmatprep.mubr.f32.mxu1 %v10900_v51  ;;  %v7599_v59 = vpop.eup %5671  ;;  %v1982_v33 = vadd.f32 %v7565_v12, %v1981_v53  ;;  %5693 = vpow2.f32 %v7493_v29  ;;  %v1947_v29 = vmul.f32 1.442695, %v10987_v32 }
 0x3e2   : > { %v7607_v19 = vpop.eup %5673  ;;  %5695 = vpow2.f32 %v7495_v44  ;;  %v1955_v44 = vmul.f32 1.442695, %v10989_v16 }
 0x3e3   : > { %v7618_v53 = vpop.eup %5675  ;;  %v1983_v9 = vadd.f32 %v7572_v17, %v1982_v33  ;;  %5697 = vpow2.f32 %v7497_v2  ;;  %v10990_v2 = vsub.f32 %v7285_v48, %v7359_v37  ;;  %v10992_v48 = vsub.f32 %v7302_v27, %v7359_v37 }
 0x3e4   : > { %5134 = vmatmul.mubr.msk.f32.gmra.mrb[118].mxu1 %vm1359_vm7, %v7513_v25  ;;  %v7626_v58 = vpop.eup %5677  ;;  %v10988_v25 = vsub.f32 %v7267_v61, %v7359_v37  ;;  %5699 = vpow2.f32 %v7504_v21  ;;  %v10991_v21 = vsub.f32 %v7294_v11, %v7359_v37 }
 0x3e5   : > { %2590 = vmatprep.mubr.f32.mxu1 %v10900_v51  ;;  %v7632_v47 = vpop.eup %5679  ;;  %v1984_v32 = vadd.f32 %v7582_v39, %v1983_v9  ;;  %5701 = vpow2.f32 %v7509_v49  ;;  %v1959_v1 = vmul.f32 1.442695, %v10990_v2  ;;  %v1967_v49 = vmul.f32 1.442695, %v10992_v48  ;;  %v2265_v2 = vpop.trf.xlu1 }
 0x3e6   : > { %v1951_v30 = vmul.f32 1.442695, %v10988_v25  ;;  %v7639_v33 = vpop.eup %5681  ;;  %5703 = vpow2.f32 %v1947_v29  ;;  %v1963_v18 = vmul.f32 1.442695, %v10991_v21 }
 0x3e7   : > { %v7646_v61 = vpop.eup %5683  ;;  %v1985_v25 = vadd.f32 %v7590_v50, %v1984_v32 }
 0x3e8   : > { %5135 = vmatmul.mubr.msk.f32.gmra.mrb[120].mxu1 %vm1359_vm7, %v2263_v15  ;;  %v7653_v9 = vpop.eup %5685  ;;  %5705 = vpow2.f32 %v1951_v30  ;;  %v10993_v15 = vsub.f32 %v7312_v3, %v7359_v37  ;;  %v10994_v30 = vsub.f32 %v7322_v10, %v7359_v37  ;;  %v10996_v3 = vsub.f32 %v7094_v20, %v7365_v63 }
 0x3e9   : > { %2596 = vmatprep.mubr.f32.mxu1 %v10900_v51  ;;  %v7658_v16 = vpop.eup %5687  ;;  %5707 = vpow2.f32 %v1955_v44  ;;  %v1986_v11 = vadd.f32 %v7599_v59, %v1985_v25  ;;  %v10997_v10 = vsub.f32 %v7098_v43, %v7365_v63  ;;  %v11000_v43 = vsub.f32 %v7119_v31, %v7365_v63 }
 0x3ea   : > { %v1971_v29 = vmul.f32 1.442695, %v10993_v15  ;;  %v7664_v32 = vpop.eup %5689  ;;  %5709 = vpow2.f32 %v1959_v1  ;;  %v1975_v21 = vmul.f32 1.442695, %v10994_v30  ;;  %v1853_v48 = vmul.f32 1.442695, %v10996_v3 }
 0x3eb   : > { %v7670_v27 = vpop.eup %5691  ;;  %5711 = vpow2.f32 %v1963_v18  ;;  %v1987_v44 = vadd.f32 %v7607_v19, %v1986_v11  ;;  %v1857_v37 = vmul.f32 1.442695, %v10997_v10  ;;  %v10998_v18 = vsub.f32 %v7104_v13, %v7365_v63  ;;  %v2266_v10 = vpop.trf.xlu1 }
 0x3ec   : > { %5136 = vmatmul.mubr.msk.f32.gmra.mrb[122].mxu1 %vm1359_vm7, %v2264_v36  ;;  %10995 = vst [vmem:[#allocation8_spill] sm:$0xff] %v7670_v27  ;;  %v7677_v25 = vpop.eup %5693  ;;  %5713 = vpow2.f32 %v1967_v49  ;;  %v10999_v11 = vsub.f32 %v7112_v62, %v7365_v63  ;;  %v1869_v30 = vmul.f32 1.442695, %v11000_v43  ;;  %v11001_v13 = vsub.f32 %v7125_v56, %v7365_v63 }
 0x3ed   : > { %2602 = vmatprep.mubr.f32.mxu1 %v10900_v51  ;;  %v7682_v1 = vpop.eup %5695  ;;  %5715 = vpow2.f32 %v1971_v29  ;;  %v1988_v36 = vadd.f32 %v7618_v53, %v1987_v44  ;;  %v1861_v15 = vmul.f32 1.442695, %v10998_v18  ;;  %v11003_v43 = vsub.f32 %v7137_v35, %v7365_v63 }
 0x3ee   : > { %v7688_v20 = vpop.eup %5697  ;;  %5717 = vpow2.f32 %v1975_v21  ;;  %v1865_v49 = vmul.f32 1.442695, %v10999_v11  ;;  %v1873_v3 = vmul.f32 1.442695, %v11001_v13  ;;  %v11002_v21 = vsub.f32 %v7131_v0, %v7365_v63 }
 0x3ef   : > { %v7697_v29 = vpop.eup %5699  ;;  %v1989_v44 = vadd.f32 %v7626_v58, %v1988_v36  ;;  %5719 = vpow2.f32 %v1853_v48  ;;  %v1881_v13 = vmul.f32 1.442695, %v11003_v43 }
 0x3f0   : > { %5137 = vmatmul.mubr.msk.f32.gmra.mrb[124].mxu1 %vm1359_vm7, %v2265_v2  ;;  %v1877_v62 = vmul.f32 1.442695, %v11002_v21  ;;  %v7707_v31 = vpop.eup %5701  ;;  %5721 = vpow2.f32 %v1857_v37  ;;  %v11004_v21 = vsub.f32 %v7143_v23, %v7365_v63  ;;  %v11005_v37 = vsub.f32 %v7150_v26, %v7365_v63 }
 0x3f1   : > { %2608 = vmatprep.mubr.f32.mxu1 %v10900_v51  ;;  %v7715_v36 = vpop.eup %5703  ;;  %v1990_v0 = vadd.f32 %v7632_v47, %v1989_v44  ;;  %5723 = vpow2.f32 %v1861_v15  ;;  %v11006_v23 = vsub.f32 %v7156_v45, %v7365_v63  ;;  %v11009_v45 = vsub.f32 %v10969_v24, %v7365_v63 }
 0x3f2   : > { %v7722_v11 = vpop.eup %5705  ;;  %5725 = vpow2.f32 %v1865_v49  ;;  %v1885_v56 = vmul.f32 1.442695, %v11004_v21  ;;  %v1889_v18 = vmul.f32 1.442695, %v11005_v37  ;;  %v11008_v21 = vsub.f32 %v10968_v8, %v7365_v63  ;;  %v2267_v49 = vpop.trf.xlu1 }
 0x3f3   : > { %v7731_v15 = vpop.eup %5707  ;;  %v1991_v44 = vadd.f32 %v7639_v33, %v1990_v0  ;;  %5727 = vpow2.f32 %v1869_v30  ;;  %v11007_v0 = vsub.f32 %v10967_v60, %v7365_v63  ;;  %v11010_v60 = vsub.f32 %v10970_v6, %v7365_v63 }
 0x3f4   : > { %5138 = vmatmul.mubr.msk.f32.gmra.mrb[126].mxu1 %vm1359_vm7, %v2266_v10  ;;  %v7740_v35 = vpop.eup %5709  ;;  %5729 = vpow2.f32 %v1873_v3  ;;  %v1893_v10 = vmul.f32 1.442695, %v11006_v23  ;;  %v1901_v3 = vmul.f32 1.442695, %v11008_v21  ;;  %v1905_v23 = vmul.f32 1.442695, %v11009_v45 }
 0x3f5   : > { %2614 = vmatprep.mubr.f32.mxu1 %v10900_v51  ;;  %v1897_v30 = vmul.f32 1.442695, %v11007_v0  ;;  %v7750_v37 = vpop.eup %5711  ;;  %v1992_v43 = vadd.f32 %v7646_v61, %v1991_v44  ;;  %5731 = vpow2.f32 %v1877_v62  ;;  %v1909_v0 = vmul.f32 1.442695, %v11010_v60 }
 0x3f6   : > { %v7759_v48 = vpop.eup %5713  ;;  %5733 = vpow2.f32 %v1881_v13  ;;  %v11012_v60 = vsub.f32 %v10972_v14, %v7365_v63  ;;  %v11015_v14 = vsub.f32 %v10975_v4, %v7365_v63  ;;  %v11027_v4 = vld [vmem:[#allocation73_spill] sm:$0xff] }
 0x3f7   : > { %v7769_v62 = vpop.eup %5715  ;;  %v1993_v24 = vadd.f32 %v7653_v9, %v1992_v43  ;;  %5735 = vpow2.f32 %v1885_v56  ;;  %v11013_v56 = vsub.f32 %v10973_v42, %v7365_v63 }
 0x3f8   : > { %5139 = vmatmul.mubr.msk.f32.gmra.mrb[128].mxu1 %vm1359_vm7, %v2267_v49  ;;  %v7777_v21 = vpop.eup %5717  ;;  %5737 = vpow2.f32 %v1889_v18  ;;  %v11011_v49 = vsub.f32 %v10971_v7, %v7365_v63  ;;  %v1917_v43 = vmul.f32 1.442695, %v11012_v60  ;;  %v1929_v26 = vmul.f32 1.442695, %v11015_v14  ;;  %v11025_v14 = vld [vmem:[#allocation56_spill] sm:$0xff] }
 0x3f9   : > { %3337 = vmatprep.mubr.f32.mxu1 %v10900_v51  ;;  %v1921_v13 = vmul.f32 1.442695, %v11013_v56  ;;  %v5720_v8 = vpop.eup %5719  ;;  %v1994_v6 = vadd.f32 %v7658_v16, %v1993_v24  ;;  %5739 = vpow2.f32 %v1893_v10  ;;  %v11026_v5 = vsub.f32 %v11025_v14, %v7365_v63 }
 0x3fa   : > { %v1913_v45 = vmul.f32 1.442695, %v11011_v49  ;;  %v5722_v7 = vpop.eup %5721  ;;  %5741 = vpow2.f32 %v1897_v30  ;;  %v11014_v30 = vsub.f32 %v10974_v46, %v7365_v63  ;;  %v11016_v49 = vsub.f32 %v10976_v28, %v7365_v63  ;;  %v11028_v28 = vld [vmem:[#allocation76_spill] sm:$0xff] }
 0x3fb   : > { %v5724_v60 = vpop.eup %5723  ;;  %v1995_v10 = vadd.f32 %v7664_v32, %v1994_v6  ;;  %5743 = vpow2.f32 %v1901_v3  ;;  %v2016_v24 = vadd.f32 %v5722_v7, %v5720_v8  ;;  %v5230_v56 = vpack.c.bf16 %v5722_v7, %v5720_v8  ;;  %v7813_v7 = vpop.xlane.xlu0 %1000 }
 0x3fc   : > { %v5726_v44 = vpop.eup %5725  ;;  %5745 = vpow2.f32 %v1905_v23  ;;  %v1925_v18 = vmul.f32 1.442695, %v11014_v30  ;;  %v1933_v42 = vmul.f32 1.442695, %v11016_v49  ;;  %v11017_v46 = vpack.c.bf16 %v7538_v57, %v7529_v55  ;;  %v11020_v49 = vld [vmem:[#allocation71_spill] sm:$0xff]  ;;  %v11023_v57 = vld [vmem:[#allocation21_spill] sm:$0xff] }
 0x3fd   : > { %v5728_v2 = vpop.eup %5727  ;;  %v1996_v6 = vadd.f32 %v7670_v27, %v1995_v10  ;;  %5747 = vpow2.f32 %v1909_v0  ;;  %v2017_v3 = vadd.f32 %v5724_v60, %v2016_v24  ;;  %5231 = vmatprep.subr.bf16.mxu0 %v5230_v56  ;;  %v5234_v8 = vpack.c.bf16 %v5726_v44, %v5724_v60  ;;  %v11022_v10 = vld [vmem:[#allocation74_spill] sm:$0xff] }
 0x3fe   : > { %v5730_v23 = vpop.eup %5729  ;;  %5749 = vpow2.f32 %v1913_v45  ;;  %5233 = vmatpush1.bf16.msra.mxu0 %v11017_v46  ;;  %v11024_v46 = vsub.f32 %v11023_v57, %v7365_v63  ;;  %v1941_v30 = vmul.f32 1.442695, %v11026_v5  ;;  %v11032_v5 = vpack.c.bf16 %v7557_v52, %v7548_v38 }
 0x3ff   : > { %v5732_v24 = vpop.eup %5731  ;;  %v1997_v60 = vadd.f32 %v7677_v25, %v1996_v6  ;;  %5751 = vpow2.f32 %v1917_v43  ;;  %v2018_v45 = vadd.f32 %v5726_v44, %v2017_v3  ;;  %5235 = vmatprep.subr.bf16.mxu0 %v5234_v8  ;;  %v5238_v56 = vpack.c.bf16 %v5730_v23, %v5728_v2  ;;  %v7849_v52 = vpop.xlane.xlu0 %1006 }
 0x400   : > { %v5734_v55 = vpop.eup %5733  ;;  %5753 = vpow2.f32 %v1921_v13  ;;  %v1937_v27 = vmul.f32 1.442695, %v11024_v46  ;;  %v11029_v13 = vld [vmem:[#allocation57_spill] sm:$0xff]  ;;  %v11031_v46 = vsub.f32 %v10980_v54, %v7365_v63  ;;  %vm1081_vm13 = vcmp.eq.f32.partialorder %v7813_v7, inf }
 0x401   : > { %v5736_v51 = vpop.eup %5735  ;;  %v1998_v6 = vadd.f32 %v7682_v1, %v1997_v60  ;;  %5755 = vpow2.f32 %v1925_v18  ;;  %v2019_v44 = vadd.f32 %v5728_v2, %v2018_v45  ;;  %v5242_v43 = vpack.c.bf16 %v5734_v55, %v5732_v24  ;;  %v11034_v54 = vld [vmem:[#allocation61_spill] sm:$0xff] }
 0x402   : > { %v5738_v3 = vpop.eup %5737  ;;  %5757 = vpow2.f32 %v1929_v26  ;;  %v11030_v8 = vsub.f32 %v11029_v13, %v7365_v63  ;;  %v1949_v14 = vmul.f32 1.442695, %v11031_v46  ;;  %5237 = vmatpush1.bf16.msra.mxu0 %v11032_v5  ;;  %v11033_v45 = vsub.f32 %v10981_v22, %v7365_v63 }
 0x403   : > { %v7840_v0 = vpop.eup %5739  ;;  %v1999_v18 = vadd.f32 %v7688_v20, %v1998_v6  ;;  %5759 = vpow2.f32 %v1933_v42  ;;  %v2020_v2 = vadd.f32 %v5730_v23, %v2019_v44  ;;  %5239 = vmatprep.subr.bf16.mxu0 %v5238_v56  ;;  %v5246_v26 = vpack.c.bf16 %v5738_v3, %v5736_v51  ;;  %v11037_v44 = vld [vmem:[#allocation75_spill] sm:$0xff] }
 0x404   : > { %v1945_v57 = vmul.f32 1.442695, %v11030_v8  ;;  %v5742_v60 = vpop.eup %5741  ;;  %5761 = vpow2.f32 %v1937_v27  ;;  %v1953_v13 = vmul.f32 1.442695, %v11033_v45  ;;  %v11035_v8 = vsub.f32 %v11034_v54, %v7365_v63  ;;  %v11036_v27 = vld [vmem:[#allocation58_spill] sm:$0xff] }
 0x405   : > { %v7851_v38 = vpop.eup %5743  ;;  %v2000_v6 = vadd.f32 %v7697_v29, %v1999_v18  ;;  %5763 = vpow2.f32 %v1941_v30  ;;  %v2021_v42 = vadd.f32 %v5732_v24, %v2020_v2  ;;  %v5250_v23 = vpack.c.bf16 %v5742_v60, %v7840_v0 }
 0x406   : > { %v1957_v46 = vmul.f32 1.442695, %v11035_v8  ;;  %v7855_v56 = vpop.eup %5745  ;;  %v895_v22 = vmul.f32 %v11037_v44, %v11036_v27  ;;  %5765 = vpow2.f32 %v1945_v57  ;;  %v11038_v5 = vsub.f32 %v10983_v34, %v7365_v63 }
 0x407   : > { %v11039_v54 = vsub.f32 %v10984_v41, %v7365_v63  ;;  %v11040_v30 = vpack.c.bf16 %v7572_v17, %v7565_v12  ;;  %v7868_v24 = vpop.eup %5747  ;;  %v2001_v18 = vadd.f32 %v7707_v31, %v2000_v6  ;;  %5767 = vpow2.f32 %v1949_v14  ;;  %v11042_v12 = vld [vmem:[#allocation65_spill] sm:$0xff] }
 0x408   : > { %v1961_v45 = vmul.f32 1.442695, %v11038_v5  ;;  %v2022_v2 = vadd.f32 %v5734_v55, %v2021_v42  ;;  %v5254_v57 = vpack.c.bf16 %v7855_v56, %v7851_v38  ;;  %v7873_v34 = vpop.eup %5749  ;;  %vm896_vm1 = vcmp.eq.f32.partialorder %v11036_v27, inf }
 0x409   : > { %v1965_v8 = vmul.f32 1.442695, %v11039_v54  ;;  %5241 = vmatpush1.bf16.msra.mxu0 %v11040_v30  ;;  %5769 = vpow2.f32 %v1953_v13  ;;  %v11041_v41 = vsub.f32 %v10985_v40, %v7365_v63  ;;  %v11043_v44 = vsub.f32 %v11042_v12, %v7365_v63  ;;  %v7882_v6 = vpop.eup %5751  ;;  %v11044_v40 = vld [vmem:[#allocation66_spill] sm:$0xff]  ;;  %v7896_v12 = vpop.xlane.xlu0 %808 }
 0x40a   : > { %5243 = vmatprep.subr.bf16.mxu0 %v5242_v43  ;;  %v2002_v55 = vadd.f32 %v7715_v36, %v2001_v18  ;;  %5771 = vpow2.f32 %v1957_v46  ;;  %v2023_v43 = vadd.f32 %v5736_v51, %v2022_v2  ;;  %v5258_v14 = vpack.c.bf16 %v7873_v34, %v7868_v24  ;;  %v7887_v42 = vpop.eup %5753 }
 0x40b   : > { %v1969_v17 = vmul.f32 1.442695, %v11041_v41  ;;  %v1973_v5 = vmul.f32 1.442695, %v11043_v44  ;;  %v897_v13 = vsel %vm896_vm1, %v11036_v27, %v895_v22  ;;  %5773 = vpow2.f32 %v1961_v45  ;;  %v7898_v46 = vpop.eup %5755 }
 0x40c   : > { %v11045_v54 = vsub.f32 %v11044_v40, %v7365_v63  ;;  %v11046_v41 = vpack.c.bf16 %v7590_v50, %v7582_v39  ;;  %v2003_v51 = vadd.f32 %v7722_v11, %v2002_v55  ;;  %5775 = vpow2.f32 %v1965_v8  ;;  %v7903_v45 = vpop.eup %5757  ;;  %v7907_v50 = vpop.xlane.xlu1 %817 }
 0x40d   : > { %v2024_v18 = vadd.f32 %v5738_v3, %v2023_v43  ;;  %v5262_v22 = vpack.c.bf16 %v7887_v42, %v7882_v6  ;;  %vm898_vm10 = vcmp.eq.f32.partialorder %v11036_v27, 0.0  ;;  %v899_v63 = vand.u32 2147483648, %v11036_v27  ;;  %v7909_v39 = vpop.eup %5759  ;;  %v7929_v40 = vpop.xlane.xlu0 %814 }
 0x40e   : > { %v1977_v30 = vmul.f32 1.442695, %v11045_v54  ;;  %5245 = vmatpush1.bf16.msra.mxu0 %v11046_v41  ;;  %5777 = vpow2.f32 %v1969_v17  ;;  %v2004_v2 = vadd.f32 %v7731_v15, %v2003_v51  ;;  %v7915_v8 = vpop.eup %5761  ;;  %v11047_v44 = vpack.c.bf16 %v7607_v19, %v7599_v59 }
 0x40f   : > { %5247 = vmatprep.subr.bf16.mxu0 %v5246_v26  ;;  %5779 = vpow2.f32 %v1973_v5  ;;  %v2025_v3 = vadd.f32 %v7840_v0, %v2024_v18  ;;  %v5266_v26 = vpack.c.bf16 %v7903_v45, %v7898_v46  ;;  %v900_v27 = vsel %vm898_vm10, %v899_v63, %v897_v13  ;;  %v7920_v17 = vpop.eup %5763 }
 0x410   : > { %5781 = vpow2.f32 %v1977_v30  ;;  %v2005_v55 = vadd.f32 %v7740_v35, %v2004_v2  ;;  %v5270_v0 = vpack.c.bf16 %v7915_v8, %v7909_v39  ;;  %v7926_v5 = vpop.eup %5765  ;;  %v11048_v54 = vpack.c.bf16 %v7626_v58, %v7618_v53 }
 0x411   : > { %v2026_v43 = vadd.f32 %v5742_v60, %v2025_v3  ;;  %5783 = vrsqrt.f32 %v7907_v50  ;;  %v7931_v19 = vpop.eup %5767  ;;  %v5274_v60 = vpack.c.bf16 %v7926_v5, %v7920_v17  ;;  %v1144_v30 = vmax.f32 %v900_v27, 1e-12 }
 0x412   : > { %5249 = vmatpush1.bf16.msra.mxu0 %v11047_v44  ;;  %5785 = vrsqrt.f32 %v7813_v7  ;;  %v2006_v59 = vadd.f32 %v7750_v37, %v2005_v55  ;;  %vm910_vm11 = vcmp.eq.f32.partialorder %v7907_v50, inf  ;;  %vm912_vm12 = vcmp.eq.f32.partialorder %v7907_v50, 0.0 }
 0x413   : > { %5251 = vmatprep.subr.bf16.mxu0 %v5250_v23  ;;  %v2027_v13 = vadd.f32 %v7851_v38, %v2026_v43  ;;  %5787 = vrsqrt.f32 %v7849_v52  ;;  %v7938_v23 = vpop.eup %5769  ;;  %vm1083_vm14 = vcmp.eq.f32.partialorder %v7813_v7, 0.0  ;;  %vm1095_vm15 = vcmp.eq.f32.partialorder %v7849_v52, inf }
 0x414   : > { %5789 = vrsqrt.f32 %v7896_v12  ;;  %v7944_v41 = vpop.eup %5771  ;;  %v2007_v51 = vadd.f32 %v7759_v48, %v2006_v59  ;;  %v5278_v18 = vpack.c.bf16 %v7938_v23, %v7931_v19  ;;  %vm1097_vm0 = vcmp.eq.f32.partialorder %v7849_v52, 0.0 }
 0x415   : > { %v2028_v38 = vadd.f32 %v7855_v56, %v2027_v13  ;;  %5791 = vrsqrt.f32 %v7929_v40  ;;  %v7951_v63 = vpop.eup %5773  ;;  %v11049_v56 = vpack.c.bf16 %v7639_v33, %v7632_v47  ;;  %v913_v47 = vand.u32 2147483648, %v7907_v50 }
 0x416   : > { %5253 = vmatpush1.bf16.msra.mxu0 %v11048_v54  ;;  %v7953_v2 = vpop.eup %5775  ;;  %v2008_v58 = vadd.f32 %v7769_v62, %v2007_v51  ;;  %v5282_v3 = vpack.c.bf16 %v7951_v63, %v7944_v41  ;;  %5793 = vrcp.f32 %v1144_v30  ;;  %v1098_v30 = vand.u32 2147483648, %v7849_v52 }
 0x417   : > { %5255 = vmatprep.subr.bf16.mxu0 %v5254_v57  ;;  %v2029_v53 = vadd.f32 %v7868_v24, %v2028_v38  ;;  %v11050_v51 = vpack.c.bf16 %v7653_v9, %v7646_v61  ;;  %vm889_vm2 = vcmp.eq.f32.partialorder %v7896_v12, inf  ;;  %vm891_vm3 = vcmp.eq.f32.partialorder %v7896_v12, 0.0 }
 0x418   : > { %v7959_v44 = vpop.eup %5777  ;;  %v7967_v27 = vadd.f32 %v7777_v21, %v2008_v58  ;;  %vm903_vm4 = vcmp.eq.f32.partialorder %v7929_v40, inf  ;;  %vm905_vm5 = vcmp.eq.f32.partialorder %v7929_v40, 0.0 }
 0x419   : > { %v7964_v57 = vpop.eup %5779  ;;  %v2030_v55 = vadd.f32 %v7873_v34, %v2029_v53  ;;  %v5286_v24 = vpack.c.bf16 %v7959_v44, %v7953_v2  ;;  %v1084_v34 = vand.u32 2147483648, %v7813_v7 }
 0x41a   : > { %5257 = vmatpush1.bf16.msra.mxu0 %v11049_v56  ;;  %v7973_v43 = vpop.eup %5781  ;;  %v892_v56 = vand.u32 2147483648, %v7896_v12 }
 0x41b   : > { %5259 = vmatprep.subr.bf16.mxu0 %v5258_v14  ;;  %v5784_v33 = vpop.eup %5783  ;;  %v2031_v59 = vadd.f32 %v7882_v6, %v2030_v55  ;;  %v5290_v14 = vpack.c.bf16 %v7973_v43, %v7964_v57 }
 0x41c   : > { %v5786_v13 = vpop.eup %5785  ;;  %v909_v54 = vmul.f32 %v5784_v33, %v7907_v50 }
 0x41d   : > { %v5788_v38 = vpop.eup %5787  ;;  %v2032_v58 = vadd.f32 %v7887_v42, %v2031_v59  ;;  %v1080_v53 = vmul.f32 %v5786_v13, %v7813_v7 }
 0x41e   : > { %5261 = vmatpush1.bf16.msra.mxu0 %v11050_v51  ;;  %v5790_v55 = vpop.eup %5789  ;;  %v911_v61 = vsel %vm910_vm11, %v7907_v50, %v909_v54  ;;  %v1094_v9 = vmul.f32 %v5788_v38, %v7849_v52  ;;  %v11051_v51 = vpack.c.bf16 %v7664_v32, %v7658_v16 }
 0x41f   : > { %5263 = vmatprep.subr.bf16.mxu0 %v5262_v22  ;;  %v5792_v33 = vpop.eup %5791  ;;  %v2033_v59 = vadd.f32 %v7898_v46, %v2032_v58  ;;  %v1082_v6 = vsel %vm1081_vm13, %v7813_v7, %v1080_v53  ;;  %v888_v42 = vmul.f32 %v5790_v55, %v7896_v12  ;;  %v914_v22 = vsel %vm912_vm12, %v913_v47, %v911_v61 }
 0x420   : > { %v1085_v13 = vsel %vm1083_vm14, %v1084_v34, %v1082_v6  ;;  %v1096_v54 = vsel %vm1095_vm15, %v7849_v52, %v1094_v9  ;;  %v902_v38 = vmul.f32 %v5792_v33, %v7929_v40  ;;  %v1146_v58 = vmax.f32 %v914_v22, 1e-12  ;;  %v5794_v47 = vpop.eup %5793 }
 0x421   : > { %v2034_v53 = vadd.f32 %v7903_v45, %v2033_v59  ;;  %v1223_v55 = vmax.f32 %v1085_v13, 1e-12  ;;  %v890_v50 = vsel %vm889_vm2, %v7896_v12, %v888_v42  ;;  %v906_v7 = vand.u32 2147483648, %v7929_v40  ;;  %v11052_v45 = vld [vmem:[#allocation8_spill] sm:$0xff] }
 0x422   : > { %5265 = vmatpush1.bf16.msra.mxu0 %v11051_v51  ;;  %v1099_v16 = vsel %vm1097_vm0, %v1098_v30, %v1096_v54  ;;  %v904_v32 = vsel %vm903_vm4, %v7929_v40, %v902_v38  ;;  %v893_v34 = vsel %vm891_vm3, %v892_v56, %v890_v50  ;;  %5795 = vrcp.f32 %v1146_v58  ;;  %v11057_v42 = vld [vmem:[#allocation36_spill] sm:$0xff]  ;;  %v11060_v51 = vld [vmem:[#allocation14_spill] sm:$0xff]  ;;  %v11061_v58 = vld [vmem:[#allocation13_spill] sm:$0xff] }
 0x423   : > { %5267 = vmatprep.subr.bf16.mxu0 %v5266_v26  ;;  %v2035_v61 = vadd.f32 %v7909_v39, %v2034_v53  ;;  %5797 = vrcp.f32 %v1223_v55  ;;  %v1143_v9 = vmax.f32 %v893_v34, 1e-12  ;;  %v907_v46 = vsel %vm905_vm5, %v906_v7, %v904_v32  ;;  %v11062_v55 = vld [vmem:[#allocation15_spill] sm:$0xff]  ;;  %v11065_v34 = vld [vmem:[#allocation18_spill] sm:$0xff] }
 0x424   : > { %v11053_v26 = vpack.c.bf16 %v7677_v25, %v11052_v45  ;;  %v1145_v52 = vmax.f32 %v907_v46, 1e-12  ;;  %v1225_v33 = vmax.f32 %v1099_v16, 1e-12  ;;  %v11054_v40 = vpack.c.bf16 %v7688_v20, %v7682_v1  ;;  %v11056_v20 = vld [vmem:[#allocation37_spill] sm:$0xff]  ;;  %v11064_v16 = vld [vmem:[#allocation19_spill] sm:$0xff] }
 0x425   : > { %v2036_v30 = vadd.f32 %v7915_v8, %v2035_v61  ;;  %5799 = vrcp.f32 %v1143_v9  ;;  %v11055_v39 = vpack.c.bf16 %v7707_v31, %v7697_v29  ;;  %v1170_v1 = vmul.f32 10.0, %v5794_v47  ;;  %v11068_v9 = vld [vmem:[#allocation52_spill] sm:$0xff] }
 0x426   : > { %5269 = vmatpush1.bf16.msra.mxu0 %v11053_v26  ;;  %5801 = vrcp.f32 %v1145_v52  ;;  %v11058_v29 = vpack.c.bf16 %v7722_v11, %v7715_v36  ;;  %v11063_v36 = vld [vmem:[#allocation22_spill] sm:$0xff]  ;;  %v11067_v61 = vpack.c.bf16 %v7740_v35, %v7731_v15  ;;  %v11069_v52 = vld [vmem:[#allocation53_spill] sm:$0xff] }
 0x427   : > { %5271 = vmatprep.subr.bf16.mxu0 %v5270_v0  ;;  %v2037_v12 = vadd.f32 %v7920_v17, %v2036_v30  ;;  %5803 = vrcp.f32 %v1225_v33  ;;  %v1201_v50 = vmul.f32 %v1170_v1, %v11062_v55  ;;  %v11071_v35 = vld [vmem:[#allocation38_spill] sm:$0xff] }
 0x429   : > { %v2038_v56 = vadd.f32 %v7926_v5, %v2037_v12  ;;  %v11070_v12 = vld [vmem:[#allocation39_spill] sm:$0xff] }
 0x42a   : > { %5273 = vmatpush1.bf16.msra.mxu0 %v11054_v40 }
 0x42b   : > { %5275 = vmatprep.subr.bf16.mxu0 %v5274_v60  ;;  %v2039_v25 = vadd.f32 %v7931_v19, %v2038_v56  ;;  %v11059_v19 = vld [vmem:[#allocation17_spill] sm:$0xff] }
 0x42c   : > { %v5796_v59 = vpop.eup %5795 }
 0x42d   : > { %v5798_v8 = vpop.eup %5797  ;;  %v2040_v0 = vadd.f32 %v7938_v23, %v2039_v25  ;;  %v1174_v5 = vmul.f32 10.0, %v5796_v59  ;;  %v1202_v23 = vmul.f32 %v1170_v1, %v11059_v19  ;;  %v11072_v25 = vpack.c.bf16 %v7759_v48, %v7750_v37  ;;  %v11075_v59 = vld [vmem:[#allocation55_spill] sm:$0xff]  ;;  %v11076_v48 = vld [vmem:[#allocation69_spill] sm:$0xff]  ;;  %v2962_v1 = vpop.permute.xlu0 %2961 }
 0x42e   : > { %5277 = vmatpush1.bf16.msra.mxu0 %v11055_v39  ;;  %v1280_v6 = vmul.f32 %v5798_v8, %v11056_v20  ;;  %v1279_v17 = vmul.f32 %v5798_v8, %v11057_v42  ;;  %v11077_v37 = vpack.c.bf16 %v11020_v49, %v11076_v48  ;;  %v11078_v39 = vld [vmem:[#allocation67_spill] sm:$0xff]  ;;  %v11079_v8 = vld [vmem:[#allocation70_spill] sm:$0xff] }
 0x42f   : > { %5279 = vmatprep.subr.bf16.mxu0 %v5278_v18  ;;  %v5800_v60 = vpop.eup %5799  ;;  %v2041_v22 = vadd.f32 %v7944_v41, %v2040_v0  ;;  %v1206_v11 = vmul.f32 %v1174_v5, %v11063_v36 }
 0x430   : > { %v5802_v13 = vpop.eup %5801  ;;  %3145 = vxpose.xlu0.b32.start [1/4] (short) %v1280_v6, 128  ;;  %v1168_v31 = vmul.f32 10.0, %v5800_v60  ;;  %3113 = vxpose.xlu1.b32.start [1/4] (short) %v1279_v17, 128 }
 0x431   : > { %v2042_v54 = vadd.f32 %v7951_v63, %v2041_v22  ;;  %v1172_v18 = vmul.f32 10.0, %v5802_v13  ;;  %v5804_v7 = vpop.eup %5803  ;;  %v11066_v63 = vld [vmem:[#allocation20_spill] sm:$0xff] }
 0x432   : > { %5281 = vmatpush1.bf16.msra.mxu0 %v11058_v29  ;;  %v1200_v38 = vmul.f32 %v1168_v31, %v11060_v51  ;;  %v1199_v53 = vmul.f32 %v1168_v31, %v11061_v58  ;;  %v1284_v40 = vmul.f32 %v5804_v7, %v11070_v12  ;;  %v1283_v56 = vmul.f32 %v5804_v7, %v11071_v35 }
 0x433   : > { %5283 = vmatprep.subr.bf16.mxu0 %v5282_v3  ;;  %v2043_v47 = vadd.f32 %v7953_v2, %v2042_v54  ;;  %v1204_v32 = vmul.f32 %v1172_v18, %v11064_v16  ;;  %v1203_v41 = vmul.f32 %v1172_v18, %v11065_v34  ;;  %v1205_v3 = vmul.f32 %v1174_v5, %v11066_v63 }
 0x434   : > { %3146 = vxpose.xlu0.b32.cont [2/4] (short) %v11068_v9, 128  ;;  %v5374_v46 = vpack.c.bf16 %v1202_v23, %v1200_v38  ;;  %v5376_v45 = vpack.c.bf16 %v1201_v50, %v1199_v53  ;;  %3114 = vxpose.xlu1.b32.cont [2/4] (short) %v11069_v52, 128 }
 0x435   : > { %v2044_v26 = vadd.f32 %v7959_v44, %v2043_v47  ;;  %v5378_v30 = vpack.c.bf16 %v1206_v11, %v1204_v32  ;;  %v5380_v33 = vpack.c.bf16 %v1205_v3, %v1203_v41  ;;  %v11073_v44 = vpack.c.bf16 %v7777_v21, %v7769_v62  ;;  %v11084_v21 = vld [vmem:[#allocation72_spill] sm:$0xff] }
 0x436   : > { %5285 = vmatpush1.bf16.msra.mxu0 %v11067_v61  ;;  %5375 = vmatprep.subr.bf16.mxu1 %v5374_v46  ;;  %v11083_v62 = vpack.c.bf16 %v11028_v28, %v11027_v4  ;;  %v11085_v0 = vpack.c.bf16 %v11022_v10, %v11084_v21 }
 0x437   : > { %5287 = vmatprep.subr.bf16.mxu0 %v5286_v24  ;;  %v2045_v15 = vadd.f32 %v7964_v57, %v2044_v26  ;;  %5377 = vmatpush1.bf16.msra.mxu1 %v5376_v45  ;;  %v11074_v24 = vld [vmem:[#allocation54_spill] sm:$0xff]  ;;  %v11080_v57 = vld [vmem:[#allocation68_spill] sm:$0xff] }
 0x438   : > { %3147 = vxpose.xlu0.b32.cont [3/4] (short) %v1284_v40, 128  ;;  %3115 = vxpose.xlu1.b32.cont [3/4] (short) %v1283_v56, 128 }
 0x439   : > { %v8096_v2 = vadd.f32 %v7973_v43, %v2045_v15  ;;  %5379 = vmatprep.subr.bf16.mxu1 %v5378_v30  ;;  %v11081_v43 = vpack.c.bf16 %v11079_v8, %v11080_v57 }
 0x43a   : > { %5289 = vmatpush1.bf16.msra.mxu0 %v11072_v25 }
 0x43b   : > { %5291 = vmatprep.subr.bf16.mxu0 %v5290_v14  ;;  %5381 = vmatpush1.bf16.msra.mxu1 %v5380_v33  ;;  %v11082_v14 = vmov 0.0  }
 0x43c   : > { %3148 = vxpose.xlu0.b32.end [4/4] (short) %v11074_v24, 128  ;;  %3116 = vxpose.xlu1.b32.end [4/4] (short) %v11075_v59, 128 }
 0x43e   : > { %5293 = vmatpush1.bf16.msra.mxu0 %v11073_v44 }
 0x43f   : > { %5303 = vmatprep.subr.bf16.mxu0 %v11077_v37 }
 0x441   : > { %2192 = vmatmul.mubr.f32.vlgmr.msra.gmra.mrb[96].mxu0 %v11078_v39 }
 0x442   : > { %5305 = vmatpush1.bf16.msra.mxu0 %v11081_v43  ;;  %3029 = vmatprep.mubr.f32.mxu0 %v11082_v14  ;;  %v6237_v43 = vld [vmem:[%s10589_s2] sm:$0xf] }
 0x443   : > { %5307 = vmatprep.subr.bf16.mxu0 %v11083_v62 }
 0x446   : > { %5309 = vmatpush1.bf16.msra.mxu0 %v11085_v0 }
 0x449   : > { %5140 = vmatmul.mubr.msk.f32.vlgmr.msra.gmra.mrb[98].mxu0 %vm1359_vm7, %v2962_v1 }
 0x44f   : > { %v8121_v49 = vpop.f32.mrb[66].mxu1 }
 0x450   : > { %v8123_v20 = vpop.f32.mrb[67].mxu1 }
 0x451   : > { %11086 = vst [vmem:[#allocation6_spill] sm:$0xff] %v8123_v20 }
 0x453   : > { %v8125_v6 = vpop.f32.mrb[68].mxu1 }
 0x454   : > { %v8127_v42 = vpop.f32.mrb[69].mxu1 }
 0x455   : > { %11087 = vst [vmem:[#allocation5_spill] sm:$0xff] %v8127_v42 }
 0x457   : > { %v8129_v17 = vpop.f32.mrb[70].mxu1 }
 0x458   : > { %v2621_v4 = vmax.f32 %v8121_v49, %v8129_v17  ;;  %v8133_v28 = vpop.f32.mrb[71].mxu1 }
 0x459   : > { %11088 = vst [vmem:[#allocation7_spill] sm:$0xff] %v8133_v28  ;;  %v2658_v10 = vmax.f32 %v8123_v20, %v8133_v28 }
 0x45b   : > { %v8137_v5 = vpop.f32.mrb[72].mxu1 }
 0x45c   : > { %v2622_v60 = vmax.f32 %v8125_v6, %v8137_v5  ;;  %v8141_v22 = vpop.f32.mrb[73].mxu1 }
 0x45d   : > { %11089 = vst [vmem:[#allocation12_spill] sm:$0xff] %v8141_v22  ;;  %v2659_v13 = vmax.f32 %v8127_v42, %v8141_v22 }
 0x45f   : > { %v8145_v29 = vpop.f32.mrb[74].mxu1 }
 0x460   : > { %v2623_v31 = vmax.f32 %v2621_v4, %v8145_v29  ;;  %v8148_v54 = vpop.f32.mrb[75].mxu1 }
 0x461   : > { %11090 = vst [vmem:[#allocation10_spill] sm:$0xff] %v8148_v54  ;;  %v2660_v19 = vmax.f32 %v2658_v10, %v8148_v54 }
 0x463   : > { %v8151_v23 = vpop.f32.mrb[76].mxu1 }
 0x464   : > { %v2624_v18 = vmax.f32 %v2622_v60, %v8151_v23  ;;  %v8154_v51 = vpop.f32.mrb[77].mxu1 }
 0x465   : > { %11091 = vst [vmem:[#allocation9_spill] sm:$0xff] %v8154_v51  ;;  %v2661_v38 = vmax.f32 %v2659_v13, %v8154_v51 }
 0x467   : > { %v8157_v58 = vpop.f32.mrb[78].mxu1 }
 0x468   : > { %v2625_v53 = vmax.f32 %v2623_v31, %v8157_v58  ;;  %v8160_v55 = vpop.f32.mrb[79].mxu1 }
 0x469   : > { %11092 = vst [vmem:[#allocation11_spill] sm:$0xff] %v8160_v55  ;;  %v2662_v50 = vmax.f32 %v2660_v19, %v8160_v55 }
 0x46b   : > { %v8163_v36 = vpop.f32.mrb[80].mxu1 }
 0x46c   : > { %v2626_v11 = vmax.f32 %v2624_v18, %v8163_v36  ;;  %v8166_v7 = vpop.f32.mrb[81].mxu1 }
 0x46d   : > { %11093 = vst [vmem:[#allocation24_spill] sm:$0xff] %v8166_v7  ;;  %v2663_v47 = vmax.f32 %v2661_v38, %v8166_v7 }
 0x46f   : > { %v8169_v16 = vpop.f32.mrb[82].mxu1 }
 0x470   : > { %v2627_v32 = vmax.f32 %v2625_v53, %v8169_v16  ;;  %v8172_v34 = vpop.f32.mrb[83].mxu1 }
 0x471   : > { %11094 = vst [vmem:[#allocation16_spill] sm:$0xff] %v8172_v34  ;;  %v2664_v41 = vmax.f32 %v2662_v50, %v8172_v34  ;;  %v11126_v34 = vld [vmem:[#allocation35_spill] sm:$0xff] }
 0x473   : > { %v8175_v63 = vpop.f32.mrb[84].mxu1 }
 0x474   : > { %v2628_v3 = vmax.f32 %v2626_v11, %v8175_v63  ;;  %v8178_v61 = vpop.f32.mrb[85].mxu1 }
 0x475   : > { %11095 = vst [vmem:[#allocation59_spill] sm:$0xff] %v8178_v61  ;;  %v2665_v9 = vmax.f32 %v2663_v47, %v8178_v61  ;;  %v11105_v47 = vld [vmem:[#allocation44_spill] sm:$0xff] }
 0x477   : > { %v8181_v46 = vpop.f32.mrb[86].mxu1 }
 0x478   : > { %v2629_v45 = vmax.f32 %v2627_v32, %v8181_v46  ;;  %v8184_v26 = vpop.f32.mrb[87].mxu1 }
 0x479   : > { %11096 = vst [vmem:[#allocation60_spill] sm:$0xff] %v8184_v26  ;;  %v2666_v52 = vmax.f32 %v2664_v41, %v8184_v26 }
 0x47b   : > { %v8187_v30 = vpop.f32.mrb[88].mxu1 }
 0x47c   : > { %v2630_v33 = vmax.f32 %v2628_v3, %v8187_v30  ;;  %v8190_v12 = vpop.f32.mrb[89].mxu1 }
 0x47d   : > { %11097 = vst [vmem:[#allocation62_spill] sm:$0xff] %v8190_v12  ;;  %v2667_v40 = vmax.f32 %v2665_v9, %v8190_v12 }
 0x47f   : > { %v8193_v15 = vpop.f32.mrb[90].mxu1 }
 0x480   : > { %v2631_v35 = vmax.f32 %v2629_v45, %v8193_v15  ;;  %v8196_v56 = vpop.f32.mrb[91].mxu1  ;;  %v11107_v45 = vld [vmem:[#allocation49_spill] sm:$0xff] }
 0x481   : > { %11098 = vst [vmem:[#allocation63_spill] sm:$0xff] %v8196_v56  ;;  %v2668_v25 = vmax.f32 %v2666_v52, %v8196_v56 }
 0x483   : > { %v8199_v44 = vpop.f32.mrb[92].mxu1 }
 0x484   : > { %v2632_v24 = vmax.f32 %v2630_v33, %v8199_v44  ;;  %v8202_v59 = vpop.f32.mrb[93].mxu1 }
 0x485   : > { %11099 = vst [vmem:[#allocation64_spill] sm:$0xff] %v8202_v59  ;;  %v2669_v48 = vmax.f32 %v2667_v40, %v8202_v59 }
 0x487   : > { %v8205_v37 = vpop.f32.mrb[94].mxu1 }
 0x488   : > { %v2633_v39 = vmax.f32 %v2631_v35, %v8205_v37  ;;  %v8208_v8 = vpop.f32.mrb[95].mxu1 }
 0x489   : > { %11100 = vst [vmem:[#allocation71_spill] sm:$0xff] %v8208_v8  ;;  %v2670_v57 = vmax.f32 %v2668_v25, %v8208_v8  ;;  %v11123_v8 = vld [vmem:[#allocation32_spill] sm:$0xff] }
 0x48a   : > { %3870 = vrot.lane.b32.xlu1 %v6237_v43, %s6305_s5  ;;  %s6245_s5 = scalar_lea.vmem %s6244_s30, 256 }
 0x48b   : > { %v8214_v62 = vpop.f32.mrb[96].mxu1  ;;  %v8251_v25 = vpop.f32.mrb[80].mxu0  ;;  %p6247_p1 = scmp.lt.s32.totalorder %s6245_s5, %s6239_s29 }
 0x48c   : > { %v2634_v21 = vmax.f32 %v2632_v24, %v8214_v62  ;;  %v8217_v0 = vpop.f32.mrb[97].mxu1  ;;  %11109 = vst [vmem:[#allocation61_spill] sm:$0xff] %v8251_v25  ;;  %v11110_v24 = vld [vmem:[#allocation51_spill] sm:$0xff] }
 0x48d   : > { %11101 = vst [vmem:[#allocation74_spill] sm:$0xff] %v8217_v0  ;;  %v2671_v1 = vmax.f32 %v2669_v48, %v8217_v0  ;;  %p6248_p2 = por %p6247_p1, %p6246_p0 }
 0x48f   : > { %v8220_v4 = vpop.f32.mrb[98].mxu1  ;;  %p6249_p3 = pnand %p6248_p2, %p6242_p13 }
 0x490   : > { %v2635_v10 = vmax.f32 %v2633_v39, %v8220_v4  ;;  %v8223_v60 = vpop.f32.mrb[99].mxu1  ;;  %v8255_v39 = vpop.f32.mrb[81].mxu0 }
 0x491   : > { %11102 = vst [vmem:[#allocation21_spill] sm:$0xff] %v8223_v60  ;;  %v2672_v13 = vmax.f32 %v2670_v57, %v8223_v60  ;;  %11111 = vst [vmem:[#allocation58_spill] sm:$0xff] %v8255_v39  ;;  %v8257_v57 = vpop.f32.mrb[82].mxu0 }
 0x492   : > { %11112 = vst [vmem:[#allocation75_spill] sm:$0xff] %v8257_v57 }
 0x493   : > { %v8226_v31 = vpop.f32.mrb[100].mxu1 }
 0x494   : > { %v2636_v19 = vmax.f32 %v2634_v21, %v8226_v31  ;;  %v8229_v18 = vpop.f32.mrb[101].mxu1  ;;  %v8261_v21 = vpop.f32.mrb[83].mxu0 }
 0x495   : > { %11103 = vst [vmem:[#allocation56_spill] sm:$0xff] %v8229_v18  ;;  %v2673_v38 = vmax.f32 %v2671_v1, %v8229_v18  ;;  %11113 = vst [vmem:[#allocation65_spill] sm:$0xff] %v8261_v21 }
 0x497   : > { %v8232_v53 = vpop.f32.mrb[102].mxu1 }
 0x498   : > { %v2637_v50 = vmax.f32 %v2635_v10, %v8232_v53  ;;  %v8235_v11 = vpop.f32.mrb[103].mxu1 }
 0x499   : > { %11104 = vst [vmem:[#allocation73_spill] sm:$0xff] %v8235_v11  ;;  %1012 = vadd.xlane.f32.xlu0 %v11105_v47  ;;  %v2674_v32 = vmax.f32 %v2672_v13, %v8235_v11  ;;  %v8266_v13 = vpop.f32.mrb[84].mxu0 }
 0x49a   : > { %11115 = vst [vmem:[#allocation8_spill] sm:$0xff] %v8266_v13 }
 0x49b   : > { %v8239_v41 = vpop.f32.mrb[104].mxu1 }
 0x49c   : > { %v2638_v3 = vmax.f32 %v2636_v19, %v8239_v41  ;;  %v8242_v9 = vpop.f32.mrb[105].mxu1  ;;  %v11116_v19 = vld [vmem:[#allocation26_spill] sm:$0xff] }
 0x49d   : > { %11106 = vst [vmem:[#allocation76_spill] sm:$0xff] %v8242_v9  ;;  %1018 = vadd.xlane.f32.xlu0 %v11107_v45  ;;  %v2675_v52 = vmax.f32 %v2673_v38, %v8242_v9  ;;  %v11121_v9 = vld [vmem:[#allocation29_spill] sm:$0xff] }
 0x49f   : > { %v8246_v33 = vpop.f32.mrb[106].mxu1 }
 0x4a0   : > { %v2639_v40 = vmax.f32 %v2637_v50, %v8246_v33  ;;  %v8249_v35 = vpop.f32.mrb[107].mxu1  ;;  %v8270_v50 = vpop.f32.mrb[85].mxu0 }
 0x4a1   : > { %11108 = vst [vmem:[#allocation57_spill] sm:$0xff] %v8249_v35  ;;  %1021 = vadd.xlane.f32.xlu0 %v11110_v24  ;;  %v2676_v48 = vmax.f32 %v2674_v32, %v8249_v35  ;;  %11117 = vst [vmem:[#allocation37_spill] sm:$0xff] %v8270_v50  ;;  %v8272_v47 = vpop.f32.mrb[86].mxu0 }
 0x4a2   : > { %11118 = vst [vmem:[#allocation36_spill] sm:$0xff] %v8272_v47  ;;  %v8276_v45 = vpop.f32.mrb[87].mxu0  ;;  %v11167_v47 = vld [vmem:[#allocation21_spill] sm:$0xff] }
 0x4a3   : > { %v8259_v43 = vpop.f32.mrb[108].mxu1  ;;  %11119 = vst [vmem:[#allocation17_spill] sm:$0xff] %v8276_v45 }
 0x4a4   : > { %v2640_v1 = vmax.f32 %v2638_v3, %v8259_v43  ;;  %v8264_v10 = vpop.f32.mrb[109].mxu1  ;;  %v8281_v3 = vpop.f32.mrb[88].mxu0  ;;  %v11170_v13 = vld [vmem:[#allocation76_spill] sm:$0xff] }
 0x4a5   : > { %11114 = vst [vmem:[#allocation66_spill] sm:$0xff] %v8264_v10  ;;  %820 = vadd.xlane.f32.xlu0 %v11116_v19  ;;  %v2677_v38 = vmax.f32 %v2675_v52, %v8264_v10  ;;  %v8285_v11 = vpop.f32.mrb[89].mxu0 }
 0x4a6   : > { %v8287_v52 = vpop.f32.mrb[90].mxu0 }
 0x4a7   : > { %v8274_v32 = vpop.f32.mrb[110].mxu1  ;;  %v8291_v18 = vpop.f32.mrb[91].mxu0 }
 0x4a8   : > { %v2641_v24 = vmax.f32 %v2639_v40, %v8274_v32  ;;  %v8279_v35 = vpop.f32.mrb[111].mxu1  ;;  %v8296_v40 = vpop.f32.mrb[92].mxu0 }
 0x4a9   : > { %11120 = vst [vmem:[#allocation14_spill] sm:$0xff] %v8279_v35  ;;  %823 = vadd.xlane.f32.xlu0 %v11121_v9  ;;  %v2678_v19 = vmax.f32 %v2676_v48, %v8279_v35  ;;  %v8300_v59 = vpop.f32.mrb[93].mxu0  ;;  %v11124_v35 = vld [vmem:[#allocation47_spill] sm:$0xff] }
 0x4ab   : > { %v8289_v10 = vpop.f32.mrb[112].mxu1  ;;  %v8302_v48 = vpop.f32.mrb[94].mxu0 }
 0x4ac   : > { %v2642_v60 = vmax.f32 %v2640_v1, %v8289_v10  ;;  %v8294_v0 = vpop.f32.mrb[113].mxu1  ;;  %v8307_v12 = vpop.f32.mrb[95].mxu0 }
 0x4ad   : > { %11122 = vst [vmem:[#allocation13_spill] sm:$0xff] %v8294_v0  ;;  %826 = vadd.xlane.f32.xlu0 %v11123_v8  ;;  %v2679_v9 = vmax.f32 %v2677_v38, %v8294_v0 }
 0x4ae   : > { %1015 = vadd.xlane.f32.xlu1 %v11124_v35 }
 0x4af   : > { %v8305_v56 = vpop.f32.mrb[114].mxu1 }
 0x4b0   : > { %v2643_v1 = vmax.f32 %v2641_v24, %v8305_v56  ;;  %v8310_v26 = vpop.f32.mrb[115].mxu1  ;;  %v3129_v61 = vpop.trf.xlu1 }
 0x4b1   : > { %11125 = vst [vmem:[#allocation15_spill] sm:$0xff] %v8310_v26  ;;  %829 = vadd.xlane.f32.xlu0 %v11126_v34  ;;  %v2680_v8 = vmax.f32 %v2678_v19, %v8310_v26  ;;  %5141 = vmatmul.mubr.msk.f32.vlgmr.msra.gmra.mrb[130].mxu1 %vm1359_vm7, %v3129_v61 }
 0x4b2   : > { %3343 = vmatprep.mubr.f32.mxu1 %v11082_v14 }
 0x4b3   : > { %v8316_v38 = vpop.f32.mrb[116].mxu1 }
 0x4b4   : > { %v2644_v35 = vmax.f32 %v2642_v60, %v8316_v38  ;;  %v8319_v0 = vpop.f32.mrb[117].mxu1  ;;  %v3130_v7 = vpop.trf.xlu1 }
 0x4b5   : > { %11127 = vst [vmem:[#allocation22_spill] sm:$0xff] %v8319_v0  ;;  %v2681_v24 = vmax.f32 %v2679_v9, %v8319_v0  ;;  %5142 = vmatmul.mubr.msk.f32.gmra.mrb[132].mxu1 %vm1359_vm7, %v3130_v7 }
 0x4b6   : > { %3349 = vmatprep.mubr.f32.mxu1 %v11082_v14 }
 0x4b7   : > { %v8324_v34 = vpop.f32.mrb[118].mxu1 }
 0x4b8   : > { %11128 = vst [vmem:[#allocation19_spill] sm:$0xff] %v8324_v34  ;;  %v2645_v19 = vmax.f32 %v2643_v1, %v8324_v34  ;;  %v8327_v61 = vpop.f32.mrb[119].mxu1  ;;  %v3131_v26 = vpop.trf.xlu1 }
 0x4b9   : > { %11129 = vst [vmem:[#allocation18_spill] sm:$0xff] %v8327_v61  ;;  %v2682_v55 = vmax.f32 %v2680_v8, %v8327_v61  ;;  %5143 = vmatmul.mubr.msk.f32.gmra.mrb[134].mxu1 %vm1359_vm7, %v3131_v26  ;;  %v2010_v61 = vrot.slane %v7967_v27, 4 }
 0x4ba   : > { %3355 = vmatprep.mubr.f32.mxu1 %v11082_v14 }
 0x4bb   : > { %v8332_v60 = vpop.f32.mrb[120].mxu1  ;;  %v2011_v22 = vadd.f32 %v2010_v61, %v7967_v27 }
 0x4bc   : > { %11130 = vst [vmem:[#allocation20_spill] sm:$0xff] %v8332_v60  ;;  %v2646_v9 = vmax.f32 %v2644_v35, %v8332_v60  ;;  %v8335_v7 = vpop.f32.mrb[121].mxu1  ;;  %v3132_v0 = vpop.trf.xlu1 }
 0x4bd   : > { %11131 = vst [vmem:[#allocation52_spill] sm:$0xff] %v8335_v7  ;;  %v2683_v51 = vmax.f32 %v2681_v24, %v8335_v7  ;;  %5144 = vmatmul.mubr.msk.f32.gmra.mrb[136].mxu1 %vm1359_vm7, %v3132_v0 }
 0x4be   : > { %3361 = vmatprep.mubr.f32.mxu1 %v11082_v14 }
 0x4bf   : > { %v8340_v1 = vpop.f32.mrb[122].mxu1 }
 0x4c0   : > { %11132 = vst [vmem:[#allocation53_spill] sm:$0xff] %v8340_v1  ;;  %v2647_v8 = vmax.f32 %v2645_v19, %v8340_v1  ;;  %v8343_v26 = vpop.f32.mrb[123].mxu1  ;;  %v3133_v54 = vpop.trf.xlu1  ;;  %v2047_v19 = vrot.slane %v8096_v2, 4 }
 0x4c1   : > { %11133 = vst [vmem:[#allocation39_spill] sm:$0xff] %v8343_v26  ;;  %v2684_v35 = vmax.f32 %v2682_v55, %v8343_v26  ;;  %5145 = vmatmul.mubr.msk.f32.gmra.mrb[138].mxu1 %vm1359_vm7, %v3133_v54  ;;  %v8358_v55 = vpop.trf.xlu0 }
 0x4c2   : > { %3367 = vmatprep.mubr.f32.mxu1 %v11082_v14  ;;  %11136 = vst [vmem:[#allocation55_spill] sm:$0xff] %v8358_v55  ;;  %v2048_v20 = vadd.f32 %v2047_v19, %v8096_v2 }
 0x4c3   : > { %v8349_v24 = vpop.f32.mrb[124].mxu1 }
 0x4c4   : > { %11134 = vst [vmem:[#allocation38_spill] sm:$0xff] %v8349_v24  ;;  %v2648_v0 = vmax.f32 %v2646_v9, %v8349_v24  ;;  %v8352_v7 = vpop.f32.mrb[125].mxu1  ;;  %v3134_v28 = vpop.trf.xlu1  ;;  %v2012_v24 = vrot.slane %v2011_v22, 2  ;;  %v2049_v19 = vrot.slane %v2048_v20, 2 }
 0x4c5   : > { %11135 = vst [vmem:[#allocation54_spill] sm:$0xff] %v8352_v7  ;;  %v2685_v42 = vmax.f32 %v2683_v51, %v8352_v7  ;;  %5146 = vmatmul.mubr.msk.f32.gmra.mrb[140].mxu1 %vm1359_vm7, %v3134_v28  ;;  %v8372_v51 = vpop.trf.xlu0 }
 0x4c6   : > { %3373 = vmatprep.mubr.f32.mxu1 %v11082_v14  ;;  %11140 = vst [vmem:[#allocation68_spill] sm:$0xff] %v8372_v51  ;;  %v2013_v2 = vadd.f32 %v2012_v24, %v2011_v22  ;;  %v2050_v51 = vadd.f32 %v2049_v19, %v2048_v20  ;;  %v5462_v24 = vpack.c.bf16 %v8291_v18, %v8285_v11 }
 0x4c7   : > { %v8361_v54 = vpop.f32.mrb[126].mxu1 }
 0x4c8   : > { %11137 = vst [vmem:[#allocation69_spill] sm:$0xff] %v8361_v54  ;;  %v2649_v26 = vmax.f32 %v2647_v8, %v8361_v54  ;;  %v8364_v9 = vpop.f32.mrb[127].mxu1  ;;  %v3135_v27 = vpop.trf.xlu1  ;;  %v2014_v34 = vrot.slane %v2013_v2, 1  ;;  %5463 = vmatprep.subr.bf16.mxu1 %v5462_v24 }
 0x4c9   : > { %11138 = vst [vmem:[#allocation67_spill] sm:$0xff] %v8364_v9  ;;  %v2686_v61 = vmax.f32 %v2684_v35, %v8364_v9  ;;  %5147 = vmatmul.mubr.msk.f32.gmra.mrb[142].mxu1 %vm1359_vm7, %v3135_v27 }
 0x4ca   : > { %3379 = vmatprep.mubr.f32.mxu1 %v11082_v14 }
 0x4cb   : > { %v8370_v28 = vpop.f32.mrb[128].mxu1 }
 0x4cc   : > { %11139 = vst [vmem:[#allocation70_spill] sm:$0xff] %v8370_v28  ;;  %v2650_v7 = vmax.f32 %v2648_v0, %v8370_v28  ;;  %v8375_v55 = vpop.f32.mrb[129].mxu1  ;;  %v3136_v8 = vpop.trf.xlu1  ;;  %v11181_v25 = vld [vmem:[#allocation54_spill] sm:$0xff] }
 0x4cd   : > { %11141 = vst [vmem:[#allocation72_spill] sm:$0xff] %v8375_v55  ;;  %v2687_v54 = vmax.f32 %v2685_v42, %v8375_v55  ;;  %5148 = vmatmul.mubr.msk.f32.gmra.mrb[144].mxu1 %vm1359_vm7, %v3136_v8  ;;  %v8381_v28 = vpop.trf.xlu0 }
 0x4ce   : > { %v2651_v35 = vmax.f32 %v2649_v26, %v2650_v7  ;;  %3385 = vmatprep.mubr.f32.mxu1 %v11082_v14 }
 0x4cf   : > { %v2688_v27 = vmax.f32 %v2686_v61, %v2687_v54  ;;  %v5466_v61 = vpack.c.bf16 %v8307_v12, %v8300_v59 }
 0x4d0   : > { %v2652_v9 = vrot.slane %v2651_v35, 4  ;;  %v3137_v1 = vpop.trf.xlu1  ;;  %v11182_v50 = vld [vmem:[#allocation67_spill] sm:$0xff] }
 0x4d1   : > { %v2689_v60 = vrot.slane %v2688_v27, 4  ;;  %5149 = vmatmul.mubr.msk.f32.gmra.mrb[146].mxu1 %vm1359_vm7, %v3137_v1  ;;  %v5464_v1 = vpack.c.bf16 %v8287_v52, %v8281_v3  ;;  %v2015_v3 = vadd.f32 %v2014_v34, %v2013_v2  ;;  %v2051_v52 = vrot.slane %v2050_v51, 1  ;;  %v8402_v11 = vpop.trf.xlu0 }
 0x4d2   : > { %v2653_v0 = vmax.f32 %v2651_v35, %v2652_v9  ;;  %3391 = vmatprep.mubr.f32.mxu1 %v11082_v14  ;;  %v5468_v9 = vpack.c.bf16 %v8302_v48, %v8296_v40 }
 0x4d3   : > { %v2690_v26 = vmax.f32 %v2688_v27, %v2689_v60  ;;  %5465 = vmatpush1.bf16.msra.mxu1 %v5464_v1  ;;  %5805 = vrcp.f32 %v2015_v3  ;;  %v2052_v27 = vadd.f32 %v2051_v52, %v2050_v51  ;;  %v11147_v52 = vld [vmem:[#allocation70_spill] sm:$0xff] }
 0x4d4   : > { %v2654_v54 = vrot.slane %v2653_v0, 2  ;;  %v3138_v8 = vpop.trf.xlu1  ;;  %5467 = vmatprep.subr.bf16.mxu1 %v5466_v61 }
 0x4d5   : > { %v2691_v19 = vrot.slane %v2690_v26, 2  ;;  %5150 = vmatmul.mubr.msk.f32.gmra.mrb[148].mxu1 %vm1359_vm7, %v3138_v8  ;;  %v11143_v8 = vld [vmem:[#allocation20_spill] sm:$0xff]  ;;  %5807 = vrcp.f32 %v2052_v27 }
 0x4d6   : > { %v2655_v60 = vmax.f32 %v2653_v0, %v2654_v54  ;;  %3397 = vmatprep.mubr.f32.mxu1 %v11082_v14 }
 0x4d7   : > { %v2692_v35 = vmax.f32 %v2690_v26, %v2691_v19  ;;  %5469 = vmatpush1.bf16.msra.mxu1 %v5468_v9 }
 0x4d8   : > { %v2656_v18 = vrot.slane %v2655_v60, 1  ;;  %v3139_v40 = vpop.trf.xlu1 }
 0x4d9   : > { %v2693_v48 = vrot.slane %v2692_v35, 1  ;;  %5151 = vmatmul.mubr.msk.f32.gmra.mrb[150].mxu1 %vm1359_vm7, %v3139_v40 }
 0x4da   : > { %v8405_v12 = vmax.f32 %v2655_v60, %v2656_v18  ;;  %3403 = vmatprep.mubr.f32.mxu1 %v11082_v14  ;;  %v11150_v60 = vld [vmem:[#allocation5_spill] sm:$0xff] }
 0x4db   : > { %v8408_v59 = vmax.f32 %v2692_v35, %v2693_v48  ;;  %v11146_v35 = vld [vmem:[#allocation69_spill] sm:$0xff] }
 0x4dc   : > { %v2695_v34 = vsub.f32 %v8121_v49, %v8405_v12  ;;  %v2697_v2 = vsub.f32 %v8125_v6, %v8405_v12  ;;  %v2699_v0 = vsub.f32 %v8129_v17, %v8405_v12  ;;  %v2701_v26 = vsub.f32 %v8137_v5, %v8405_v12  ;;  %v3140_v1 = vpop.trf.xlu1 }
 0x4dd   : > { %v2703_v24 = vsub.f32 %v8145_v29, %v8405_v12  ;;  %v2705_v51 = vsub.f32 %v8151_v23, %v8405_v12  ;;  %v2707_v54 = vsub.f32 %v8157_v58, %v8405_v12  ;;  %v2709_v49 = vsub.f32 %v8163_v36, %v8405_v12  ;;  %5152 = vmatmul.mubr.msk.f32.gmra.mrb[152].mxu1 %vm1359_vm7, %v3140_v1  ;;  %v8435_v23 = vpop.trf.xlu0  ;;  %v8484_v42 = vpop.eup %5805 }
 0x4de   : > { %v2711_v6 = vsub.f32 %v8169_v16, %v8405_v12  ;;  %v2713_v17 = vsub.f32 %v8175_v63, %v8405_v12  ;;  %v2715_v5 = vsub.f32 %v8181_v46, %v8405_v12  ;;  %v2717_v29 = vsub.f32 %v8187_v30, %v8405_v12  ;;  %3409 = vmatprep.mubr.f32.mxu1 %v11082_v14 }
 0x4df   : > { %v2719_v58 = vsub.f32 %v8193_v15, %v8405_v12  ;;  %v2721_v36 = vsub.f32 %v8199_v44, %v8405_v12  ;;  %v2723_v16 = vsub.f32 %v8205_v37, %v8405_v12  ;;  %v2725_v63 = vsub.f32 %v8214_v62, %v8405_v12  ;;  %11149 = vst [vmem:[#allocation44_spill] sm:$0xff] %v8484_v42  ;;  %v11179_v42 = vld [vmem:[#allocation52_spill] sm:$0xff] }
 0x4e0   : > { %v2727_v46 = vsub.f32 %v8220_v4, %v8405_v12  ;;  %v2729_v30 = vsub.f32 %v8226_v31, %v8405_v12  ;;  %v2731_v9 = vsub.f32 %v8232_v53, %v8405_v12  ;;  %v2733_v15 = vsub.f32 %v8239_v41, %v8405_v12  ;;  %v3141_v61 = vpop.trf.xlu1  ;;  %v11142_v41 = vld [vmem:[#allocation19_spill] sm:$0xff] }
 0x4e1   : > { %v2735_v44 = vsub.f32 %v8246_v33, %v8405_v12  ;;  %v2737_v37 = vsub.f32 %v8259_v43, %v8405_v12  ;;  %v2739_v62 = vsub.f32 %v8274_v32, %v8405_v12  ;;  %v2741_v4 = vsub.f32 %v8289_v10, %v8405_v12  ;;  %5153 = vmatmul.mubr.msk.f32.gmra.mrb[154].mxu1 %vm1359_vm7, %v3141_v61  ;;  %v11144_v32 = vld [vmem:[#allocation53_spill] sm:$0xff]  ;;  %v11145_v10 = vld [vmem:[#allocation38_spill] sm:$0xff]  ;;  %v8482_v20 = vpop.trf.xlu0  ;;  %v11164_v31 = vld [vmem:[#allocation55_spill] sm:$0xff] }
 0x4e2   : > { %3415 = vmatprep.mubr.f32.mxu1 %v11082_v14  ;;  %v2759_v40 = vmul.f32 1.442695, %v2695_v34  ;;  %v2763_v48 = vmul.f32 1.442695, %v2697_v2  ;;  %v2767_v1 = vmul.f32 1.442695, %v2699_v0  ;;  %v11183_v21 = vsub.f32 %v8305_v56, %v8405_v12 }
 0x4e3   : > { %v11148_v61 = vld [vmem:[#allocation6_spill] sm:$0xff]  ;;  %v2771_v19 = vmul.f32 1.442695, %v2701_v26  ;;  %v2775_v18 = vmul.f32 1.442695, %v2703_v24  ;;  %v11185_v56 = vsub.f32 %v11142_v41, %v8405_v12 }
 0x4e4   : > { %v3142_v22 = vpop.trf.xlu1  ;;  %5809 = vpow2.f32 %v2759_v40  ;;  %v2779_v34 = vmul.f32 1.442695, %v2705_v51  ;;  %v2783_v2 = vmul.f32 1.442695, %v2707_v54  ;;  %v2787_v7 = vmul.f32 1.442695, %v2709_v49 }
 0x4e5   : > { %5154 = vmatmul.mubr.msk.f32.gmra.mrb[156].mxu1 %vm1359_vm7, %v3142_v22  ;;  %5811 = vpow2.f32 %v2763_v48  ;;  %v2791_v3 = vmul.f32 1.442695, %v2711_v6  ;;  %v2795_v33 = vmul.f32 1.442695, %v2713_v17  ;;  %v2799_v26 = vmul.f32 1.442695, %v2715_v5  ;;  %v8491_v22 = vpop.trf.xlu0 }
 0x4e6   : > { %3421 = vmatprep.mubr.f32.mxu1 %v11082_v14  ;;  %5813 = vpow2.f32 %v2767_v1  ;;  %v2803_v27 = vmul.f32 1.442695, %v2717_v29  ;;  %v2807_v43 = vmul.f32 1.442695, %v2719_v58  ;;  %v2811_v24 = vmul.f32 1.442695, %v2721_v36 }
 0x4e7   : > { %5815 = vpow2.f32 %v2771_v19  ;;  %v2815_v40 = vmul.f32 1.442695, %v2723_v16  ;;  %v2819_v48 = vmul.f32 1.442695, %v2725_v63  ;;  %v2823_v51 = vmul.f32 1.442695, %v2727_v46  ;;  %v8509_v46 = vpop.eup %5807 }
 0x4e8   : > { %v3143_v0 = vpop.trf.xlu1  ;;  %5817 = vpow2.f32 %v2775_v18  ;;  %v2827_v54 = vmul.f32 1.442695, %v2729_v30  ;;  %v8494_v49 = vmul.f32 1.442695, %v2731_v9  ;;  %v8496_v6 = vmul.f32 1.442695, %v2733_v15 }
 0x4e9   : > { %5155 = vmatmul.mubr.msk.f32.gmra.mrb[158].mxu1 %vm1359_vm7, %v3143_v0  ;;  %5819 = vpow2.f32 %v2779_v34  ;;  %v8498_v17 = vmul.f32 1.442695, %v2735_v44  ;;  %v8500_v5 = vmul.f32 1.442695, %v2737_v37  ;;  %v8502_v58 = vmul.f32 1.442695, %v2739_v62  ;;  %v8526_v34 = vpop.trf.xlu0 }
 0x4ea   : > { %3427 = vmatprep.mubr.f32.mxu1 %v11082_v14  ;;  %5821 = vpow2.f32 %v2783_v2  ;;  %v8504_v36 = vmul.f32 1.442695, %v2741_v4  ;;  %v11151_v16 = vld [vmem:[#allocation7_spill] sm:$0xff]  ;;  %11152 = vst [vmem:[#allocation49_spill] sm:$0xff] %v8509_v46  ;;  %v11154_v9 = vld [vmem:[#allocation10_spill] sm:$0xff]  ;;  %v11155_v44 = vld [vmem:[#allocation9_spill] sm:$0xff] }
 0x4eb   : > { %5823 = vpow2.f32 %v2787_v7  ;;  %v11153_v7 = vld [vmem:[#allocation12_spill] sm:$0xff]  ;;  %v11156_v4 = vld [vmem:[#allocation11_spill] sm:$0xff]  ;;  %v11161_v15 = vld [vmem:[#allocation62_spill] sm:$0xff] }
 0x4ec   : > { %v3144_v29 = vpop.trf.xlu1  ;;  %5825 = vpow2.f32 %v2791_v3  ;;  %v11157_v3 = vld [vmem:[#allocation24_spill] sm:$0xff]  ;;  %v11159_v0 = vld [vmem:[#allocation59_spill] sm:$0xff] }
 0x4ed   : > { %5156 = vmatmul.mubr.msk.f32.gmra.mrb[160].mxu1 %vm1359_vm7, %v3144_v29  ;;  %5827 = vpow2.f32 %v2795_v33  ;;  %v11158_v18 = vld [vmem:[#allocation16_spill] sm:$0xff]  ;;  %v11162_v33 = vld [vmem:[#allocation63_spill] sm:$0xff]  ;;  %v8579_v57 = vpop.trf.xlu0 }
 0x4ee   : > { %3433 = vmatprep.mubr.f32.mxu1 %v11082_v14  ;;  %v8518_v62 = vpop.eup %5809  ;;  %5829 = vpow2.f32 %v2799_v26  ;;  %v11160_v37 = vld [vmem:[#allocation60_spill] sm:$0xff]  ;;  %v11165_v19 = vld [vmem:[#allocation71_spill] sm:$0xff] }
 0x4ef   : > { %v8528_v2 = vpop.eup %5811  ;;  %5831 = vpow2.f32 %v2803_v27  ;;  %v11163_v27 = vld [vmem:[#allocation64_spill] sm:$0xff] }
 0x4f0   : > { %v8536_v30 = vpop.eup %5813  ;;  %5833 = vpow2.f32 %v2807_v43  ;;  %v2887_v1 = vadd.f32 %v8528_v2, %v8518_v62  ;;  %v11166_v43 = vld [vmem:[#allocation74_spill] sm:$0xff] }
 0x4f1   : > { %5157 = vmatmul.mubr.msk.f32.gmra.mrb[162].mxu1 %vm1359_vm7, %v11164_v31  ;;  %v8546_v29 = vpop.eup %5815  ;;  %5835 = vpow2.f32 %v2811_v24  ;;  %v11168_v31 = vld [vmem:[#allocation56_spill] sm:$0xff] }
 0x4f2   : > { %3439 = vmatprep.mubr.f32.mxu1 %v11082_v14  ;;  %v8555_v63 = vpop.eup %5817  ;;  %5837 = vpow2.f32 %v2815_v40  ;;  %v2888_v53 = vadd.f32 %v8536_v30, %v2887_v1  ;;  %v11175_v24 = vld [vmem:[#allocation68_spill] sm:$0xff] }
 0x4f3   : > { %v8562_v26 = vpop.eup %5819  ;;  %5839 = vpow2.f32 %v2819_v48 }
 0x4f4   : > { %v8570_v46 = vpop.eup %5821  ;;  %5841 = vpow2.f32 %v2823_v51  ;;  %v2889_v1 = vadd.f32 %v8546_v29, %v2888_v53 }
 0x4f5   : > { %5158 = vmatmul.mubr.msk.f32.gmra.mrb[164].mxu1 %vm1359_vm7, %v11175_v24  ;;  %v8581_v39 = vpop.eup %5823  ;;  %5843 = vpow2.f32 %v2827_v54  ;;  %v2855_v54 = vmul.f32 1.442695, %v11183_v21  ;;  %v2863_v21 = vmul.f32 1.442695, %v11185_v56 }
 0x4f6   : > { %3445 = vmatprep.mubr.f32.mxu1 %v11082_v14  ;;  %v8590_v48 = vpop.eup %5825  ;;  %5845 = vpow2.f32 %v8494_v49  ;;  %v2890_v24 = vadd.f32 %v8555_v63, %v2889_v1  ;;  %v11184_v49 = vsub.f32 %v8316_v38, %v8405_v12  ;;  %v11186_v38 = vsub.f32 %v11143_v8, %v8405_v12 }
 0x4f7   : > { %v8598_v40 = vpop.eup %5827  ;;  %5847 = vpow2.f32 %v8496_v6 }
 0x4f8   : > { %v8607_v1 = vpop.eup %5829  ;;  %5849 = vpow2.f32 %v8498_v17  ;;  %v2891_v45 = vadd.f32 %v8562_v26, %v2890_v24  ;;  %v2859_v51 = vmul.f32 1.442695, %v11184_v49  ;;  %v8630_v24 = vpop.trf.xlu0 }
 0x4f9   : > { %5159 = vmatmul.mubr.msk.f32.gmra.mrb[166].mxu1 %vm1359_vm7, %v8381_v28  ;;  %v8616_v6 = vpop.eup %5831  ;;  %5851 = vpow2.f32 %v8500_v5  ;;  %v2867_v5 = vmul.f32 1.442695, %v11186_v38 }
 0x4fa   : > { %3451 = vmatprep.mubr.f32.mxu1 %v11082_v14  ;;  %v8623_v17 = vpop.eup %5833  ;;  %5853 = vpow2.f32 %v8502_v58  ;;  %v2892_v28 = vadd.f32 %v8570_v46, %v2891_v45  ;;  %v11187_v58 = vsub.f32 %v11144_v32, %v8405_v12  ;;  %v11190_v32 = vsub.f32 %v11146_v35, %v8405_v12 }
 0x4fb   : > { %v8632_v53 = vpop.eup %5835  ;;  %5855 = vpow2.f32 %v8504_v36  ;;  %v11188_v36 = vsub.f32 %v11145_v10, %v8405_v12 }
 0x4fc   : > { %v8638_v49 = vpop.eup %5837  ;;  %5857 = vpow2.f32 %v2855_v54  ;;  %v2871_v41 = vmul.f32 1.442695, %v11187_v58  ;;  %v2893_v56 = vadd.f32 %v8581_v39, %v2892_v28  ;;  %v2879_v54 = vmul.f32 1.442695, %v11190_v32  ;;  %v8671_v35 = vpop.trf.xlu0 }
 0x4fd   : > { %5160 = vmatmul.mubr.msk.f32.gmra.mrb[168].mxu1 %vm1359_vm7, %v8402_v11  ;;  %v8646_v45 = vpop.eup %5839  ;;  %5859 = vpow2.f32 %v2859_v51  ;;  %v2875_v8 = vmul.f32 1.442695, %v11188_v36  ;;  %v11191_v11 = vsub.f32 %v11147_v52, %v8405_v12  ;;  %v11193_v12 = vsub.f32 %v11150_v60, %v8408_v59 }
 0x4fe   : > { %3457 = vmatprep.mubr.f32.mxu1 %v11082_v14  ;;  %v8652_v38 = vpop.eup %5841  ;;  %5861 = vpow2.f32 %v2863_v21  ;;  %v2894_v28 = vadd.f32 %v8590_v48, %v2893_v56  ;;  %v11192_v21 = vsub.f32 %v11148_v61, %v8408_v59  ;;  %v11195_v32 = vsub.f32 %v11153_v7, %v8408_v59 }
 0x4ff   : > { %11189 = vst [vmem:[#allocation51_spill] sm:$0xff] %v8652_v38  ;;  %v8658_v58 = vpop.eup %5843  ;;  %5863 = vpow2.f32 %v2867_v5  ;;  %v2883_v51 = vmul.f32 1.442695, %v11191_v11  ;;  %v2765_v52 = vmul.f32 1.442695, %v11193_v12  ;;  %v11194_v5 = vsub.f32 %v11151_v16, %v8408_v59 }
 0x500   : > { %v8663_v10 = vpop.eup %5845  ;;  %5865 = vpow2.f32 %v2871_v41  ;;  %v2895_v36 = vadd.f32 %v8598_v40, %v2894_v28  ;;  %v2761_v55 = vmul.f32 1.442695, %v11192_v21  ;;  %v2773_v28 = vmul.f32 1.442695, %v11195_v32 }
 0x501   : > { %5161 = vmatmul.mubr.msk.f32.gmra.mrb[170].mxu1 %vm1359_vm7, %v8435_v23  ;;  %v8673_v56 = vpop.eup %5847  ;;  %5867 = vpow2.f32 %v2875_v8  ;;  %v2769_v41 = vmul.f32 1.442695, %v11194_v5  ;;  %v11196_v8 = vsub.f32 %v11154_v9, %v8408_v59  ;;  %v11197_v16 = vsub.f32 %v11155_v44, %v8408_v59 }
 0x502   : > { %3463 = vmatprep.mubr.f32.mxu1 %v11082_v14  ;;  %v8682_v61 = vpop.eup %5849  ;;  %5869 = vpow2.f32 %v2879_v54  ;;  %v2896_v23 = vadd.f32 %v8607_v1, %v2895_v36  ;;  %v11198_v54 = vsub.f32 %v11156_v4, %v8408_v59  ;;  %v11199_v36 = vsub.f32 %v11157_v3, %v8408_v59  ;;  %v11212_v3 = vld [vmem:[#allocation44_spill] sm:$0xff] }
 0x503   : > { %v2777_v60 = vmul.f32 1.442695, %v11196_v8  ;;  %v8691_v11 = vpop.eup %5851  ;;  %5871 = vpow2.f32 %v2883_v51  ;;  %v2781_v21 = vmul.f32 1.442695, %v11197_v16  ;;  %v11200_v51 = vsub.f32 %v11158_v18, %v8408_v59 }
 0x504   : > { %v2785_v12 = vmul.f32 1.442695, %v11198_v54  ;;  %v2789_v7 = vmul.f32 1.442695, %v11199_v36  ;;  %v8702_v5 = vpop.eup %5853  ;;  %v2897_v9 = vadd.f32 %v8616_v6, %v2896_v23  ;;  %5873 = vpow2.f32 %v2761_v55 }
 0x505   : > { %v2793_v32 = vmul.f32 1.442695, %v11200_v51  ;;  %v11201_v44 = vsub.f32 %v11159_v0, %v8408_v59  ;;  %5162 = vmatmul.mubr.msk.f32.gmra.mrb[172].mxu1 %vm1359_vm7, %v8482_v20  ;;  %v8713_v4 = vpop.eup %5855  ;;  %5875 = vpow2.f32 %v2765_v52  ;;  %v8725_v20 = vpop.trf.xlu0  ;;  %v11202_v36 = vsub.f32 %v11160_v37, %v8408_v59 }
 0x506   : > { %3469 = vmatprep.mubr.f32.mxu1 %v11082_v14  ;;  %v8722_v23 = vpop.eup %5857  ;;  %v2898_v0 = vadd.f32 %v8623_v17, %v2897_v9  ;;  %5877 = vpow2.f32 %v2769_v41 }
 0x507   : > { %v2797_v8 = vmul.f32 1.442695, %v11201_v44  ;;  %v8731_v54 = vpop.eup %5859  ;;  %5879 = vpow2.f32 %v2773_v28 }
 0x508   : > { %v8739_v9 = vpop.eup %5861  ;;  %v2899_v44 = vadd.f32 %v8632_v53, %v2898_v0  ;;  %5881 = vpow2.f32 %v2777_v60  ;;  %v11203_v60 = vsub.f32 %v11161_v15, %v8408_v59  ;;  %v11205_v15 = vsub.f32 %v11163_v27, %v8408_v59 }
 0x509   : > { %5163 = vmatmul.mubr.msk.f32.gmra.mrb[174].mxu1 %vm1359_vm7, %v8491_v22  ;;  %v8748_v16 = vpop.eup %5863  ;;  %5883 = vpow2.f32 %v2781_v21  ;;  %v2801_v21 = vmul.f32 1.442695, %v11202_v36  ;;  %v8778_v36 = vpop.trf.xlu0 }
 0x50a   : > { %3475 = vmatprep.mubr.f32.mxu1 %v11082_v14  ;;  %v8757_v0 = vpop.eup %5865  ;;  %v2900_v28 = vadd.f32 %v8638_v49, %v2899_v44  ;;  %5885 = vpow2.f32 %v2785_v12  ;;  %v2805_v41 = vmul.f32 1.442695, %v11203_v60  ;;  %v11204_v12 = vsub.f32 %v11162_v33, %v8408_v59 }
 0x50b   : > { %v8765_v52 = vpop.eup %5867  ;;  %5887 = vpow2.f32 %v2789_v7 }
 0x50c   : > { %v8770_v22 = vpop.eup %5869  ;;  %v2901_v18 = vadd.f32 %v8646_v45, %v2900_v28  ;;  %5889 = vpow2.f32 %v2793_v32  ;;  %v2809_v37 = vmul.f32 1.442695, %v11204_v12  ;;  %v2813_v28 = vmul.f32 1.442695, %v11205_v15 }
 0x50d   : > { %5164 = vmatmul.mubr.msk.f32.gmra.mrb[176].mxu1 %vm1359_vm7, %v8526_v34  ;;  %v8782_v44 = vpop.eup %5871  ;;  %5891 = vpow2.f32 %v2797_v8  ;;  %v11206_v34 = vsub.f32 %v11165_v19, %v8408_v59  ;;  %v11207_v8 = vsub.f32 %v11166_v43, %v8408_v59  ;;  %v11208_v15 = vsub.f32 %v11167_v47, %v8408_v59 }
 0x50e   : > { %3481 = vmatprep.mubr.f32.mxu1 %v11082_v14  ;;  %v5874_v32 = vpop.eup %5873  ;;  %v2902_v33 = vadd.f32 %v8652_v38, %v2901_v18  ;;  %5893 = vpow2.f32 %v2801_v21  ;;  %v11209_v43 = vsub.f32 %v11168_v31, %v8408_v59  ;;  %v8817_v31 = vpop.trf.xlu0 }
 0x50f   : > { %v2817_v60 = vmul.f32 1.442695, %v11206_v34  ;;  %v5876_v7 = vpop.eup %5875  ;;  %5895 = vpow2.f32 %v2805_v41  ;;  %v2821_v27 = vmul.f32 1.442695, %v11207_v8  ;;  %v2825_v51 = vmul.f32 1.442695, %v11208_v15 }
 0x510   : > { %v5878_v55 = vpop.eup %5877  ;;  %v2903_v18 = vadd.f32 %v8658_v58, %v2902_v33  ;;  %5897 = vpow2.f32 %v2809_v37  ;;  %v2924_v21 = vadd.f32 %v5876_v7, %v5874_v32  ;;  %v5310_v34 = vpack.c.bf16 %v5876_v7, %v5874_v32  ;;  %v11210_v8 = vld [vmem:[#allocation73_spill] sm:$0xff] }
 0x511   : > { %5165 = vmatmul.mubr.msk.f32.gmra.mrb[178].mxu1 %vm1359_vm7, %v8579_v57  ;;  %v5880_v12 = vpop.eup %5879  ;;  %5899 = vpow2.f32 %v2813_v28  ;;  %v2829_v41 = vmul.f32 1.442695, %v11209_v43  ;;  %v11211_v47 = vsub.f32 %v11210_v8, %v8408_v59  ;;  %v11214_v28 = vld [vmem:[#allocation49_spill] sm:$0xff] }
 0x512   : > { %3487 = vmatprep.mubr.f32.mxu1 %v11082_v14  ;;  %v5882_v7 = vpop.eup %5881  ;;  %v2904_v32 = vadd.f32 %v8663_v10, %v2903_v18  ;;  %5901 = vpow2.f32 %v2817_v60  ;;  %v2925_v57 = vadd.f32 %v5878_v55, %v2924_v21  ;;  %5311 = vmatprep.subr.bf16.mxu0 %v5310_v34  ;;  %v11217_v8 = vld [vmem:[#allocation57_spill] sm:$0xff]  ;;  %v11219_v60 = vpack.c.bf16 %v8528_v2, %v8518_v62 }
 0x513   : > { %v2833_v15 = vmul.f32 1.442695, %v11211_v47  ;;  %v5884_v43 = vpop.eup %5883  ;;  %5903 = vpow2.f32 %v2821_v27  ;;  %v11218_v47 = vsub.f32 %v11217_v8, %v8408_v59  ;;  %v5314_v18 = vpack.c.bf16 %v5880_v12, %v5878_v55  ;;  %v11220_v27 = vld [vmem:[#allocation66_spill] sm:$0xff] }
 0x514   : > { %v2193_v19 = vpop.f32.mrb[96].mxu0  ;;  %5313 = vmatpush1.bf16.msra.mxu0 %v11219_v60  ;;  %v5886_v21 = vpop.eup %5885  ;;  %v2905_v34 = vadd.f32 %v8673_v56, %v2904_v32  ;;  %5905 = vpow2.f32 %v2825_v51 }
 0x515   : > { %v8810_v38 = vmul.f32 %v11212_v3, %v2193_v19  ;;  %v2195_v37 = vpop.f32.mrb[97].mxu0  ;;  %v11216_v3 = vsub.f32 %v11170_v13, %v8408_v59  ;;  %5166 = vmatmul.mubr.msk.f32.gmra.mrb[180].mxu1 %vm1359_vm7, %v8630_v24  ;;  %v5888_v13 = vpop.eup %5887  ;;  %5907 = vpow2.f32 %v2829_v41  ;;  %5315 = vmatprep.subr.bf16.mxu0 %v5314_v18  ;;  %v11224_v41 = vld [vmem:[#allocation13_spill] sm:$0xff]  ;;  %v11228_v18 = vpack.c.bf16 %v8546_v29, %v8536_v30 }
 0x516   : > { %v8815_v33 = vmul.f32 %v11214_v28, %v2195_v37  ;;  %v2926_v37 = vadd.f32 %v5880_v12, %v2925_v57  ;;  %v5318_v28 = vpack.c.bf16 %v5884_v43, %v5882_v7  ;;  %3493 = vmatprep.mubr.f32.mxu1 %v11082_v14  ;;  %v5890_v55 = vpop.eup %5889  ;;  %v2906_v51 = vadd.f32 %v8682_v61, %v2905_v34  ;;  %v8853_v34 = vpop.trf.xlu0 }
 0x517   : > { %11213 = vst [vmem:[#allocation26_spill] sm:$0xff] %v8810_v38  ;;  %v2837_v19 = vmul.f32 1.442695, %v11216_v3  ;;  %v2841_v38 = vmul.f32 1.442695, %v11218_v47  ;;  %v11221_v3 = vsub.f32 %v11220_v27, %v8408_v59  ;;  %v11222_v47 = vld [vmem:[#allocation14_spill] sm:$0xff]  ;;  %5909 = vpow2.f32 %v2833_v15  ;;  %v5892_v24 = vpop.eup %5891 }
 0x518   : > { %11215 = vst [vmem:[#allocation29_spill] sm:$0xff] %v8815_v33  ;;  %v11223_v62 = vsub.f32 %v11222_v47, %v8408_v59  ;;  %v2927_v12 = vadd.f32 %v5882_v7, %v2926_v37  ;;  %v5322_v32 = vpack.c.bf16 %v5888_v13, %v5886_v21  ;;  %v11225_v57 = vsub.f32 %v11224_v41, %v8408_v59  ;;  %v11226_v27 = vld [vmem:[#allocation15_spill] sm:$0xff] }
 0x519   : > { %v2845_v8 = vmul.f32 1.442695, %v11221_v3  ;;  %5911 = vpow2.f32 %v2837_v19  ;;  %v11227_v3 = vsub.f32 %v11226_v27, %v8408_v59  ;;  %5317 = vmatpush1.bf16.msra.mxu0 %v11228_v18  ;;  %v2907_v15 = vadd.f32 %v8691_v11, %v2906_v51  ;;  %5167 = vmatmul.mubr.msk.f32.gmra.mrb[182].mxu1 %vm1359_vm7, %v8671_v35  ;;  %v11231_v27 = vld [vmem:[#allocation18_spill] sm:$0xff] }
 0x51a   : > { %v2849_v2 = vmul.f32 1.442695, %v11223_v62  ;;  %v2853_v60 = vmul.f32 1.442695, %v11225_v57  ;;  %v8848_v62 = vpop.eup %5893  ;;  %5913 = vpow2.f32 %v2841_v38  ;;  %v2928_v7 = vadd.f32 %v5884_v43, %v2927_v12  ;;  %5319 = vmatprep.subr.bf16.mxu0 %v5318_v28  ;;  %v11229_v57 = vld [vmem:[#allocation22_spill] sm:$0xff]  ;;  %3499 = vmatprep.mubr.f32.mxu1 %v11082_v14 }
 0x51b   : > { %v2857_v47 = vmul.f32 1.442695, %v11227_v3  ;;  %v5326_v19 = vpack.c.bf16 %v5892_v24, %v5890_v55  ;;  %v5896_v41 = vpop.eup %5895  ;;  %5915 = vpow2.f32 %v2845_v8  ;;  %v11230_v30 = vsub.f32 %v11229_v57, %v8408_v59 }
 0x51c   : > { %v8855_v37 = vpop.f32.mrb[98].mxu0  ;;  %v11232_v51 = vsub.f32 %v11231_v27, %v8408_v59  ;;  %v8864_v28 = vpop.eup %5897  ;;  %v2908_v35 = vadd.f32 %v8702_v5, %v2907_v15  ;;  %5917 = vpow2.f32 %v2849_v2  ;;  %v2929_v12 = vadd.f32 %v5886_v21, %v2928_v7 }
 0x51d   : > { %v2861_v29 = vmul.f32 1.442695, %v11230_v30  ;;  %v3033_v43 = vpop.f32.mrb[99].mxu0  ;;  %v5330_v3 = vpack.c.bf16 %v5896_v41, %v8848_v62  ;;  %v8868_v8 = vpop.eup %5899  ;;  %5919 = vpow2.f32 %v2853_v60  ;;  %v11233_v18 = vsub.f32 %v11179_v42, %v8408_v59  ;;  %v11234_v30 = vld [vmem:[#allocation39_spill] sm:$0xff]  ;;  %5168 = vmatmul.mubr.msk.f32.gmra.mrb[184].mxu1 %vm1359_vm7, %v8725_v20 }
 0x51e   : > { %v2865_v38 = vmul.f32 1.442695, %v11232_v51  ;;  %3100 = vmatprep.mubr.f32.mxu0 %v3033_v43  ;;  %v11235_v27 = vsub.f32 %v11234_v30, %v8408_v59  ;;  %v11236_v33 = vpack.c.bf16 %v8562_v26, %v8555_v63  ;;  %v8879_v2 = vpop.eup %5901  ;;  %v2909_v21 = vadd.f32 %v8713_v4, %v2908_v35  ;;  %3505 = vmatprep.mubr.f32.mxu1 %v11082_v14 }
 0x51f   : > { %v2869_v57 = vmul.f32 1.442695, %v11233_v18  ;;  %5921 = vpow2.f32 %v2857_v47  ;;  %v2930_v15 = vadd.f32 %v5888_v13, %v2929_v12  ;;  %v5334_v42 = vpack.c.bf16 %v8868_v8, %v8864_v28  ;;  %v8886_v60 = vpop.eup %5903  ;;  %v3176_v47 = vpop.trf.xlu0 }
 0x520   : > { %v2873_v51 = vmul.f32 1.442695, %v11235_v27  ;;  %5321 = vmatpush1.bf16.msra.mxu0 %v11236_v33  ;;  %5923 = vpow2.f32 %v2861_v29  ;;  %v11237_v63 = vsub.f32 %v11181_v25, %v8408_v59  ;;  %v11238_v33 = vsub.f32 %v11182_v50, %v8408_v59  ;;  %v8895_v13 = vpop.eup %5905  ;;  %v11239_v25 = vld [vmem:[#allocation72_spill] sm:$0xff] }
 0x521   : > { %5323 = vmatprep.subr.bf16.mxu0 %v5322_v32  ;;  %v2910_v20 = vadd.f32 %v8722_v23, %v2909_v21  ;;  %5925 = vpow2.f32 %v2865_v38  ;;  %v2931_v32 = vadd.f32 %v5890_v55, %v2930_v15  ;;  %v5338_v29 = vpack.c.bf16 %v8886_v60, %v8879_v2  ;;  %v8900_v43 = vpop.eup %5907  ;;  %5169 = vmatmul.mubr.msk.f32.gmra.mrb[186].mxu1 %vm1359_vm7, %v8778_v36 }
 0x522   : > { %v2877_v26 = vmul.f32 1.442695, %v11237_v63  ;;  %v2881_v7 = vmul.f32 1.442695, %v11238_v33  ;;  %5927 = vpow2.f32 %v2869_v57  ;;  %v11240_v35 = vsub.f32 %v11239_v25, %v8408_v59  ;;  %v8908_v18 = vpop.eup %5909  ;;  %3511 = vmatprep.mubr.f32.mxu1 %v11082_v14 }
 0x523   : > { %v11241_v12 = vpack.c.bf16 %v8581_v39, %v8570_v46  ;;  %v2911_v38 = vadd.f32 %v8731_v54, %v2910_v20  ;;  %5929 = vpow2.f32 %v2873_v51  ;;  %v2932_v55 = vadd.f32 %v5892_v24, %v2931_v32  ;;  %v8915_v30 = vpop.eup %5911 }
 0x524   : > { %v2885_v50 = vmul.f32 1.442695, %v11240_v35  ;;  %v5342_v57 = vpack.c.bf16 %v8900_v43, %v8895_v13  ;;  %5931 = vpow2.f32 %v2877_v26  ;;  %v8918_v39 = vpop.eup %5913  ;;  %v5346_v24 = vpack.c.bf16 %v8915_v30, %v8908_v18 }
 0x525   : > { %5325 = vmatpush1.bf16.msra.mxu0 %v11241_v12  ;;  %v2912_v59 = vadd.f32 %v8739_v9, %v2911_v38  ;;  %5933 = vpow2.f32 %v2881_v7  ;;  %v2933_v46 = vadd.f32 %v8848_v62, %v2932_v55  ;;  %v11242_v36 = vpack.c.bf16 %v8598_v40, %v8590_v48  ;;  %5170 = vmatmul.mubr.msk.f32.gmra.mrb[188].mxu1 %vm1359_vm7, %v8817_v31 }
 0x526   : > { %5327 = vmatprep.subr.bf16.mxu0 %v5326_v19  ;;  %v8924_v19 = vpop.eup %5915  ;;  %5935 = vpow2.f32 %v2885_v50  ;;  %v1013_v62 = vpop.xlane.xlu0 %1012  ;;  %3517 = vmatprep.mubr.f32.mxu1 %v11082_v14  ;;  %v11243_v31 = vpack.c.bf16 %v8616_v6, %v8607_v1 }
 0x527   : > { %v8929_v27 = vpop.eup %5917  ;;  %v2913_v51 = vadd.f32 %v8748_v16, %v2912_v59  ;;  %v2934_v21 = vadd.f32 %v5896_v41, %v2933_v46  ;;  %v5350_v15 = vpack.c.bf16 %v8924_v19, %v8918_v39  ;;  %5937 = vrsqrt.f32 %v1013_v62 }
 0x528   : > { %v8936_v63 = vpop.eup %5919  ;;  %vm1109_vm6 = vcmp.eq.f32.partialorder %v1013_v62, inf  ;;  %vm1111_vm8 = vcmp.eq.f32.partialorder %v1013_v62, 0.0 }
 0x529   : > { %5329 = vmatpush1.bf16.msra.mxu0 %v11242_v36  ;;  %v8939_v40 = vpop.eup %5921  ;;  %v2914_v48 = vadd.f32 %v8757_v0, %v2913_v51  ;;  %v2935_v26 = vadd.f32 %v8864_v28, %v2934_v21  ;;  %v5354_v41 = vpack.c.bf16 %v8936_v63, %v8929_v27  ;;  %5171 = vmatmul.mubr.msk.f32.gmra.mrb[190].mxu1 %vm1359_vm7, %v8853_v34  ;;  %v1112_v51 = vand.u32 2147483648, %v1013_v62 }
 0x52a   : > { %5331 = vmatprep.subr.bf16.mxu0 %v5330_v3  ;;  %v8945_v3 = vpop.eup %5923  ;;  %v8956_v28 = vpop.xlane.xlu0 %1018  ;;  %3523 = vmatprep.mubr.f32.mxu1 %v11082_v14  ;;  %v11244_v34 = vpack.c.bf16 %v8632_v53, %v8623_v17 }
 0x52b   : > { %v8950_v33 = vpop.eup %5925  ;;  %v2915_v7 = vadd.f32 %v8765_v52, %v2914_v48  ;;  %v2936_v20 = vadd.f32 %v8868_v8, %v2935_v26  ;;  %v5358_v32 = vpack.c.bf16 %v8945_v3, %v8939_v40  ;;  %5939 = vrsqrt.f32 %v8956_v28  ;;  %v11246_v26 = vld [vmem:[#allocation51_spill] sm:$0xff] }
 0x52c   : > { %v8960_v25 = vpop.eup %5927  ;;  %vm1123_vm9 = vcmp.eq.f32.partialorder %v8956_v28, inf  ;;  %vm1125_vm11 = vcmp.eq.f32.partialorder %v8956_v28, 0.0 }
 0x52d   : > { %5333 = vmatpush1.bf16.msra.mxu0 %v11243_v31  ;;  %v8963_v1 = vpop.eup %5929  ;;  %v2916_v6 = vadd.f32 %v8770_v22, %v2915_v7  ;;  %v2937_v35 = vadd.f32 %v8879_v2, %v2936_v20  ;;  %v5362_v8 = vpack.c.bf16 %v8960_v25, %v8950_v33  ;;  %5172 = vmatmul.mubr.msk.f32.gmra.mrb[192].mxu1 %vm1359_vm7, %v3176_v47 }
 0x52e   : > { %5335 = vmatprep.subr.bf16.mxu0 %v5334_v42  ;;  %v8969_v42 = vpop.eup %5931  ;;  %v8981_v2 = vpop.xlane.xlu0 %1021  ;;  %4847 = vmatprep.mubr.f32.mxu1 %v11082_v14  ;;  %v11245_v47 = vpack.c.bf16 %v8646_v45, %v8638_v49  ;;  %v11247_v31 = vpack.c.bf16 %v8658_v58, %v11246_v26  ;;  %v11248_v58 = vpack.c.bf16 %v8673_v56, %v8663_v10 }
 0x52f   : > { %v8974_v50 = vpop.eup %5933  ;;  %v8977_v12 = vadd.f32 %v8782_v44, %v2916_v6  ;;  %v2938_v38 = vadd.f32 %v8886_v60, %v2937_v35  ;;  %v5366_v55 = vpack.c.bf16 %v8969_v42, %v8963_v1  ;;  %v11249_v10 = vpack.c.bf16 %v8691_v11, %v8682_v61 }
 0x530   : > { %v8985_v59 = vpop.eup %5935  ;;  %vm1130_vm14 = vcmp.eq.f32.partialorder %v8981_v2, inf  ;;  %vm1132_vm15 = vcmp.eq.f32.partialorder %v8981_v2, 0.0 }
 0x531   : > { %5337 = vmatpush1.bf16.msra.mxu0 %v11244_v34  ;;  %v2939_v53 = vadd.f32 %v8895_v13, %v2938_v38  ;;  %v5370_v17 = vpack.c.bf16 %v8985_v59, %v8974_v50  ;;  %v5938_v60 = vpop.eup %5937 }
 0x532   : > { %5339 = vmatprep.subr.bf16.mxu0 %v5338_v29  ;;  %v1108_v46 = vmul.f32 %v5938_v60, %v1013_v62  ;;  %v821_v36 = vpop.xlane.xlu0 %820 }
 0x533   : > { %v2940_v29 = vadd.f32 %v8900_v43, %v2939_v53  ;;  %5941 = vrsqrt.f32 %v821_v36  ;;  %vm917_vm1 = vcmp.eq.f32.partialorder %v821_v36, inf  ;;  %vm919_vm10 = vcmp.eq.f32.partialorder %v821_v36, 0.0 }
 0x534   : > { %v1110_v48 = vsel %vm1109_vm6, %v1013_v62, %v1108_v46  ;;  %5943 = vrsqrt.f32 %v8981_v2 }
 0x535   : > { %5341 = vmatpush1.bf16.msra.mxu0 %v11245_v47  ;;  %v2941_v21 = vadd.f32 %v8908_v18, %v2940_v29  ;;  %v1113_v13 = vsel %vm1111_vm8, %v1112_v51, %v1110_v48  ;;  %v5940_v7 = vpop.eup %5939 }
 0x536   : > { %5343 = vmatprep.subr.bf16.mxu0 %v5342_v57  ;;  %v1227_v45 = vmax.f32 %v1113_v13, 1e-12  ;;  %v824_v43 = vpop.xlane.xlu0 %823  ;;  %v9005_v57 = vpop.permute.xlu1 %3870  ;;  %v11252_v13 = vld [vmem:[#allocation41_spill] sm:$0xff] }
 0x537   : > { %v2942_v49 = vadd.f32 %v8915_v30, %v2941_v21  ;;  %5945 = vrsqrt.f32 %v824_v43  ;;  %vm924_vm12 = vcmp.eq.f32.partialorder %v824_v43, inf  ;;  %v927_v46 = vand.u32 2147483648, %v824_v43 }
 0x538   : > { %5947 = vrcp.f32 %v1227_v45  ;;  %vm926_vm13 = vcmp.eq.f32.partialorder %v824_v43, 0.0 }
 0x539   : > { %5345 = vmatpush1.bf16.msra.mxu0 %v11247_v31  ;;  %v2943_v62 = vadd.f32 %v8918_v39, %v2942_v49 }
 0x53a   : > { %5347 = vmatprep.subr.bf16.mxu0 %v5346_v24  ;;  %v9015_v18 = vpop.xlane.xlu0 %826  ;;  %v1122_v24 = vmul.f32 %v5940_v7, %v8956_v28 }
 0x53b   : > { %v2944_v20 = vadd.f32 %v8924_v19, %v2943_v62  ;;  %5949 = vrsqrt.f32 %v9015_v18  ;;  %v9020_v6 = vpop.xlane.xlu1 %1015  ;;  %vm931_vm0 = vcmp.eq.f32.partialorder %v9015_v18, inf  ;;  %vm933_vm2 = vcmp.eq.f32.partialorder %v9015_v18, 0.0 }
 0x53c   : > { %5951 = vrsqrt.f32 %v9020_v6  ;;  %v1124_v11 = vsel %vm1123_vm9, %v8956_v28, %v1122_v24  ;;  %vm1116_vm3 = vcmp.eq.f32.partialorder %v9020_v6, inf  ;;  %vm1118_vm4 = vcmp.eq.f32.partialorder %v9020_v6, 0.0 }
 0x53d   : > { %5349 = vmatpush1.bf16.msra.mxu0 %v11248_v58  ;;  %v2945_v30 = vadd.f32 %v8929_v27, %v2944_v20  ;;  %v5942_v35 = vpop.eup %5941  ;;  %v1126_v27 = vand.u32 2147483648, %v8956_v28  ;;  %v11251_v28 = vld [vmem:[#allocation40_spill] sm:$0xff] }
 0x53e   : > { %5351 = vmatprep.subr.bf16.mxu0 %v5350_v15  ;;  %v916_v39 = vmul.f32 %v5942_v35, %v821_v36  ;;  %v9030_v19 = vpop.xlane.xlu0 %829  ;;  %v920_v15 = vand.u32 2147483648, %v821_v36  ;;  %v5944_v34 = vpop.eup %5943 }
 0x53f   : > { %v2946_v56 = vadd.f32 %v8936_v63, %v2945_v30  ;;  %5953 = vrsqrt.f32 %v9030_v19  ;;  %v11250_v63 = vpack.c.bf16 %v8713_v4, %v8702_v5  ;;  %v1127_v51 = vsel %vm1125_vm11, %v1126_v27, %v1124_v11 }
 0x540   : > { %v918_v38 = vsel %vm917_vm1, %v821_v36, %v916_v39  ;;  %v1129_v21 = vmul.f32 %v5944_v34, %v8981_v2  ;;  %v1229_v45 = vmax.f32 %v1127_v51, 1e-12  ;;  %vm938_vm5 = vcmp.eq.f32.partialorder %v9030_v19, inf }
 0x541   : > { %5353 = vmatpush1.bf16.msra.mxu0 %v11249_v10  ;;  %v2947_v61 = vadd.f32 %v8939_v40, %v2946_v56  ;;  %v5946_v53 = vpop.eup %5945  ;;  %v1133_v40 = vand.u32 2147483648, %v8981_v2  ;;  %vm940_vm6 = vcmp.eq.f32.partialorder %v9030_v19, 0.0 }
 0x542   : > { %5355 = vmatprep.subr.bf16.mxu0 %v5354_v41  ;;  %v921_v41 = vsel %vm919_vm10, %v920_v15, %v918_v38  ;;  %v5948_v60 = vpop.eup %5947  ;;  %v923_v29 = vmul.f32 %v5946_v53, %v824_v43  ;;  %v1131_v58 = vsel %vm1130_vm14, %v8981_v2, %v1129_v21  ;;  %v11256_v2 = vpack.c.bf16 %v8782_v44, %v8770_v22  ;;  %v11258_v53 = vld [vmem:[#allocation58_spill] sm:$0xff]  ;;  %v11265_v22 = vld [vmem:[#allocation28_spill] sm:$0xff]  ;;  %v11272_v21 = vld [vmem:[#allocation37_spill] sm:$0xff] }
 0x543   : > { %v2948_v47 = vadd.f32 %v8945_v3, %v2947_v61  ;;  %v1147_v36 = vmax.f32 %v921_v41, 1e-12  ;;  %v1287_v48 = vmul.f32 %v5948_v60, %v11251_v28  ;;  %v1288_v26 = vmul.f32 %v5948_v60, %v11252_v13  ;;  %v11263_v41 = vld [vmem:[#allocation61_spill] sm:$0xff] }
 0x544   : > { %v925_v4 = vsel %vm924_vm12, %v824_v43, %v923_v29  ;;  %v11253_v3 = vpack.c.bf16 %v8731_v54, %v8722_v23  ;;  %v934_v23 = vand.u32 2147483648, %v9015_v18 }
 0x545   : > { %5357 = vmatpush1.bf16.msra.mxu0 %v11250_v63  ;;  %v2949_v5 = vadd.f32 %v8950_v33, %v2948_v47  ;;  %5955 = vrcp.f32 %v1147_v36  ;;  %v5950_v31 = vpop.eup %5949  ;;  %4022 = vxpose.xlu1.b32.start [1/4] (short) %v1287_v48, 128  ;;  %v11267_v47 = vld [vmem:[#allocation23_spill] sm:$0xff] }
 0x546   : > { %5359 = vmatprep.subr.bf16.mxu0 %v5358_v32  ;;  %v928_v32 = vsel %vm926_vm13, %v927_v46, %v925_v4  ;;  %v930_v62 = vmul.f32 %v5950_v31, %v9015_v18  ;;  %4054 = vxpose.xlu0.b32.start [1/4] (short) %v1288_v26, 128  ;;  %v5952_v7 = vpop.eup %5951  ;;  %v11269_v46 = vld [vmem:[#allocation27_spill] sm:$0xff]  ;;  %v11274_v4 = vld [vmem:[#allocation42_spill] sm:$0xff] }
 0x547   : > { %v2950_v49 = vadd.f32 %v8960_v25, %v2949_v5  ;;  %v1148_v43 = vmax.f32 %v928_v32, 1e-12  ;;  %v1115_v30 = vmul.f32 %v5952_v7, %v9020_v6  ;;  %v1119_v25 = vand.u32 2147483648, %v9020_v6  ;;  %v11276_v32 = vld [vmem:[#allocation36_spill] sm:$0xff] }
 0x548   : > { %v932_v20 = vsel %vm931_vm0, %v9015_v18, %v930_v62 }
 0x549   : > { %5361 = vmatpush1.bf16.msra.mxu0 %v11253_v3  ;;  %v2951_v54 = vadd.f32 %v8963_v1, %v2950_v49  ;;  %5957 = vrcp.f32 %v1148_v43  ;;  %v5954_v33 = vpop.eup %5953  ;;  %v935_v24 = vsel %vm933_vm2, %v934_v23, %v932_v20  ;;  %v1117_v10 = vsel %vm1116_vm3, %v9020_v6, %v1115_v30  ;;  %v11277_v49 = vld [vmem:[#allocation8_spill] sm:$0xff]  ;;  %v11281_v30 = vld [vmem:[#allocation31_spill] sm:$0xff] }
 0x54a   : > { %5363 = vmatprep.subr.bf16.mxu0 %v5362_v8  ;;  %v11254_v8 = vpack.c.bf16 %v8748_v16, %v8739_v9  ;;  %v937_v18 = vmul.f32 %v5954_v33, %v9030_v19  ;;  %v1149_v56 = vmax.f32 %v935_v24, 1e-12  ;;  %v1120_v39 = vsel %vm1118_vm4, %v1119_v25, %v1117_v10  ;;  %v11283_v25 = vld [vmem:[#allocation34_spill] sm:$0xff]  ;;  %v11287_v10 = vld [vmem:[#allocation33_spill] sm:$0xff] }
 0x54b   : > { %v2952_v35 = vadd.f32 %v8969_v42, %v2951_v54  ;;  %v941_v16 = vand.u32 2147483648, %v9030_v19  ;;  %v1228_v15 = vmax.f32 %v1120_v39, 1e-12  ;;  %v1134_v6 = vsel %vm1132_vm15, %v1133_v40, %v1131_v58  ;;  %v11275_v40 = vld [vmem:[#allocation43_spill] sm:$0xff]  ;;  %v11279_v58 = vld [vmem:[#allocation45_spill] sm:$0xff]  ;;  %v11280_v54 = vld [vmem:[#allocation46_spill] sm:$0xff] }
 0x54c   : > { %v939_v34 = vsel %vm938_vm5, %v9030_v19, %v937_v18  ;;  %5959 = vrcp.f32 %v1149_v56  ;;  %v11255_v1 = vpack.c.bf16 %v8765_v52, %v8757_v0  ;;  %v1230_v19 = vmax.f32 %v1134_v6, 1e-12  ;;  %v11257_v0 = vld [vmem:[#allocation65_spill] sm:$0xff]  ;;  %v11285_v24 = vld [vmem:[#allocation30_spill] sm:$0xff] }
 0x54d   : > { %5365 = vmatpush1.bf16.msra.mxu0 %v11254_v8  ;;  %v2953_v9 = vadd.f32 %v8974_v50, %v2952_v35  ;;  %v942_v42 = vsel %vm940_vm6, %v941_v16, %v939_v34  ;;  %5961 = vrcp.f32 %v1228_v15  ;;  %v11259_v27 = vpack.c.bf16 %v11257_v0, %v11258_v53  ;;  %v11260_v50 = vld [vmem:[#allocation25_spill] sm:$0xff]  ;;  %v11289_v16 = vld [vmem:[#allocation50_spill] sm:$0xff]  ;;  %v11290_v15 = vld [vmem:[#allocation48_spill] sm:$0xff] }
 0x54e   : > { %5367 = vmatprep.subr.bf16.mxu0 %v5366_v55  ;;  %v1150_v11 = vmax.f32 %v942_v42, 1e-12  ;;  %5963 = vrcp.f32 %v1229_v45  ;;  %v11278_v45 = vpack.c.bf16 %v11276_v32, %v11277_v49 }
 0x54f   : > { %v5956_v55 = vpop.eup %5955  ;;  %v9090_v61 = vadd.f32 %v8985_v59, %v2953_v9 }
 0x550   : > { %v1176_v38 = vmul.f32 10.0, %v5956_v55  ;;  %5965 = vrcp.f32 %v1150_v11 }
 0x551   : > { %5369 = vmatpush1.bf16.msra.mxu0 %v11255_v1  ;;  %5967 = vrcp.f32 %v1230_v19 }
 0x552   : > { %5371 = vmatprep.subr.bf16.mxu0 %v5370_v17  ;;  %v9103_v59 = vmul.f32 %v1176_v38, %v11260_v50  ;;  %v11262_v17 = vld [vmem:[#allocation75_spill] sm:$0xff]  ;;  %v9113_v29 = vmul.f32 %v1176_v38, %v11267_v47 }
 0x553   : > { %v5958_v52 = vpop.eup %5957  ;;  %v11264_v60 = vpack.c.bf16 %v11262_v17, %v11263_v41 }
 0x554   : > { %v1178_v63 = vmul.f32 10.0, %v5958_v52  ;;  %11261 = vst [vmem:[#allocation32_spill] sm:$0xff] %v9103_v59  ;;  %11268 = vst [vmem:[#allocation35_spill] sm:$0xff] %v9113_v29 }
 0x555   : > { %5373 = vmatpush1.bf16.msra.mxu0 %v11256_v2 }
 0x556   : > { %5383 = vmatprep.subr.bf16.mxu0 %v11259_v27  ;;  %v9110_v44 = vmul.f32 %v1178_v63, %v11265_v22  ;;  %v9116_v36 = vmul.f32 %v1178_v63, %v11269_v46  ;;  %v5960_v51 = vpop.eup %5959 }
 0x557   : > { %v5962_v26 = vpop.eup %5961  ;;  %v1180_v62 = vmul.f32 10.0, %v5960_v51 }
 0x558   : > { %3101 = vmatmul.mubr.f32.vlgmr.msra.gmra.mrb[100].mxu0 %v8855_v37  ;;  %11266 = vst [vmem:[#allocation47_spill] sm:$0xff] %v9110_v44  ;;  %11270 = vst [vmem:[#allocation19_spill] sm:$0xff] %v9116_v36  ;;  %v11271_v37 = vld [vmem:[#allocation17_spill] sm:$0xff]  ;;  %v5964_v5 = vpop.eup %5963  ;;  %v1289_v31 = vmul.f32 %v5962_v26, %v11274_v4  ;;  %v1290_v3 = vmul.f32 %v5962_v26, %v11275_v40 }
 0x559   : > { %5385 = vmatpush1.bf16.msra.mxu0 %v11264_v60  ;;  %3938 = vmatprep.mubr.f32.mxu0 %v11082_v14  ;;  %v11273_v28 = vpack.c.bf16 %v11271_v37, %v11272_v21  ;;  %v1291_v23 = vmul.f32 %v5964_v5, %v11279_v58  ;;  %v1292_v20 = vmul.f32 %v5964_v5, %v11280_v54 }
 0x55a   : > { %v5966_v43 = vpop.eup %5965  ;;  %4023 = vxpose.xlu1.b32.cont [2/4] (short) %v1289_v31, 128  ;;  %4055 = vxpose.xlu0.b32.cont [2/4] (short) %v1290_v3, 128  ;;  %v9135_v33 = vmul.f32 %v1180_v62, %v11281_v30  ;;  %v9141_v35 = vmul.f32 %v1180_v62, %v11285_v24 }
 0x55b   : > { %5387 = vmatprep.subr.bf16.mxu0 %v11273_v28  ;;  %v1182_v7 = vmul.f32 10.0, %v5966_v43  ;;  %v5968_v56 = vpop.eup %5967 }
 0x55c   : > { %11282 = vst [vmem:[#allocation20_spill] sm:$0xff] %v9135_v33  ;;  %11286 = vst [vmem:[#allocation38_spill] sm:$0xff] %v9141_v35  ;;  %v1294_v9 = vmul.f32 %v5968_v56, %v11289_v16  ;;  %v1293_v34 = vmul.f32 %v5968_v56, %v11290_v15 }
 0x55d   : > { %5389 = vmatpush1.bf16.msra.mxu0 %v11278_v45  ;;  %v9138_v8 = vmul.f32 %v1182_v7, %v11283_v25  ;;  %v9144_v18 = vmul.f32 %v1182_v7, %v11287_v10 }
 0x55e   : > { %4024 = vxpose.xlu1.b32.cont [3/4] (short) %v1291_v23, 128  ;;  %4056 = vxpose.xlu0.b32.cont [3/4] (short) %v1292_v20, 128 }
 0x55f   : > { %11284 = vst [vmem:[#allocation53_spill] sm:$0xff] %v9138_v8  ;;  %11288 = vst [vmem:[#allocation69_spill] sm:$0xff] %v9144_v18 }
 0x560   : > { %5173 = vmatmul.mubr.msk.f32.vlgmr.msra.gmra.mrb[102].mxu0 %vm1359_vm7, %v9005_v57 }
 0x562   : > { %4057 = vxpose.xlu0.b32.end [4/4] (short) %v1294_v9, 128  ;;  %4025 = vxpose.xlu1.b32.end [4/4] (short) %v1293_v34, 128 }
 0x584   : > { %v9152_v6 = vpop.f32.mrb[130].mxu1 }
 0x585   : > { %v9154_v1 = vpop.f32.mrb[131].mxu1 }
 0x588   : > { %v9156_v42 = vpop.f32.mrb[132].mxu1 }
 0x589   : > { %v9158_v55 = vpop.f32.mrb[133].mxu1 }
 0x58c   : > { %v9160_v11 = vpop.f32.mrb[134].mxu1 }
 0x58d   : > { %v3530_v19 = vmax.f32 %v9152_v6, %v9160_v11  ;;  %v9164_v38 = vpop.f32.mrb[135].mxu1 }
 0x58e   : > { %v3567_v2 = vmax.f32 %v9154_v1, %v9164_v38 }
 0x590   : > { %v9168_v52 = vpop.f32.mrb[136].mxu1 }
 0x591   : > { %v3531_v0 = vmax.f32 %v9156_v42, %v9168_v52  ;;  %v9172_v53 = vpop.f32.mrb[137].mxu1 }
 0x592   : > { %v3568_v27 = vmax.f32 %v9158_v55, %v9172_v53 }
 0x594   : > { %v9176_v63 = vpop.f32.mrb[138].mxu1 }
 0x595   : > { %v3532_v50 = vmax.f32 %v3530_v19, %v9176_v63  ;;  %v9179_v17 = vpop.f32.mrb[139].mxu1 }
 0x596   : > { %11291 = vst [vmem:[#allocation70_spill] sm:$0xff] %v9179_v17  ;;  %v3569_v41 = vmax.f32 %v3567_v2, %v9179_v17 }
 0x598   : > { %v9182_v60 = vpop.f32.mrb[140].mxu1 }
 0x599   : > { %v3533_v22 = vmax.f32 %v3531_v0, %v9182_v60  ;;  %v9185_v47 = vpop.f32.mrb[141].mxu1 }
 0x59a   : > { %11292 = vst [vmem:[#allocation6_spill] sm:$0xff] %v9185_v47  ;;  %v3570_v46 = vmax.f32 %v3568_v27, %v9185_v47 }
 0x59c   : > { %v9188_v51 = vpop.f32.mrb[142].mxu1 }
 0x59d   : > { %v3534_v37 = vmax.f32 %v3532_v50, %v9188_v51  ;;  %v9191_v21 = vpop.f32.mrb[143].mxu1 }
 0x59e   : > { %11293 = vst [vmem:[#allocation5_spill] sm:$0xff] %v9191_v21  ;;  %v3571_v28 = vmax.f32 %v3569_v41, %v9191_v21 }
 0x5a0   : > { %v9194_v26 = vpop.f32.mrb[144].mxu1 }
 0x5a1   : > { %v3535_v5 = vmax.f32 %v3533_v22, %v9194_v26  ;;  %v9197_v4 = vpop.f32.mrb[145].mxu1 }
 0x5a2   : > { %11294 = vst [vmem:[#allocation7_spill] sm:$0xff] %v9197_v4  ;;  %v3572_v31 = vmax.f32 %v3570_v46, %v9197_v4 }
 0x5a4   : > { %v9200_v40 = vpop.f32.mrb[146].mxu1 }
 0x5a5   : > { %v3536_v3 = vmax.f32 %v3534_v37, %v9200_v40  ;;  %v9203_v32 = vpop.f32.mrb[147].mxu1 }
 0x5a6   : > { %11295 = vst [vmem:[#allocation12_spill] sm:$0xff] %v9203_v32  ;;  %v3573_v49 = vmax.f32 %v3571_v28, %v9203_v32 }
 0x5a8   : > { %v9206_v45 = vpop.f32.mrb[148].mxu1 }
 0x5a9   : > { %v3537_v62 = vmax.f32 %v3535_v5, %v9206_v45  ;;  %v9209_v43 = vpop.f32.mrb[149].mxu1 }
 0x5aa   : > { %11296 = vst [vmem:[#allocation10_spill] sm:$0xff] %v9209_v43  ;;  %v3574_v7 = vmax.f32 %v3572_v31, %v9209_v43 }
 0x5ac   : > { %v9212_v58 = vpop.f32.mrb[150].mxu1 }
 0x5ad   : > { %v3538_v23 = vmax.f32 %v3536_v3, %v9212_v58  ;;  %v9215_v54 = vpop.f32.mrb[151].mxu1 }
 0x5ae   : > { %11297 = vst [vmem:[#allocation9_spill] sm:$0xff] %v9215_v54  ;;  %v3575_v20 = vmax.f32 %v3573_v49, %v9215_v54 }
 0x5b0   : > { %v9218_v30 = vpop.f32.mrb[152].mxu1 }
 0x5b1   : > { %v3539_v25 = vmax.f32 %v3537_v62, %v9218_v30  ;;  %v9221_v24 = vpop.f32.mrb[153].mxu1 }
 0x5b2   : > { %11298 = vst [vmem:[#allocation11_spill] sm:$0xff] %v9221_v24  ;;  %v3576_v10 = vmax.f32 %v3574_v7, %v9221_v24 }
 0x5b4   : > { %v9224_v56 = vpop.f32.mrb[154].mxu1 }
 0x5b5   : > { %v3540_v16 = vmax.f32 %v3538_v23, %v9224_v56  ;;  %v9227_v9 = vpop.f32.mrb[155].mxu1 }
 0x5b6   : > { %11299 = vst [vmem:[#allocation24_spill] sm:$0xff] %v9227_v9  ;;  %v3577_v15 = vmax.f32 %v3575_v20, %v9227_v9 }
 0x5b8   : > { %v9230_v34 = vpop.f32.mrb[156].mxu1 }
 0x5b9   : > { %v3541_v19 = vmax.f32 %v3539_v25, %v9230_v34  ;;  %v9233_v2 = vpop.f32.mrb[157].mxu1 }
 0x5ba   : > { %11300 = vst [vmem:[#allocation16_spill] sm:$0xff] %v9233_v2  ;;  %v3578_v0 = vmax.f32 %v3576_v10, %v9233_v2 }
 0x5bc   : > { %v9236_v27 = vpop.f32.mrb[158].mxu1 }
 0x5bd   : > { %v3542_v50 = vmax.f32 %v3540_v16, %v9236_v27  ;;  %v9239_v41 = vpop.f32.mrb[159].mxu1 }
 0x5be   : > { %11301 = vst [vmem:[#allocation59_spill] sm:$0xff] %v9239_v41  ;;  %v3579_v22 = vmax.f32 %v3577_v15, %v9239_v41 }
 0x5c0   : > { %v9242_v46 = vpop.f32.mrb[160].mxu1 }
 0x5c1   : > { %v3543_v37 = vmax.f32 %v3541_v19, %v9242_v46  ;;  %v9245_v28 = vpop.f32.mrb[161].mxu1 }
 0x5c2   : > { %11302 = vst [vmem:[#allocation60_spill] sm:$0xff] %v9245_v28  ;;  %v3580_v5 = vmax.f32 %v3578_v0, %v9245_v28 }
 0x5c4   : > { %v9248_v31 = vpop.f32.mrb[162].mxu1 }
 0x5c5   : > { %v3544_v3 = vmax.f32 %v3542_v50, %v9248_v31  ;;  %v9251_v49 = vpop.f32.mrb[163].mxu1 }
 0x5c6   : > { %11303 = vst [vmem:[#allocation62_spill] sm:$0xff] %v9251_v49  ;;  %v3581_v62 = vmax.f32 %v3579_v22, %v9251_v49 }
 0x5c8   : > { %v9254_v7 = vpop.f32.mrb[164].mxu1 }
 0x5c9   : > { %v3545_v23 = vmax.f32 %v3543_v37, %v9254_v7  ;;  %v9257_v20 = vpop.f32.mrb[165].mxu1 }
 0x5ca   : > { %11304 = vst [vmem:[#allocation63_spill] sm:$0xff] %v9257_v20  ;;  %v3582_v25 = vmax.f32 %v3580_v5, %v9257_v20 }
 0x5cc   : > { %v9260_v10 = vpop.f32.mrb[166].mxu1 }
 0x5cd   : > { %v3546_v16 = vmax.f32 %v3544_v3, %v9260_v10  ;;  %v9263_v15 = vpop.f32.mrb[167].mxu1 }
 0x5ce   : > { %11305 = vst [vmem:[#allocation64_spill] sm:$0xff] %v9263_v15  ;;  %v3583_v19 = vmax.f32 %v3581_v62, %v9263_v15 }
 0x5d0   : > { %v9266_v0 = vpop.f32.mrb[168].mxu1 }
 0x5d1   : > { %v3547_v50 = vmax.f32 %v3545_v23, %v9266_v0  ;;  %v9269_v22 = vpop.f32.mrb[169].mxu1 }
 0x5d2   : > { %11306 = vst [vmem:[#allocation55_spill] sm:$0xff] %v9269_v22  ;;  %v3584_v37 = vmax.f32 %v3582_v25, %v9269_v22 }
 0x5d4   : > { %v9272_v57 = vpop.f32.mrb[170].mxu1 }
 0x5d5   : > { %v3548_v5 = vmax.f32 %v3546_v16, %v9272_v57  ;;  %v9275_v39 = vpop.f32.mrb[171].mxu1 }
 0x5d6   : > { %11307 = vst [vmem:[#allocation71_spill] sm:$0xff] %v9275_v39  ;;  %v3585_v3 = vmax.f32 %v3583_v19, %v9275_v39  ;;  %v2918_v39 = vrot.slane %v8977_v12, 4 }
 0x5d8   : > { %v9278_v13 = vpop.f32.mrb[172].mxu1 }
 0x5d9   : > { %v3549_v62 = vmax.f32 %v3547_v50, %v9278_v13  ;;  %v9281_v48 = vpop.f32.mrb[173].mxu1 }
 0x5da   : > { %11308 = vst [vmem:[#allocation74_spill] sm:$0xff] %v9281_v48  ;;  %v3586_v23 = vmax.f32 %v3584_v37, %v9281_v48 }
 0x5dc   : > { %v9284_v35 = vpop.f32.mrb[174].mxu1 }
 0x5dd   : > { %v3550_v25 = vmax.f32 %v3548_v5, %v9284_v35  ;;  %v9287_v18 = vpop.f32.mrb[175].mxu1 }
 0x5de   : > { %11309 = vst [vmem:[#allocation21_spill] sm:$0xff] %v9287_v18  ;;  %v3587_v16 = vmax.f32 %v3585_v3, %v9287_v18 }
 0x5e0   : > { %v9290_v33 = vpop.f32.mrb[176].mxu1 }
 0x5e1   : > { %v3551_v19 = vmax.f32 %v3549_v62, %v9290_v33  ;;  %v9293_v8 = vpop.f32.mrb[177].mxu1 }
 0x5e2   : > { %11310 = vst [vmem:[#allocation56_spill] sm:$0xff] %v9293_v8  ;;  %v3588_v50 = vmax.f32 %v3586_v23, %v9293_v8 }
 0x5e4   : > { %v9296_v14 = vpop.f32.mrb[178].mxu1 }
 0x5e5   : > { %v3552_v37 = vmax.f32 %v3550_v25, %v9296_v14  ;;  %v9299_v29 = vpop.f32.mrb[179].mxu1 }
 0x5e6   : > { %11311 = vst [vmem:[#allocation76_spill] sm:$0xff] %v9299_v29  ;;  %v3589_v5 = vmax.f32 %v3587_v16, %v9299_v29 }
 0x5e8   : > { %v9302_v36 = vpop.f32.mrb[180].mxu1 }
 0x5e9   : > { %v3553_v3 = vmax.f32 %v3551_v19, %v9302_v36  ;;  %v9305_v59 = vpop.f32.mrb[181].mxu1 }
 0x5ea   : > { %11312 = vst [vmem:[#allocation68_spill] sm:$0xff] %v9305_v59  ;;  %v3590_v62 = vmax.f32 %v3588_v50, %v9305_v59 }
 0x5ec   : > { %v9308_v44 = vpop.f32.mrb[182].mxu1 }
 0x5ed   : > { %v3554_v23 = vmax.f32 %v3552_v37, %v9308_v44  ;;  %v9311_v8 = vpop.f32.mrb[183].mxu1 }
 0x5ee   : > { %11313 = vst [vmem:[#allocation52_spill] sm:$0xff] %v9311_v8  ;;  %v3591_v25 = vmax.f32 %v3589_v5, %v9311_v8 }
 0x5f0   : > { %v9314_v18 = vpop.f32.mrb[184].mxu1 }
 0x5f1   : > { %v3555_v16 = vmax.f32 %v3553_v3, %v9314_v18  ;;  %v9317_v29 = vpop.f32.mrb[185].mxu1 }
 0x5f2   : > { %11314 = vst [vmem:[#allocation54_spill] sm:$0xff] %v9317_v29  ;;  %v3592_v19 = vmax.f32 %v3590_v62, %v9317_v29  ;;  %v2919_v62 = vadd.f32 %v2918_v39, %v8977_v12  ;;  %v2955_v29 = vrot.slane %v9090_v61, 4 }
 0x5f4   : > { %v9320_v48 = vpop.f32.mrb[186].mxu1 }
 0x5f5   : > { %v3556_v50 = vmax.f32 %v3554_v23, %v9320_v48  ;;  %v9323_v59 = vpop.f32.mrb[187].mxu1 }
 0x5f6   : > { %11315 = vst [vmem:[#allocation67_spill] sm:$0xff] %v9323_v59  ;;  %v3593_v37 = vmax.f32 %v3591_v25, %v9323_v59  ;;  %v2956_v59 = vadd.f32 %v2955_v29, %v9090_v61 }
 0x5f8   : > { %v9327_v22 = vpop.f32.mrb[188].mxu1  ;;  %v2957_v2 = vrot.slane %v2956_v59, 2 }
 0x5f9   : > { %v3557_v5 = vmax.f32 %v3555_v16, %v9327_v22  ;;  %v9330_v8 = vpop.f32.mrb[189].mxu1  ;;  %v2920_v16 = vrot.slane %v2919_v62, 2 }
 0x5fa   : > { %11316 = vst [vmem:[#allocation73_spill] sm:$0xff] %v9330_v8  ;;  %v3594_v3 = vmax.f32 %v3592_v19, %v9330_v8 }
 0x5fb   : > { %v2921_v41 = vadd.f32 %v2920_v16, %v2919_v62 }
 0x5fc   : > { %v9335_v15 = vpop.f32.mrb[190].mxu1 }
 0x5fd   : > { %v3558_v23 = vmax.f32 %v3556_v50, %v9335_v15  ;;  %v9338_v20 = vpop.f32.mrb[191].mxu1 }
 0x5fe   : > { %11317 = vst [vmem:[#allocation44_spill] sm:$0xff] %v9338_v20  ;;  %v3595_v25 = vmax.f32 %v3593_v37, %v9338_v20  ;;  %v2922_v37 = vrot.slane %v2921_v41, 1  ;;  %v2958_v20 = vadd.f32 %v2957_v2, %v2956_v59 }
 0x600   : > { %v9342_v49 = vpop.f32.mrb[192].mxu1  ;;  %v2923_v4 = vadd.f32 %v2922_v37, %v2921_v41 }
 0x601   : > { %v3559_v28 = vmax.f32 %v3557_v5, %v9342_v49  ;;  %v9345_v19 = vpop.f32.mrb[193].mxu1  ;;  %v2959_v5 = vrot.slane %v2958_v20, 1 }
 0x602   : > { %11318 = vst [vmem:[#allocation49_spill] sm:$0xff] %v9345_v19  ;;  %v3596_v12 = vmax.f32 %v3594_v3, %v9345_v19  ;;  %5969 = vrcp.f32 %v2923_v4 }
 0x603   : > { %v3560_v39 = vmax.f32 %v3558_v23, %v3559_v28  ;;  %v2960_v3 = vadd.f32 %v2959_v5, %v2958_v20  ;;  %v11333_v20 = vld [vmem:[#allocation64_spill] sm:$0xff] }
 0x604   : > { %v3597_v8 = vmax.f32 %v3595_v25, %v3596_v12 }
 0x605   : > { %v3561_v50 = vrot.slane %v3560_v39, 4  ;;  %5971 = vrcp.f32 %v2960_v3  ;;  %v11345_v2 = vld [vmem:[#allocation44_spill] sm:$0xff] }
 0x606   : > { %v3598_v9 = vrot.slane %v3597_v8, 4 }
 0x607   : > { %v3562_v24 = vmax.f32 %v3560_v39, %v3561_v50 }
 0x608   : > { %v3599_v54 = vmax.f32 %v3597_v8, %v3598_v9 }
 0x609   : > { %v3563_v61 = vrot.slane %v3562_v24, 2 }
 0x60a   : > { %v3600_v29 = vrot.slane %v3599_v54, 2 }
 0x60b   : > { %v3564_v43 = vmax.f32 %v3562_v24, %v3563_v61 }
 0x60c   : > { %v3601_v32 = vmax.f32 %v3599_v54, %v3600_v29 }
 0x60d   : > { %v3565_v21 = vrot.slane %v3564_v43, 1 }
 0x60e   : > { %v3602_v47 = vrot.slane %v3601_v32, 1 }
 0x60f   : > { %v9348_v17 = vmax.f32 %v3564_v43, %v3565_v21 }
 0x610   : > { %v9350_v28 = vmax.f32 %v3601_v32, %v3602_v47 }
 0x611   : > { %v3604_v62 = vsub.f32 %v9152_v6, %v9348_v17  ;;  %v3606_v59 = vsub.f32 %v9156_v42, %v9348_v17  ;;  %v3608_v8 = vsub.f32 %v9160_v11, %v9348_v17  ;;  %v3610_v54 = vsub.f32 %v9168_v52, %v9348_v17 }
 0x612   : > { %v3612_v21 = vsub.f32 %v9176_v63, %v9348_v17  ;;  %v3614_v47 = vsub.f32 %v9182_v60, %v9348_v17  ;;  %v3616_v4 = vsub.f32 %v9188_v51, %v9348_v17  ;;  %v3618_v6 = vsub.f32 %v9194_v26, %v9348_v17 }
 0x613   : > { %v3620_v42 = vsub.f32 %v9200_v40, %v9348_v17  ;;  %v3622_v11 = vsub.f32 %v9206_v45, %v9348_v17  ;;  %v3624_v52 = vsub.f32 %v9212_v58, %v9348_v17  ;;  %v3626_v63 = vsub.f32 %v9218_v30, %v9348_v17 }
 0x614   : > { %v3628_v60 = vsub.f32 %v9224_v56, %v9348_v17  ;;  %v3630_v51 = vsub.f32 %v9230_v34, %v9348_v17  ;;  %v3632_v26 = vsub.f32 %v9236_v27, %v9348_v17  ;;  %v3634_v40 = vsub.f32 %v9242_v46, %v9348_v17 }
 0x615   : > { %v3636_v32 = vsub.f32 %v9248_v31, %v9348_v17  ;;  %v3638_v45 = vsub.f32 %v9254_v7, %v9348_v17  ;;  %v3640_v43 = vsub.f32 %v9260_v10, %v9348_v17  ;;  %v3642_v58 = vsub.f32 %v9266_v0, %v9348_v17  ;;  %v9418_v10 = vpop.eup %5969 }
 0x616   : > { %v3644_v30 = vsub.f32 %v9272_v57, %v9348_v17  ;;  %v3646_v24 = vsub.f32 %v9278_v13, %v9348_v17  ;;  %v3648_v56 = vsub.f32 %v9284_v35, %v9348_v17  ;;  %v3650_v9 = vsub.f32 %v9290_v33, %v9348_v17  ;;  %v11335_v33 = vld [vmem:[#allocation71_spill] sm:$0xff] }
 0x617   : > { %v3668_v46 = vmul.f32 1.442695, %v3604_v62  ;;  %v3672_v31 = vmul.f32 1.442695, %v3606_v59  ;;  %v3676_v7 = vmul.f32 1.442695, %v3608_v8 }
 0x618   : > { %v3680_v0 = vmul.f32 1.442695, %v3610_v54  ;;  %v3684_v25 = vmul.f32 1.442695, %v3612_v21  ;;  %v3688_v16 = vmul.f32 1.442695, %v3614_v47 }
 0x619   : > { %5973 = vpow2.f32 %v3668_v46  ;;  %v3692_v12 = vmul.f32 1.442695, %v3616_v4  ;;  %v3696_v39 = vmul.f32 1.442695, %v3618_v6  ;;  %v3700_v50 = vmul.f32 1.442695, %v3620_v42 }
 0x61a   : > { %5975 = vpow2.f32 %v3672_v31  ;;  %v3704_v37 = vmul.f32 1.442695, %v3622_v11  ;;  %v3708_v61 = vmul.f32 1.442695, %v3624_v52  ;;  %v3712_v29 = vmul.f32 1.442695, %v3626_v63  ;;  %v9432_v52 = vpop.eup %5971 }
 0x61b   : > { %5977 = vpow2.f32 %v3676_v7  ;;  %v3716_v5 = vmul.f32 1.442695, %v3628_v60  ;;  %v3720_v62 = vmul.f32 1.442695, %v3630_v51  ;;  %v3724_v59 = vmul.f32 1.442695, %v3632_v26 }
 0x61c   : > { %5979 = vpow2.f32 %v3680_v0  ;;  %v3728_v8 = vmul.f32 1.442695, %v3634_v40  ;;  %v3732_v3 = vmul.f32 1.442695, %v3636_v32  ;;  %v3736_v54 = vmul.f32 1.442695, %v3638_v45 }
 0x61d   : > { %5981 = vpow2.f32 %v3684_v25  ;;  %v3740_v21 = vmul.f32 1.442695, %v3640_v43  ;;  %v3744_v47 = vmul.f32 1.442695, %v3642_v58  ;;  %v9422_v46 = vmul.f32 1.442695, %v3644_v30 }
 0x61e   : > { %5983 = vpow2.f32 %v3688_v16  ;;  %v9424_v4 = vmul.f32 1.442695, %v3646_v24  ;;  %v9426_v6 = vmul.f32 1.442695, %v3648_v56  ;;  %v9428_v42 = vmul.f32 1.442695, %v3650_v9 }
 0x61f   : > { %5985 = vpow2.f32 %v3692_v12  ;;  %v11319_v60 = vld [vmem:[#allocation70_spill] sm:$0xff]  ;;  %v11321_v45 = vld [vmem:[#allocation5_spill] sm:$0xff]  ;;  %v11322_v58 = vld [vmem:[#allocation7_spill] sm:$0xff] }
 0x620   : > { %5987 = vpow2.f32 %v3696_v39  ;;  %v11320_v26 = vld [vmem:[#allocation6_spill] sm:$0xff]  ;;  %v11323_v24 = vld [vmem:[#allocation12_spill] sm:$0xff]  ;;  %v11325_v0 = vld [vmem:[#allocation9_spill] sm:$0xff] }
 0x621   : > { %5989 = vpow2.f32 %v3700_v50  ;;  %v11324_v31 = vld [vmem:[#allocation10_spill] sm:$0xff]  ;;  %v11326_v16 = vld [vmem:[#allocation11_spill] sm:$0xff]  ;;  %v11328_v56 = vld [vmem:[#allocation16_spill] sm:$0xff] }
 0x622   : > { %5991 = vpow2.f32 %v3704_v37  ;;  %v11329_v12 = vld [vmem:[#allocation59_spill] sm:$0xff]  ;;  %v11330_v40 = vld [vmem:[#allocation60_spill] sm:$0xff]  ;;  %v11331_v51 = vld [vmem:[#allocation62_spill] sm:$0xff] }
 0x623   : > { %v9440_v32 = vpop.eup %5973  ;;  %5993 = vpow2.f32 %v3708_v61  ;;  %v11327_v61 = vld [vmem:[#allocation24_spill] sm:$0xff]  ;;  %v11332_v7 = vld [vmem:[#allocation63_spill] sm:$0xff]  ;;  %v11344_v63 = vld [vmem:[#allocation73_spill] sm:$0xff] }
 0x624   : > { %v9448_v9 = vpop.eup %5975  ;;  %5995 = vpow2.f32 %v3712_v29  ;;  %v11334_v43 = vld [vmem:[#allocation55_spill] sm:$0xff] }
 0x625   : > { %v9458_v50 = vpop.eup %5977  ;;  %5997 = vpow2.f32 %v3716_v5  ;;  %v3796_v37 = vadd.f32 %v9448_v9, %v9440_v32  ;;  %v11339_v5 = vld [vmem:[#allocation76_spill] sm:$0xff] }
 0x626   : > { %v9468_v25 = vpop.eup %5979  ;;  %5999 = vpow2.f32 %v3720_v62  ;;  %v11342_v62 = vld [vmem:[#allocation54_spill] sm:$0xff] }
 0x627   : > { %v9476_v11 = vpop.eup %5981  ;;  %6001 = vpow2.f32 %v3724_v59  ;;  %v3797_v29 = vadd.f32 %v9458_v50, %v3796_v37 }
 0x628   : > { %v9483_v41 = vpop.eup %5983  ;;  %6003 = vpow2.f32 %v3728_v8 }
 0x629   : > { %v9491_v13 = vpop.eup %5985  ;;  %6005 = vpow2.f32 %v3732_v3  ;;  %v3798_v37 = vadd.f32 %v9468_v25, %v3797_v29 }
 0x62a   : > { %v9498_v27 = vpop.eup %5987  ;;  %6007 = vpow2.f32 %v3736_v54  ;;  %v11347_v54 = vsub.f32 %v9296_v14, %v9348_v17  ;;  %v11349_v14 = vsub.f32 %v9308_v44, %v9348_v17 }
 0x62b   : > { %v9456_v39 = vpop.f32.mrb[100].mxu0  ;;  %v9506_v35 = vpop.eup %5989  ;;  %6009 = vpow2.f32 %v3740_v21  ;;  %v3799_v29 = vadd.f32 %v9476_v11, %v3798_v37  ;;  %v11348_v21 = vsub.f32 %v9302_v36, %v9348_v17 }
 0x62c   : > { %v9466_v30 = vpop.f32.mrb[101].mxu0  ;;  %v9513_v23 = vpop.eup %5991  ;;  %6011 = vpow2.f32 %v3744_v47  ;;  %v3764_v8 = vmul.f32 1.442695, %v11347_v54 }
 0x62d   : > { %v9523_v37 = vpop.eup %5993  ;;  %6013 = vpow2.f32 %v9422_v46  ;;  %v3800_v47 = vadd.f32 %v9483_v41, %v3799_v29  ;;  %v3768_v3 = vmul.f32 1.442695, %v11348_v21  ;;  %v3772_v46 = vmul.f32 1.442695, %v11349_v14 }
 0x62e   : > { %v9530_v59 = vpop.eup %5995  ;;  %6015 = vpow2.f32 %v9424_v4  ;;  %v11350_v4 = vsub.f32 %v9314_v18, %v9348_v17  ;;  %v11353_v18 = vsub.f32 %v9335_v15, %v9348_v17  ;;  %v11356_v15 = vsub.f32 %v9158_v55, %v9350_v28 }
 0x62f   : > { %6017 = vpow2.f32 %v9426_v6  ;;  %v3801_v29 = vadd.f32 %v9491_v13, %v3800_v47  ;;  %v11352_v47 = vsub.f32 %v9327_v22, %v9348_v17 }
 0x630   : > { %6019 = vpow2.f32 %v9428_v42  ;;  %v3776_v36 = vmul.f32 1.442695, %v11350_v4 }
 0x631   : > { %6021 = vpow2.f32 %v3764_v8  ;;  %v3802_v44 = vadd.f32 %v9498_v27, %v3801_v29  ;;  %v3784_v42 = vmul.f32 1.442695, %v11352_v47  ;;  %v3788_v8 = vmul.f32 1.442695, %v11353_v18 }
 0x632   : > { %6023 = vpow2.f32 %v3768_v3  ;;  %v11354_v29 = vsub.f32 %v9342_v49, %v9348_v17 }
 0x633   : > { %v9521_v34 = vpop.f32.mrb[102].mxu0  ;;  %6025 = vpow2.f32 %v3772_v46  ;;  %v3803_v4 = vadd.f32 %v9506_v35, %v3802_v44  ;;  %v11355_v46 = vsub.f32 %v9154_v1, %v9350_v28  ;;  %v3674_v44 = vmul.f32 1.442695, %v11356_v15 }
 0x634   : > { %11346 = vst [vmem:[#allocation57_spill] sm:$0xff] %v9521_v34  ;;  %v3942_v57 = vpop.f32.mrb[103].mxu0  ;;  %v9536_v34 = vpop.eup %5997  ;;  %6027 = vpow2.f32 %v3776_v36  ;;  %v3792_v3 = vmul.f32 1.442695, %v11354_v29  ;;  %v11358_v36 = vsub.f32 %v9172_v53, %v9350_v28  ;;  %v11362_v53 = vsub.f32 %v11322_v58, %v9350_v28 }
 0x635   : > { %4009 = vmatprep.mubr.f32.mxu0 %v3942_v57  ;;  %v9543_v54 = vpop.eup %5999  ;;  %v11351_v57 = vsub.f32 %v9320_v48, %v9348_v17  ;;  %v3804_v22 = vadd.f32 %v9513_v23, %v3803_v4  ;;  %v3670_v47 = vmul.f32 1.442695, %v11355_v46  ;;  %v11357_v17 = vsub.f32 %v9164_v38, %v9350_v28 }
 0x636   : > { %v9549_v21 = vpop.eup %6001  ;;  %v11359_v4 = vsub.f32 %v11319_v60, %v9350_v28  ;;  %v11361_v38 = vsub.f32 %v11321_v45, %v9350_v28  ;;  %v3698_v60 = vmul.f32 1.442695, %v11362_v53  ;;  %v11366_v58 = vsub.f32 %v11326_v16, %v9350_v28 }
 0x637   : > { %v3780_v6 = vmul.f32 1.442695, %v11351_v57  ;;  %v9555_v14 = vpop.eup %6003  ;;  %v3678_v49 = vmul.f32 1.442695, %v11357_v17  ;;  %v3805_v55 = vadd.f32 %v9523_v37, %v3804_v22  ;;  %v11364_v22 = vsub.f32 %v11324_v31, %v9350_v28 }
 0x638   : > { %v9560_v19 = vpop.eup %6005  ;;  %v3686_v1 = vmul.f32 1.442695, %v11359_v4  ;;  %v3694_v15 = vmul.f32 1.442695, %v11361_v38  ;;  %v3714_v38 = vmul.f32 1.442695, %v11366_v58  ;;  %v3110_v31 = vmul.f32 %v9432_v52, %v9466_v30 }
 0x639   : > { %v9566_v48 = vpop.eup %6007  ;;  %6029 = vpow2.f32 %v3780_v6  ;;  %v3682_v6 = vmul.f32 1.442695, %v11358_v36  ;;  %v3806_v45 = vadd.f32 %v9530_v59, %v3805_v55  ;;  %v11368_v52 = vld [vmem:[#allocation29_spill] sm:$0xff] }
 0x63a   : > { %v9571_v57 = vpop.eup %6009  ;;  %6031 = vpow2.f32 %v3784_v42  ;;  %v11360_v42 = vsub.f32 %v11320_v26, %v9350_v28  ;;  %v3706_v26 = vmul.f32 1.442695, %v11364_v22  ;;  %v9641_v30 = vadd.f32 %v3110_v31, %v11368_v52 }
 0x63b   : > { %v9580_v18 = vpop.eup %6011  ;;  %6033 = vpow2.f32 %v3788_v8  ;;  %v11363_v8 = vsub.f32 %v11323_v24, %v9350_v28  ;;  %v3108_v24 = vmul.f32 %v9418_v10, %v9456_v39  ;;  %v11367_v10 = vld [vmem:[#allocation26_spill] sm:$0xff] }
 0x63c   : > { %v9591_v29 = vpop.eup %6013  ;;  %v3690_v46 = vmul.f32 1.442695, %v11360_v42  ;;  %6035 = vpow2.f32 %v3792_v3  ;;  %v11365_v3 = vsub.f32 %v11325_v0, %v9350_v28  ;;  %v3807_v0 = vadd.f32 %v9536_v34, %v3806_v45 }
 0x63d   : > { %v9600_v17 = vpop.eup %6015  ;;  %v3702_v36 = vmul.f32 1.442695, %v11363_v8  ;;  %6037 = vpow2.f32 %v3670_v47  ;;  %v5392_v47 = vpack.c.bf16 %v9448_v9, %v9440_v32  ;;  %v9638_v39 = vadd.f32 %v3108_v24, %v11367_v10 }
 0x63e   : > { %v9611_v4 = vpop.eup %6017  ;;  %v3710_v42 = vmul.f32 1.442695, %v11365_v3  ;;  %6039 = vpow2.f32 %v3674_v44  ;;  %v11370_v10 = vsub.f32 %v11328_v56, %v9350_v28  ;;  %v11373_v56 = vsub.f32 %v11331_v51, %v9350_v28 }
 0x63f   : > { %v9620_v53 = vpop.eup %6019  ;;  %6041 = vpow2.f32 %v3678_v49  ;;  %v3808_v49 = vadd.f32 %v9543_v54, %v3807_v0 }
 0x640   : > { %v9628_v55 = vpop.eup %6021  ;;  %6043 = vpow2.f32 %v3682_v6  ;;  %v3722_v31 = vmul.f32 1.442695, %v11370_v10  ;;  %v3734_v10 = vmul.f32 1.442695, %v11373_v56 }
 0x641   : > { %v9635_v8 = vpop.eup %6023  ;;  %6045 = vpow2.f32 %v3686_v1  ;;  %v3809_v1 = vadd.f32 %v9549_v21, %v3808_v49 }
 0x642   : > { %v9645_v45 = vpop.eup %6025  ;;  %6047 = vpow2.f32 %v3690_v46  ;;  %v11369_v46 = vsub.f32 %v11327_v61, %v9350_v28  ;;  %v11374_v61 = vsub.f32 %v11332_v7, %v9350_v28  ;;  %v11377_v7 = vsub.f32 %v11335_v33, %v9350_v28 }
 0x643   : > { %v9652_v58 = vpop.eup %6027  ;;  %6049 = vpow2.f32 %v3694_v15  ;;  %v3810_v15 = vadd.f32 %v9555_v14, %v3809_v1 }
 0x644   : > { %v9660_v0 = vpop.eup %6029  ;;  %6051 = vpow2.f32 %v3698_v60  ;;  %v3718_v52 = vmul.f32 1.442695, %v11369_v46 }
 0x645   : > { %v9667_v6 = vpop.eup %6031  ;;  %6053 = vpow2.f32 %v3702_v36  ;;  %v3811_v22 = vadd.f32 %v9560_v19, %v3810_v15  ;;  %v11371_v36 = vsub.f32 %v11329_v12, %v9350_v28 }
 0x646   : > { %v9675_v49 = vpop.eup %6033  ;;  %6055 = vpow2.f32 %v3706_v26  ;;  %v11372_v26 = vsub.f32 %v11330_v40, %v9350_v28  ;;  %v11375_v40 = vsub.f32 %v11333_v20, %v9350_v28 }
 0x647   : > { %v9683_v3 = vpop.eup %6035  ;;  %6057 = vpow2.f32 %v3710_v42  ;;  %v3726_v1 = vmul.f32 1.442695, %v11371_v36  ;;  %v3812_v42 = vadd.f32 %v9566_v48, %v3811_v22 }
 0x648   : > { %v6038_v24 = vpop.eup %6037  ;;  %6059 = vpow2.f32 %v3714_v38  ;;  %v3730_v60 = vmul.f32 1.442695, %v11372_v26  ;;  %v3738_v38 = vmul.f32 1.442695, %v11374_v61  ;;  %v3742_v26 = vmul.f32 1.442695, %v11375_v40 }
 0x649   : > { %v6040_v46 = vpop.eup %6039  ;;  %6061 = vpow2.f32 %v3718_v52  ;;  %v3813_v51 = vadd.f32 %v9571_v57, %v3812_v42  ;;  %v3750_v61 = vmul.f32 1.442695, %v11377_v7  ;;  %v11378_v42 = vld [vmem:[#allocation74_spill] sm:$0xff]  ;;  %v11385_v7 = vpack.c.bf16 %v9468_v25, %v9458_v50 }
 0x64a   : > { %v6042_v44 = vpop.eup %6041  ;;  %v3833_v15 = vadd.f32 %v6040_v46, %v6038_v24  ;;  %v5390_v12 = vpack.c.bf16 %v6040_v46, %v6038_v24  ;;  %6063 = vpow2.f32 %v3722_v31  ;;  %v11376_v24 = vsub.f32 %v11334_v43, %v9350_v28 }
 0x64b   : > { %v6044_v36 = vpop.eup %6043  ;;  %6065 = vpow2.f32 %v3726_v1  ;;  %v3814_v1 = vadd.f32 %v9580_v18, %v3813_v51  ;;  %v11379_v43 = vsub.f32 %v11378_v42, %v9350_v28 }
 0x64c   : > { %v6046_v16 = vpop.eup %6045  ;;  %v3834_v56 = vadd.f32 %v6042_v44, %v3833_v15  ;;  %5391 = vmatprep.subr.bf16.mxu0 %v5390_v12  ;;  %v5394_v22 = vpack.c.bf16 %v6044_v36, %v6042_v44  ;;  %6067 = vpow2.f32 %v3730_v60  ;;  %v3746_v31 = vmul.f32 1.442695, %v11376_v24  ;;  %v11380_v12 = vld [vmem:[#allocation21_spill] sm:$0xff] }
 0x64d   : > { %v6048_v52 = vpop.eup %6047  ;;  %5393 = vmatpush1.bf16.msra.mxu0 %v5392_v47  ;;  %6069 = vpow2.f32 %v3734_v10  ;;  %v3754_v15 = vmul.f32 1.442695, %v11379_v43  ;;  %v11381_v33 = vsub.f32 %v11380_v12, %v9350_v28  ;;  %v3815_v32 = vadd.f32 %v9591_v29, %v3814_v1 }
 0x64e   : > { %v6050_v20 = vpop.eup %6049  ;;  %v3835_v46 = vadd.f32 %v6044_v36, %v3834_v56  ;;  %5395 = vmatprep.subr.bf16.mxu0 %v5394_v22  ;;  %v5398_v44 = vpack.c.bf16 %v6048_v52, %v6046_v16  ;;  %6071 = vpow2.f32 %v3738_v38  ;;  %v11382_v36 = vld [vmem:[#allocation56_spill] sm:$0xff]  ;;  %v11384_v56 = vsub.f32 %v11339_v5, %v9350_v28 }
 0x64f   : > { %v6052_v60 = vpop.eup %6051  ;;  %v3758_v40 = vmul.f32 1.442695, %v11381_v33  ;;  %6073 = vpow2.f32 %v3742_v26  ;;  %v11383_v51 = vsub.f32 %v11382_v36, %v9350_v28  ;;  %v3816_v1 = vadd.f32 %v9600_v17, %v3815_v32  ;;  %v11388_v33 = vld [vmem:[#allocation52_spill] sm:$0xff] }
 0x650   : > { %v6054_v24 = vpop.eup %6053  ;;  %v3836_v9 = vadd.f32 %v6046_v16, %v3835_v46  ;;  %v5402_v47 = vpack.c.bf16 %v6052_v60, %v6050_v20  ;;  %6075 = vpow2.f32 %v3746_v31  ;;  %v3766_v22 = vmul.f32 1.442695, %v11384_v56  ;;  %v11386_v46 = vld [vmem:[#allocation68_spill] sm:$0xff] }
 0x651   : > { %v6056_v10 = vpop.eup %6055  ;;  %v3762_v38 = vmul.f32 1.442695, %v11383_v51  ;;  %5397 = vmatpush1.bf16.msra.mxu0 %v11385_v7  ;;  %6077 = vpow2.f32 %v3750_v61  ;;  %v11387_v43 = vsub.f32 %v11386_v46, %v9350_v28  ;;  %v11389_v5 = vsub.f32 %v11388_v33, %v9350_v28 }
 0x652   : > { %v6058_v42 = vpop.eup %6057  ;;  %v3837_v16 = vadd.f32 %v6048_v52, %v3836_v9  ;;  %5399 = vmatprep.subr.bf16.mxu0 %v5398_v44  ;;  %v5406_v26 = vpack.c.bf16 %v6056_v10, %v6054_v24  ;;  %6079 = vpow2.f32 %v3754_v15  ;;  %v3817_v25 = vadd.f32 %v9611_v4, %v3816_v1  ;;  %v11391_v15 = vld [vmem:[#allocation67_spill] sm:$0xff] }
 0x653   : > { %v6060_v31 = vpop.eup %6059  ;;  %v3770_v12 = vmul.f32 1.442695, %v11387_v43  ;;  %v3774_v36 = vmul.f32 1.442695, %v11389_v5  ;;  %6081 = vpow2.f32 %v3758_v40  ;;  %v11390_v52 = vsub.f32 %v11342_v62, %v9350_v28 }
 0x654   : > { %v6062_v51 = vpop.eup %6061  ;;  %v3838_v50 = vadd.f32 %v6050_v20, %v3837_v16  ;;  %v5410_v32 = vpack.c.bf16 %v6060_v31, %v6058_v42  ;;  %6083 = vpow2.f32 %v3762_v38  ;;  %v11392_v9 = vsub.f32 %v11391_v15, %v9350_v28 }
 0x655   : > { %v6064_v61 = vpop.eup %6063  ;;  %v3778_v44 = vmul.f32 1.442695, %v11390_v52  ;;  %v11393_v7 = vpack.c.bf16 %v9483_v41, %v9476_v11  ;;  %v3818_v1 = vadd.f32 %v9620_v53, %v3817_v25  ;;  %6085 = vpow2.f32 %v3766_v22 }
 0x656   : > { %v3782_v56 = vmul.f32 1.442695, %v11392_v9  ;;  %v6066_v46 = vpop.eup %6065  ;;  %v3839_v20 = vadd.f32 %v6052_v60, %v3838_v50  ;;  %v5414_v40 = vpack.c.bf16 %v6064_v61, %v6062_v51  ;;  %6087 = vpow2.f32 %v3770_v12  ;;  %v11396_v60 = vld [vmem:[#allocation49_spill] sm:$0xff] }
 0x657   : > { %5401 = vmatpush1.bf16.msra.mxu0 %v11393_v7  ;;  %v6068_v38 = vpop.eup %6067  ;;  %v11394_v62 = vsub.f32 %v11344_v63, %v9350_v28  ;;  %v11395_v43 = vsub.f32 %v11345_v2, %v9350_v28  ;;  %v3819_v41 = vadd.f32 %v9628_v55, %v3818_v1  ;;  %6089 = vpow2.f32 %v3774_v36 }
 0x658   : > { %5403 = vmatprep.subr.bf16.mxu0 %v5402_v47  ;;  %v6070_v5 = vpop.eup %6069  ;;  %v3840_v11 = vadd.f32 %v6054_v24, %v3839_v20  ;;  %v5418_v25 = vpack.c.bf16 %v6068_v38, %v6066_v46  ;;  %6091 = vpow2.f32 %v3778_v44  ;;  %v11397_v47 = vsub.f32 %v11396_v60, %v9350_v28 }
 0x659   : > { %v3786_v16 = vmul.f32 1.442695, %v11394_v62  ;;  %v3790_v33 = vmul.f32 1.442695, %v11395_v43  ;;  %v6072_v22 = vpop.eup %6071  ;;  %v11398_v63 = vpack.c.bf16 %v9498_v27, %v9491_v13  ;;  %v3820_v2 = vadd.f32 %v9635_v8, %v3819_v41 }
 0x65a   : > { %v3794_v12 = vmul.f32 1.442695, %v11397_v47  ;;  %v6074_v50 = vpop.eup %6073  ;;  %6093 = vpow2.f32 %v3782_v56  ;;  %v3841_v52 = vadd.f32 %v6056_v10, %v3840_v11  ;;  %v5422_v15 = vpack.c.bf16 %v6072_v22, %v6070_v5 }
 0x65b   : > { %5405 = vmatpush1.bf16.msra.mxu0 %v11398_v63  ;;  %v6076_v36 = vpop.eup %6075  ;;  %6095 = vpow2.f32 %v3786_v16  ;;  %v3821_v44 = vadd.f32 %v9645_v45, %v3820_v2  ;;  %v11399_v27 = vpack.c.bf16 %v9513_v23, %v9506_v35 }
 0x65c   : > { %5407 = vmatprep.subr.bf16.mxu0 %v5406_v26  ;;  %v6078_v24 = vpop.eup %6077  ;;  %6097 = vpow2.f32 %v3790_v33  ;;  %v3842_v9 = vadd.f32 %v6058_v42, %v3841_v52  ;;  %v5426_v28 = vpack.c.bf16 %v6076_v36, %v6074_v50  ;;  %v11400_v33 = vpack.c.bf16 %v9530_v59, %v9523_v37 }
 0x65d   : > { %v6080_v7 = vpop.eup %6079  ;;  %6099 = vpow2.f32 %v3794_v12  ;;  %v3822_v56 = vadd.f32 %v9652_v58, %v3821_v44 }
 0x65e   : > { %v6082_v13 = vpop.eup %6081  ;;  %v3843_v10 = vadd.f32 %v6060_v31, %v3842_v9  ;;  %v5430_v26 = vpack.c.bf16 %v6080_v7, %v6078_v24  ;;  %v11402_v9 = vpack.c.bf16 %v9555_v14, %v9549_v21  ;;  %v11405_v21 = vpack.c.bf16 %v9600_v17, %v9591_v29  ;;  %v6238_v29 = vld [vmem:[%s10589_s2] sm:$0xf] }
 0x65f   : > { %5409 = vmatpush1.bf16.msra.mxu0 %v11399_v27  ;;  %v6084_v1 = vpop.eup %6083  ;;  %v3823_v62 = vadd.f32 %v9660_v0, %v3822_v56  ;;  %4779 = vrot.lane.b32.xlu0 %v6238_v29, %s6306_s8 }
 0x660   : > { %5411 = vmatprep.subr.bf16.mxu0 %v5410_v32  ;;  %v6086_v20 = vpop.eup %6085  ;;  %v3844_v16 = vadd.f32 %v6062_v51, %v3843_v10  ;;  %v5434_v43 = vpack.c.bf16 %v6084_v1, %v6082_v13  ;;  %v11401_v51 = vpack.c.bf16 %v9543_v54, %v9536_v34  ;;  %v11403_v34 = vpack.c.bf16 %v9566_v48, %v9560_v19 }
 0x661   : > { %v6088_v42 = vpop.eup %6087  ;;  %v3824_v35 = vadd.f32 %v9667_v6, %v3823_v62  ;;  %v11406_v19 = vpack.c.bf16 %v9620_v53, %v9611_v4  ;;  %v11408_v4 = vpack.c.bf16 %v9652_v58, %v9645_v45  ;;  %v11414_v58 = vld [vmem:[#allocation57_spill] sm:$0xff]  ;;  %v11416_v62 = vld [vmem:[#allocation35_spill] sm:$0xff] }
 0x662   : > { %v6090_v41 = vpop.eup %6089  ;;  %v3845_v23 = vadd.f32 %v6064_v61, %v3844_v16  ;;  %v5438_v11 = vpack.c.bf16 %v6088_v42, %v6086_v20 }
 0x663   : > { %5413 = vmatpush1.bf16.msra.mxu0 %v11400_v33  ;;  %v6092_v31 = vpop.eup %6091  ;;  %v3825_v60 = vadd.f32 %v9675_v49, %v3824_v35  ;;  %v11422_v33 = vld [vmem:[#allocation69_spill] sm:$0xff]  ;;  %v4070_v35 = vpop.trf.xlu0 }
 0x664   : > { %5415 = vmatprep.subr.bf16.mxu0 %v5414_v40  ;;  %v6094_v32 = vpop.eup %6093  ;;  %v3846_v47 = vadd.f32 %v6066_v46, %v3845_v23  ;;  %v5442_v12 = vpack.c.bf16 %v6092_v31, %v6090_v41 }
 0x665   : > { %v6096_v63 = vpop.eup %6095  ;;  %v9781_v59 = vadd.f32 %v9683_v3, %v3825_v60 }
 0x666   : > { %v6098_v2 = vpop.eup %6097  ;;  %v3847_v37 = vadd.f32 %v6068_v38, %v3846_v47  ;;  %v5446_v61 = vpack.c.bf16 %v6096_v63, %v6094_v32  ;;  %v11404_v38 = vpack.c.bf16 %v9580_v18, %v9571_v57  ;;  %v11407_v18 = vpack.c.bf16 %v9635_v8, %v9628_v55 }
 0x667   : > { %5417 = vmatpush1.bf16.msra.mxu0 %v11401_v51  ;;  %v6100_v40 = vpop.eup %6099  ;;  %v11409_v55 = vpack.c.bf16 %v9667_v6, %v9660_v0  ;;  %v11418_v6 = vmov 0.0   ;;  %v11419_v0 = vld [vmem:[#allocation53_spill] sm:$0xff] }
 0x668   : > { %5419 = vmatprep.subr.bf16.mxu0 %v5418_v25  ;;  %v3848_v52 = vadd.f32 %v6070_v5, %v3847_v37  ;;  %v5450_v44 = vpack.c.bf16 %v6100_v40, %v6098_v2  ;;  %v4038_v25 = vpop.trf.xlu1 }
 0x66a   : > { %v3849_v46 = vadd.f32 %v6072_v22, %v3848_v52 }
 0x66b   : > { %5421 = vmatpush1.bf16.msra.mxu0 %v11402_v9 }
 0x66c   : > { %5423 = vmatprep.subr.bf16.mxu0 %v5422_v15  ;;  %v3850_v27 = vadd.f32 %v6074_v50, %v3849_v46  ;;  %v4039_v48 = vpop.trf.xlu1 }
 0x66e   : > { %v3851_v54 = vadd.f32 %v6076_v36, %v3850_v27 }
 0x66f   : > { %5425 = vmatpush1.bf16.msra.mxu0 %v11403_v34 }
 0x670   : > { %5427 = vmatprep.subr.bf16.mxu0 %v5426_v28  ;;  %v3852_v56 = vadd.f32 %v6078_v24, %v3851_v54  ;;  %v4040_v15 = vpop.trf.xlu1 }
 0x672   : > { %v3853_v5 = vadd.f32 %v6080_v7, %v3852_v56  ;;  %v11410_v7 = vpack.c.bf16 %v9683_v3, %v9675_v49  ;;  %v11423_v3 = vld [vmem:[#allocation38_spill] sm:$0xff] }
 0x673   : > { %5429 = vmatpush1.bf16.msra.mxu0 %v11404_v38  ;;  %v11424_v49 = vpack.c.bf16 %v11422_v33, %v11423_v3 }
 0x674   : > { %5431 = vmatprep.subr.bf16.mxu0 %v5430_v26  ;;  %v3854_v10 = vadd.f32 %v6082_v13, %v3853_v5  ;;  %v4041_v8 = vpop.trf.xlu1  ;;  %v11411_v13 = vld [vmem:[#allocation47_spill] sm:$0xff]  ;;  %v11412_v26 = vld [vmem:[#allocation32_spill] sm:$0xff] }
 0x676   : > { %v3855_v14 = vadd.f32 %v6084_v1, %v3854_v10  ;;  %v11413_v1 = vpack.c.bf16 %v11411_v13, %v11412_v26 }
 0x677   : > { %5433 = vmatpush1.bf16.msra.mxu0 %v11405_v21 }
 0x678   : > { %5435 = vmatprep.subr.bf16.mxu0 %v5434_v43  ;;  %v3856_v22 = vadd.f32 %v6086_v20, %v3855_v14  ;;  %v4042_v45 = vpop.trf.xlu1  ;;  %v11415_v20 = vld [vmem:[#allocation19_spill] sm:$0xff]  ;;  %v11420_v43 = vld [vmem:[#allocation20_spill] sm:$0xff]  ;;  %v3827_v14 = vrot.slane %v9781_v59, 4 }
 0x679   : > { %v11417_v16 = vpack.c.bf16 %v11415_v20, %v11416_v62 }
 0x67a   : > { %v3857_v50 = vadd.f32 %v6088_v42, %v3856_v22  ;;  %v11421_v42 = vpack.c.bf16 %v11419_v0, %v11420_v43 }
 0x67b   : > { %5437 = vmatpush1.bf16.msra.mxu0 %v11406_v19  ;;  %v3828_v19 = vadd.f32 %v3827_v14, %v9781_v59 }
 0x67c   : > { %5439 = vmatprep.subr.bf16.mxu0 %v5438_v11  ;;  %v3858_v57 = vadd.f32 %v6090_v41, %v3857_v50  ;;  %v4043_v41 = vpop.trf.xlu1  ;;  %v4071_v11 = vpop.trf.xlu0 }
 0x67d   : > { %v3829_v50 = vrot.slane %v3828_v19, 2 }
 0x67e   : > { %v3859_v17 = vadd.f32 %v6092_v31, %v3858_v57 }
 0x67f   : > { %5441 = vmatpush1.bf16.msra.mxu0 %v11407_v18  ;;  %v3830_v18 = vadd.f32 %v3829_v50, %v3828_v19 }
 0x680   : > { %5443 = vmatprep.subr.bf16.mxu0 %v5442_v12  ;;  %v3860_v36 = vadd.f32 %v6094_v32, %v3859_v17  ;;  %v4044_v23 = vpop.trf.xlu1  ;;  %v4072_v32 = vpop.trf.xlu0 }
 0x681   : > { %v3831_v17 = vrot.slane %v3830_v18, 1 }
 0x682   : > { %v3861_v53 = vadd.f32 %v6096_v63, %v3860_v36 }
 0x683   : > { %5445 = vmatpush1.bf16.msra.mxu0 %v11408_v4  ;;  %v3832_v36 = vadd.f32 %v3831_v17, %v3830_v18 }
 0x684   : > { %5447 = vmatprep.subr.bf16.mxu0 %v5446_v61  ;;  %v3862_v24 = vadd.f32 %v6098_v2, %v3861_v53  ;;  %v4045_v31 = vpop.trf.xlu1  ;;  %v4073_v47 = vpop.trf.xlu0 }
 0x685   : > { %6101 = vrcp.f32 %v3832_v36 }
 0x686   : > { %v9810_v28 = vadd.f32 %v6100_v40, %v3862_v24 }
 0x687   : > { %5449 = vmatpush1.bf16.msra.mxu0 %v11409_v55 }
 0x688   : > { %5451 = vmatprep.subr.bf16.mxu0 %v5450_v44  ;;  %v4046_v60 = vpop.trf.xlu1  ;;  %v4074_v63 = vpop.trf.xlu0  ;;  %v3864_v22 = vrot.slane %v9810_v28, 4 }
 0x68b   : > { %5453 = vmatpush1.bf16.msra.mxu0 %v11410_v7 }
 0x68c   : > { %5455 = vmatprep.subr.bf16.mxu0 %v11413_v1  ;;  %v4047_v12 = vpop.trf.xlu1  ;;  %v4075_v2 = vpop.trf.xlu0 }
 0x68e   : > { %4010 = vmatmul.mubr.f32.vlgmr.msra.gmra.mrb[104].mxu0 %v11414_v58 }
 0x68f   : > { %5457 = vmatpush1.bf16.msra.mxu0 %v11417_v16  ;;  %4246 = vmatprep.mubr.f32.mxu0 %v11418_v6  ;;  %v6102_v53 = vpop.eup %6101 }
 0x690   : > { %5459 = vmatprep.subr.bf16.mxu0 %v11421_v42  ;;  %v4048_v51 = vpop.trf.xlu1  ;;  %v4076_v61 = vpop.trf.xlu0 }
 0x693   : > { %5461 = vmatpush1.bf16.msra.mxu0 %v11424_v49 }
 0x694   : > { %v4049_v37 = vpop.trf.xlu1  ;;  %v4077_v52 = vpop.trf.xlu0 }
 0x696   : > { %5174 = vmatmul.mubr.msk.f32.vlgmr.msra.gmra.mrb[106].mxu0 %vm1359_vm7, %v4038_v25 }
 0x697   : > { %4252 = vmatprep.mubr.f32.mxu0 %v11418_v6 }
 0x698   : > { %v4050_v40 = vpop.trf.xlu1  ;;  %v4078_v9 = vpop.trf.xlu0 }
 0x69a   : > { %5175 = vmatmul.mubr.msk.f32.gmra.mrb[108].mxu0 %vm1359_vm7, %v4039_v48  ;;  %v3865_v48 = vadd.f32 %v3864_v22, %v9810_v28 }
 0x69b   : > { %4258 = vmatprep.mubr.f32.mxu0 %v11418_v6 }
 0x69c   : > { %v4051_v44 = vpop.trf.xlu1  ;;  %v4079_v27 = vpop.trf.xlu0  ;;  %v3866_v57 = vrot.slane %v3865_v48, 2 }
 0x69e   : > { %5176 = vmatmul.mubr.msk.f32.gmra.mrb[110].mxu0 %vm1359_vm7, %v4040_v15  ;;  %v3867_v29 = vadd.f32 %v3866_v57, %v3865_v48 }
 0x69f   : > { %4264 = vmatprep.mubr.f32.mxu0 %v11418_v6 }
 0x6a0   : > { %v4052_v46 = vpop.trf.xlu1  ;;  %v4080_v54 = vpop.trf.xlu0  ;;  %v3868_v15 = vrot.slane %v3867_v29, 1 }
 0x6a2   : > { %5177 = vmatmul.mubr.msk.f32.gmra.mrb[112].mxu0 %vm1359_vm7, %v4041_v8  ;;  %v3869_v4 = vadd.f32 %v3868_v15, %v3867_v29 }
 0x6a3   : > { %4270 = vmatprep.mubr.f32.mxu0 %v11418_v6 }
 0x6a4   : > { %v4053_v34 = vpop.trf.xlu1  ;;  %v4081_v56 = vpop.trf.xlu0  ;;  %6103 = vrcp.f32 %v3869_v4 }
 0x6a6   : > { %5178 = vmatmul.mubr.msk.f32.gmra.mrb[114].mxu0 %vm1359_vm7, %v4042_v45 }
 0x6a7   : > { %4276 = vmatprep.mubr.f32.mxu0 %v11418_v6 }
 0x6a8   : > { %v4082_v38 = vpop.trf.xlu0 }
 0x6aa   : > { %5179 = vmatmul.mubr.msk.f32.gmra.mrb[116].mxu0 %vm1359_vm7, %v4043_v41 }
 0x6ab   : > { %4282 = vmatprep.mubr.f32.mxu0 %v11418_v6 }
 0x6ac   : > { %v4083_v5 = vpop.trf.xlu0 }
 0x6ae   : > { %5180 = vmatmul.mubr.msk.f32.gmra.mrb[118].mxu0 %vm1359_vm7, %v4044_v23  ;;  %v6104_v55 = vpop.eup %6103 }
 0x6af   : > { %4288 = vmatprep.mubr.f32.mxu0 %v11418_v6 }
 0x6b0   : > { %v4084_v25 = vpop.trf.xlu0 }
 0x6b2   : > { %5181 = vmatmul.mubr.msk.f32.gmra.mrb[120].mxu0 %vm1359_vm7, %v4045_v31 }
 0x6b3   : > { %4294 = vmatprep.mubr.f32.mxu0 %v11418_v6 }
 0x6b4   : > { %v4085_v10 = vpop.trf.xlu0 }
 0x6b6   : > { %5182 = vmatmul.mubr.msk.f32.gmra.mrb[122].mxu0 %vm1359_vm7, %v4046_v60 }
 0x6b7   : > { %4300 = vmatprep.mubr.f32.mxu0 %v11418_v6 }
 0x6ba   : > { %5183 = vmatmul.mubr.msk.f32.gmra.mrb[124].mxu0 %vm1359_vm7, %v4047_v12 }
 0x6bb   : > { %4306 = vmatprep.mubr.f32.mxu0 %v11418_v6 }
 0x6be   : > { %5184 = vmatmul.mubr.msk.f32.gmra.mrb[126].mxu0 %vm1359_vm7, %v4048_v51 }
 0x6bf   : > { %4312 = vmatprep.mubr.f32.mxu0 %v11418_v6 }
 0x6c2   : > { %5185 = vmatmul.mubr.msk.f32.gmra.mrb[128].mxu0 %vm1359_vm7, %v4049_v37 }
 0x6c3   : > { %4318 = vmatprep.mubr.f32.mxu0 %v11418_v6 }
 0x6c6   : > { %5186 = vmatmul.mubr.msk.f32.gmra.mrb[130].mxu0 %vm1359_vm7, %v4050_v40 }
 0x6c7   : > { %4324 = vmatprep.mubr.f32.mxu0 %v11418_v6 }
 0x6ca   : > { %5187 = vmatmul.mubr.msk.f32.gmra.mrb[132].mxu0 %vm1359_vm7, %v4051_v44 }
 0x6cb   : > { %4330 = vmatprep.mubr.f32.mxu0 %v11418_v6 }
 0x6ce   : > { %5188 = vmatmul.mubr.msk.f32.gmra.mrb[134].mxu0 %vm1359_vm7, %v4052_v46 }
 0x6cf   : > { %4336 = vmatprep.mubr.f32.mxu0 %v11418_v6 }
 0x6d1   : > { %v4780_v21 = vpop.permute.xlu0 %4779 }
 0x6d2   : > { %5189 = vmatmul.mubr.msk.f32.gmra.mrb[136].mxu0 %vm1359_vm7, %v4053_v34  ;;  %5206 = vmatmul.mubr.msk.f32.vlgmr.msra.gmra.mrb[194].mxu1 %vm1359_vm7, %v4780_v21 }
 0x6d3   : > { %4342 = vmatprep.mubr.f32.mxu0 %v11418_v6 }
 0x6d6   : > { %5190 = vmatmul.mubr.msk.f32.gmra.mrb[138].mxu0 %vm1359_vm7, %v4070_v35 }
 0x6d7   : > { %4348 = vmatprep.mubr.f32.mxu0 %v11418_v6 }
 0x6da   : > { %5191 = vmatmul.mubr.msk.f32.gmra.mrb[140].mxu0 %vm1359_vm7, %v4071_v11 }
 0x6db   : > { %4354 = vmatprep.mubr.f32.mxu0 %v11418_v6 }
 0x6de   : > { %5192 = vmatmul.mubr.msk.f32.gmra.mrb[142].mxu0 %vm1359_vm7, %v4072_v32 }
 0x6df   : > { %4360 = vmatprep.mubr.f32.mxu0 %v11418_v6 }
 0x6e2   : > { %5193 = vmatmul.mubr.msk.f32.gmra.mrb[144].mxu0 %vm1359_vm7, %v4073_v47 }
 0x6e3   : > { %4366 = vmatprep.mubr.f32.mxu0 %v11418_v6 }
 0x6e6   : > { %5194 = vmatmul.mubr.msk.f32.gmra.mrb[146].mxu0 %vm1359_vm7, %v4074_v63 }
 0x6e7   : > { %4372 = vmatprep.mubr.f32.mxu0 %v11418_v6 }
 0x6ea   : > { %5195 = vmatmul.mubr.msk.f32.gmra.mrb[148].mxu0 %vm1359_vm7, %v4075_v2 }
 0x6eb   : > { %4378 = vmatprep.mubr.f32.mxu0 %v11418_v6 }
 0x6ee   : > { %5196 = vmatmul.mubr.msk.f32.gmra.mrb[150].mxu0 %vm1359_vm7, %v4076_v61 }
 0x6ef   : > { %4384 = vmatprep.mubr.f32.mxu0 %v11418_v6 }
 0x6f2   : > { %5197 = vmatmul.mubr.msk.f32.gmra.mrb[152].mxu0 %vm1359_vm7, %v4077_v52 }
 0x6f3   : > { %4390 = vmatprep.mubr.f32.mxu0 %v11418_v6 }
 0x6f6   : > { %5198 = vmatmul.mubr.msk.f32.gmra.mrb[154].mxu0 %vm1359_vm7, %v4078_v9 }
 0x6f7   : > { %4396 = vmatprep.mubr.f32.mxu0 %v11418_v6 }
 0x6fa   : > { %5199 = vmatmul.mubr.msk.f32.gmra.mrb[156].mxu0 %vm1359_vm7, %v4079_v27 }
 0x6fb   : > { %4402 = vmatprep.mubr.f32.mxu0 %v11418_v6 }
 0x6fe   : > { %5200 = vmatmul.mubr.msk.f32.gmra.mrb[158].mxu0 %vm1359_vm7, %v4080_v54 }
 0x6ff   : > { %4408 = vmatprep.mubr.f32.mxu0 %v11418_v6 }
 0x702   : > { %5201 = vmatmul.mubr.msk.f32.gmra.mrb[160].mxu0 %vm1359_vm7, %v4081_v56 }
 0x703   : > { %4414 = vmatprep.mubr.f32.mxu0 %v11418_v6 }
 0x706   : > { %5202 = vmatmul.mubr.msk.f32.gmra.mrb[162].mxu0 %vm1359_vm7, %v4082_v38 }
 0x707   : > { %4420 = vmatprep.mubr.f32.mxu0 %v11418_v6 }
 0x70a   : > { %5203 = vmatmul.mubr.msk.f32.gmra.mrb[164].mxu0 %vm1359_vm7, %v4083_v5 }
 0x70b   : > { %4426 = vmatprep.mubr.f32.mxu0 %v11418_v6 }
 0x70e   : > { %5204 = vmatmul.mubr.msk.f32.gmra.mrb[166].mxu0 %vm1359_vm7, %v4084_v25 }
 0x70f   : > { %4432 = vmatprep.mubr.f32.mxu0 %v11418_v6 }
 0x712   : > { %5205 = vmatmul.mubr.msk.f32.gmra.mrb[168].mxu0 %vm1359_vm7, %v4085_v10 }
 0x761   : > { %v4011_v24 = vpop.f32.mrb[104].mxu0 }
 0x762   : > { %v4017_v8 = vmul.f32 %v6102_v53, %v4011_v24  ;;  %v4013_v7 = vpop.f32.mrb[105].mxu0 }
 0x763   : > { %v4019_v13 = vmul.f32 %v6104_v55, %v4013_v7 }
 0x764   : > { %v9898_v59 = vadd.f32 %v4017_v8, %v9638_v39 }
 0x765   : > { %v9901_v28 = vadd.f32 %v4019_v13, %v9641_v30 }
 0x766   : > { %11425 = vst [vmem:[#allocation66_spill] sm:$0xff] %v9898_v59 }
 0x767   : > { %11426 = vst [vmem:[#allocation14_spill] sm:$0xff] %v9901_v28 }
 0x769   : > { %v9903_v26 = vpop.f32.mrb[106].mxu0 }
 0x76a   : > { %v9905_v1 = vpop.f32.mrb[107].mxu0 }
 0x76d   : > { %v9907_v45 = vpop.f32.mrb[108].mxu0 }
 0x76e   : > { %v9909_v58 = vpop.f32.mrb[109].mxu0 }
 0x771   : > { %v9911_v20 = vpop.f32.mrb[110].mxu0 }
 0x772   : > { %v4439_v62 = vmax.f32 %v9903_v26, %v9911_v20  ;;  %v9915_v16 = vpop.f32.mrb[111].mxu0 }
 0x773   : > { %v4476_v39 = vmax.f32 %v9905_v1, %v9915_v16 }
 0x775   : > { %v9919_v30 = vpop.f32.mrb[112].mxu0 }
 0x776   : > { %v4440_v6 = vmax.f32 %v9907_v45, %v9919_v30  ;;  %v9923_v0 = vpop.f32.mrb[113].mxu0 }
 0x777   : > { %v4477_v43 = vmax.f32 %v9909_v58, %v9923_v0 }
 0x779   : > { %v9927_v42 = vpop.f32.mrb[114].mxu0 }
 0x77a   : > { %v4441_v33 = vmax.f32 %v4439_v62, %v9927_v42  ;;  %v9930_v3 = vpop.f32.mrb[115].mxu0 }
 0x77b   : > { %v4478_v49 = vmax.f32 %v4476_v39, %v9930_v3 }
 0x77d   : > { %v9933_v41 = vpop.f32.mrb[116].mxu0 }
 0x77e   : > { %v4442_v35 = vmax.f32 %v4440_v6, %v9933_v41  ;;  %v9936_v23 = vpop.f32.mrb[117].mxu0 }
 0x77f   : > { %v4479_v11 = vmax.f32 %v4477_v43, %v9936_v23 }
 0x781   : > { %v9939_v31 = vpop.f32.mrb[118].mxu0 }
 0x782   : > { %v4443_v32 = vmax.f32 %v4441_v33, %v9939_v31  ;;  %v9942_v60 = vpop.f32.mrb[119].mxu0 }
 0x783   : > { %v4480_v47 = vmax.f32 %v4478_v49, %v9942_v60 }
 0x785   : > { %v9945_v12 = vpop.f32.mrb[120].mxu0 }
 0x786   : > { %v4444_v63 = vmax.f32 %v4442_v35, %v9945_v12  ;;  %v9948_v51 = vpop.f32.mrb[121].mxu0 }
 0x787   : > { %v4481_v2 = vmax.f32 %v4479_v11, %v9948_v51 }
 0x789   : > { %v9951_v37 = vpop.f32.mrb[122].mxu0 }
 0x78a   : > { %v4445_v61 = vmax.f32 %v4443_v32, %v9951_v37  ;;  %v9954_v40 = vpop.f32.mrb[123].mxu0 }
 0x78b   : > { %v4482_v52 = vmax.f32 %v4480_v47, %v9954_v40 }
 0x78d   : > { %v9957_v44 = vpop.f32.mrb[124].mxu0 }
 0x78e   : > { %v4446_v9 = vmax.f32 %v4444_v63, %v9957_v44  ;;  %v9960_v46 = vpop.f32.mrb[125].mxu0 }
 0x78f   : > { %v4483_v27 = vmax.f32 %v4481_v2, %v9960_v46 }
 0x791   : > { %v9963_v34 = vpop.f32.mrb[126].mxu0 }
 0x792   : > { %v4447_v54 = vmax.f32 %v4445_v61, %v9963_v34  ;;  %v9966_v56 = vpop.f32.mrb[127].mxu0 }
 0x793   : > { %v4484_v38 = vmax.f32 %v4482_v52, %v9966_v56 }
 0x795   : > { %v9969_v5 = vpop.f32.mrb[128].mxu0 }
 0x796   : > { %v4448_v25 = vmax.f32 %v4446_v9, %v9969_v5  ;;  %v9972_v10 = vpop.f32.mrb[129].mxu0 }
 0x797   : > { %v4485_v21 = vmax.f32 %v4483_v27, %v9972_v10 }
 0x799   : > { %v9975_v14 = vpop.f32.mrb[130].mxu0 }
 0x79a   : > { %v4449_v22 = vmax.f32 %v4447_v54, %v9975_v14  ;;  %v9978_v19 = vpop.f32.mrb[131].mxu0 }
 0x79b   : > { %v4486_v48 = vmax.f32 %v4484_v38, %v9978_v19 }
 0x79d   : > { %v9981_v50 = vpop.f32.mrb[132].mxu0 }
 0x79e   : > { %v4450_v57 = vmax.f32 %v4448_v25, %v9981_v50  ;;  %v9984_v18 = vpop.f32.mrb[133].mxu0 }
 0x79f   : > { %v4487_v29 = vmax.f32 %v4485_v21, %v9984_v18 }
 0x7a1   : > { %v9987_v17 = vpop.f32.mrb[134].mxu0 }
 0x7a2   : > { %v4451_v15 = vmax.f32 %v4449_v22, %v9987_v17  ;;  %v9990_v36 = vpop.f32.mrb[135].mxu0 }
 0x7a3   : > { %11427 = vst [vmem:[#allocation13_spill] sm:$0xff] %v9990_v36  ;;  %v4488_v4 = vmax.f32 %v4486_v48, %v9990_v36 }
 0x7a5   : > { %v9993_v53 = vpop.f32.mrb[136].mxu0 }
 0x7a6   : > { %v4452_v24 = vmax.f32 %v4450_v57, %v9993_v53  ;;  %v9996_v55 = vpop.f32.mrb[137].mxu0 }
 0x7a7   : > { %11428 = vst [vmem:[#allocation15_spill] sm:$0xff] %v9996_v55  ;;  %v4489_v8 = vmax.f32 %v4487_v29, %v9996_v55 }
 0x7a9   : > { %v9999_v7 = vpop.f32.mrb[138].mxu0 }
 0x7aa   : > { %v4453_v13 = vmax.f32 %v4451_v15, %v9999_v7  ;;  %v10002_v62 = vpop.f32.mrb[139].mxu0 }
 0x7ab   : > { %11429 = vst [vmem:[#allocation22_spill] sm:$0xff] %v10002_v62  ;;  %v4490_v39 = vmax.f32 %v4488_v4, %v10002_v62  ;;  %v10095_v62 = vpop.f32.mrb[194].mxu1 }
 0x7ac   : > { %11445 = vst [vmem:[#allocation37_spill] sm:$0xff] %v10095_v62  ;;  %v4851_v55 = vpop.f32.mrb[195].mxu1 }
 0x7ad   : > { %v10005_v6 = vpop.f32.mrb[140].mxu0  ;;  %4918 = vmatprep.mubr.f32.mxu1 %v4851_v55 }
 0x7ae   : > { %v4454_v43 = vmax.f32 %v4452_v24, %v10005_v6  ;;  %v10008_v33 = vpop.f32.mrb[141].mxu0 }
 0x7af   : > { %11430 = vst [vmem:[#allocation18_spill] sm:$0xff] %v10008_v33  ;;  %v4491_v49 = vmax.f32 %v4489_v8, %v10008_v33 }
 0x7b1   : > { %v10011_v35 = vpop.f32.mrb[142].mxu0 }
 0x7b2   : > { %v4455_v11 = vmax.f32 %v4453_v13, %v10011_v35  ;;  %v10014_v32 = vpop.f32.mrb[143].mxu0 }
 0x7b3   : > { %11431 = vst [vmem:[#allocation39_spill] sm:$0xff] %v10014_v32  ;;  %v4492_v47 = vmax.f32 %v4490_v39, %v10014_v32 }
 0x7b5   : > { %v10017_v63 = vpop.f32.mrb[144].mxu0 }
 0x7b6   : > { %v4456_v2 = vmax.f32 %v4454_v43, %v10017_v63  ;;  %v10020_v61 = vpop.f32.mrb[145].mxu0 }
 0x7b7   : > { %11432 = vst [vmem:[#allocation72_spill] sm:$0xff] %v10020_v61  ;;  %v4493_v52 = vmax.f32 %v4491_v49, %v10020_v61 }
 0x7b9   : > { %v10023_v9 = vpop.f32.mrb[146].mxu0 }
 0x7ba   : > { %v4457_v27 = vmax.f32 %v4455_v11, %v10023_v9  ;;  %v10026_v54 = vpop.f32.mrb[147].mxu0 }
 0x7bb   : > { %11433 = vst [vmem:[#allocation51_spill] sm:$0xff] %v10026_v54  ;;  %v4494_v38 = vmax.f32 %v4492_v47, %v10026_v54 }
 0x7bd   : > { %v10029_v25 = vpop.f32.mrb[148].mxu0 }
 0x7be   : > { %v4458_v21 = vmax.f32 %v4456_v2, %v10029_v25  ;;  %v10032_v22 = vpop.f32.mrb[149].mxu0 }
 0x7bf   : > { %11434 = vst [vmem:[#allocation40_spill] sm:$0xff] %v10032_v22  ;;  %v4495_v48 = vmax.f32 %v4493_v52, %v10032_v22 }
 0x7c1   : > { %v10035_v57 = vpop.f32.mrb[150].mxu0 }
 0x7c2   : > { %v4459_v29 = vmax.f32 %v4457_v27, %v10035_v57  ;;  %v10038_v15 = vpop.f32.mrb[151].mxu0 }
 0x7c3   : > { %11435 = vst [vmem:[#allocation41_spill] sm:$0xff] %v10038_v15  ;;  %v4496_v4 = vmax.f32 %v4494_v38, %v10038_v15 }
 0x7c5   : > { %v10041_v24 = vpop.f32.mrb[152].mxu0 }
 0x7c6   : > { %v4460_v8 = vmax.f32 %v4458_v21, %v10041_v24  ;;  %v10044_v13 = vpop.f32.mrb[153].mxu0 }
 0x7c7   : > { %11436 = vst [vmem:[#allocation65_spill] sm:$0xff] %v10044_v13  ;;  %v4497_v39 = vmax.f32 %v4495_v48, %v10044_v13 }
 0x7c9   : > { %v10047_v43 = vpop.f32.mrb[154].mxu0 }
 0x7ca   : > { %v4461_v49 = vmax.f32 %v4459_v29, %v10047_v43  ;;  %v10050_v11 = vpop.f32.mrb[155].mxu0 }
 0x7cb   : > { %11437 = vst [vmem:[#allocation58_spill] sm:$0xff] %v10050_v11  ;;  %v4498_v47 = vmax.f32 %v4496_v4, %v10050_v11 }
 0x7cd   : > { %v10053_v2 = vpop.f32.mrb[156].mxu0 }
 0x7ce   : > { %v4462_v52 = vmax.f32 %v4460_v8, %v10053_v2  ;;  %v10056_v27 = vpop.f32.mrb[157].mxu0 }
 0x7cf   : > { %11438 = vst [vmem:[#allocation25_spill] sm:$0xff] %v10056_v27  ;;  %v4499_v38 = vmax.f32 %v4497_v39, %v10056_v27 }
 0x7d1   : > { %v10059_v21 = vpop.f32.mrb[158].mxu0 }
 0x7d2   : > { %v4463_v48 = vmax.f32 %v4461_v49, %v10059_v21  ;;  %v10062_v28 = vpop.f32.mrb[159].mxu0 }
 0x7d3   : > { %11439 = vst [vmem:[#allocation75_spill] sm:$0xff] %v10062_v28  ;;  %v4500_v29 = vmax.f32 %v4498_v47, %v10062_v28 }
 0x7d5   : > { %v10065_v59 = vpop.f32.mrb[160].mxu0 }
 0x7d6   : > { %v4464_v4 = vmax.f32 %v4462_v52, %v10065_v59  ;;  %v10068_v11 = vpop.f32.mrb[161].mxu0 }
 0x7d7   : > { %11440 = vst [vmem:[#allocation61_spill] sm:$0xff] %v10068_v11  ;;  %v4501_v8 = vmax.f32 %v4499_v38, %v10068_v11 }
 0x7d9   : > { %v10071_v13 = vpop.f32.mrb[162].mxu0 }
 0x7da   : > { %v4465_v39 = vmax.f32 %v4463_v48, %v10071_v13  ;;  %v10074_v27 = vpop.f32.mrb[163].mxu0 }
 0x7db   : > { %11441 = vst [vmem:[#allocation28_spill] sm:$0xff] %v10074_v27  ;;  %v4502_v49 = vmax.f32 %v4500_v29, %v10074_v27 }
 0x7dd   : > { %v10077_v15 = vpop.f32.mrb[164].mxu0 }
 0x7de   : > { %v4466_v47 = vmax.f32 %v4464_v4, %v10077_v15  ;;  %v10080_v28 = vpop.f32.mrb[165].mxu0 }
 0x7df   : > { %11442 = vst [vmem:[#allocation23_spill] sm:$0xff] %v10080_v28  ;;  %v4503_v52 = vmax.f32 %v4501_v8, %v10080_v28 }
 0x7e1   : > { %v10083_v22 = vpop.f32.mrb[166].mxu0 }
 0x7e2   : > { %v4467_v38 = vmax.f32 %v4465_v39, %v10083_v22  ;;  %v10086_v11 = vpop.f32.mrb[167].mxu0 }
 0x7e3   : > { %11443 = vst [vmem:[#allocation27_spill] sm:$0xff] %v10086_v11  ;;  %v4504_v48 = vmax.f32 %v4502_v49, %v10086_v11  ;;  %v4931_v49 = vld [vmem:[%s10590_s3] sm:$0xf]  ;;  %v6307_v11 = vmov 0  }
 0x7e4   : > { %5578 = vset.pattern.permute.xlu1 %v6307_v11  ;;  %5579 = vset.pattern.permute.xlu0 %v6307_v11 }
 0x7e5   : > { %v10089_v54 = vpop.f32.mrb[168].mxu0  ;;  %4934 = vperm.xlu1 %5578, %v4931_v49  }
 0x7e6   : > { %v4468_v29 = vmax.f32 %v4466_v47, %v10089_v54  ;;  %v10092_v27 = vpop.f32.mrb[169].mxu0 }
 0x7e7   : > { %11444 = vst [vmem:[#allocation17_spill] sm:$0xff] %v10092_v27  ;;  %v4505_v4 = vmax.f32 %v4503_v52, %v10092_v27 }
 0x7e8   : > { %v4469_v61 = vmax.f32 %v4467_v38, %v4468_v29 }
 0x7e9   : > { %v4506_v32 = vmax.f32 %v4504_v48, %v4505_v4 }
 0x7ea   : > { %v4470_v33 = vrot.slane %v4469_v61, 4  ;;  %v11462_v62 = vld [vmem:[#allocation27_spill] sm:$0xff] }
 0x7eb   : > { %v4507_v8 = vrot.slane %v4506_v32, 4 }
 0x7ec   : > { %v4471_v28 = vmax.f32 %v4469_v61, %v4470_v33 }
 0x7ed   : > { %v4508_v39 = vmax.f32 %v4506_v32, %v4507_v8 }
 0x7ee   : > { %v4472_v36 = vrot.slane %v4471_v28, 2 }
 0x7ef   : > { %v4509_v47 = vrot.slane %v4508_v39, 2 }
 0x7f0   : > { %v4473_v52 = vmax.f32 %v4471_v28, %v4472_v36 }
 0x7f1   : > { %v4510_v38 = vmax.f32 %v4508_v39, %v4509_v47 }
 0x7f2   : > { %v4474_v48 = vrot.slane %v4473_v52, 1 }
 0x7f3   : > { %v4511_v29 = vrot.slane %v4510_v38, 1 }
 0x7f4   : > { %v10100_v33 = vmax.f32 %v4473_v52, %v4474_v48 }
 0x7f5   : > { %v10102_v61 = vmax.f32 %v4510_v38, %v4511_v29 }
 0x7f6   : > { %v4513_v55 = vsub.f32 %v9903_v26, %v10100_v33  ;;  %v4515_v32 = vsub.f32 %v9907_v45, %v10100_v33  ;;  %v4517_v4 = vsub.f32 %v9911_v20, %v10100_v33  ;;  %v4519_v28 = vsub.f32 %v9919_v30, %v10100_v33 }
 0x7f7   : > { %v4521_v36 = vsub.f32 %v9927_v42, %v10100_v33  ;;  %v4523_v11 = vsub.f32 %v9933_v41, %v10100_v33  ;;  %v4525_v8 = vsub.f32 %v9939_v31, %v10100_v33  ;;  %v4527_v26 = vsub.f32 %v9945_v12, %v10100_v33 }
 0x7f8   : > { %v4529_v45 = vsub.f32 %v9951_v37, %v10100_v33  ;;  %v4531_v20 = vsub.f32 %v9957_v44, %v10100_v33  ;;  %v4533_v30 = vsub.f32 %v9963_v34, %v10100_v33  ;;  %v4535_v42 = vsub.f32 %v9969_v5, %v10100_v33 }
 0x7f9   : > { %v4537_v41 = vsub.f32 %v9975_v14, %v10100_v33  ;;  %v4539_v31 = vsub.f32 %v9981_v50, %v10100_v33  ;;  %v4541_v12 = vsub.f32 %v9987_v17, %v10100_v33  ;;  %v4543_v37 = vsub.f32 %v9993_v53, %v10100_v33 }
 0x7fa   : > { %v4545_v44 = vsub.f32 %v9999_v7, %v10100_v33  ;;  %v4547_v34 = vsub.f32 %v10005_v6, %v10100_v33  ;;  %v4549_v5 = vsub.f32 %v10011_v35, %v10100_v33  ;;  %v4551_v14 = vsub.f32 %v10017_v63, %v10100_v33 }
 0x7fb   : > { %v4553_v50 = vsub.f32 %v10023_v9, %v10100_v33  ;;  %v4555_v17 = vsub.f32 %v10029_v25, %v10100_v33  ;;  %v4557_v53 = vsub.f32 %v10035_v57, %v10100_v33  ;;  %v4559_v7 = vsub.f32 %v10041_v24, %v10100_v33 }
 0x7fc   : > { %v4577_v49 = vmul.f32 1.442695, %v4513_v55  ;;  %v4581_v47 = vmul.f32 1.442695, %v4515_v32  ;;  %v4585_v52 = vmul.f32 1.442695, %v4517_v4 }
 0x7fd   : > { %v4589_v48 = vmul.f32 1.442695, %v4519_v28  ;;  %v4593_v25 = vmul.f32 1.442695, %v4521_v36  ;;  %v4597_v57 = vmul.f32 1.442695, %v4523_v11 }
 0x7fe   : > { %6105 = vpow2.f32 %v4577_v49  ;;  %v4601_v9 = vmul.f32 1.442695, %v4525_v8  ;;  %v4605_v24 = vmul.f32 1.442695, %v4527_v26  ;;  %v4609_v63 = vmul.f32 1.442695, %v4529_v45 }
 0x7ff   : > { %6107 = vpow2.f32 %v4581_v47  ;;  %v4613_v39 = vmul.f32 1.442695, %v4531_v20  ;;  %v4617_v55 = vmul.f32 1.442695, %v4533_v30  ;;  %v4621_v32 = vmul.f32 1.442695, %v4535_v42 }
 0x800   : > { %6109 = vpow2.f32 %v4585_v52  ;;  %v4625_v4 = vmul.f32 1.442695, %v4537_v41  ;;  %v4629_v38 = vmul.f32 1.442695, %v4539_v31  ;;  %v4633_v28 = vmul.f32 1.442695, %v4541_v12 }
 0x801   : > { %6111 = vpow2.f32 %v4589_v48  ;;  %v4637_v35 = vmul.f32 1.442695, %v4543_v37  ;;  %v4641_v29 = vmul.f32 1.442695, %v4545_v44  ;;  %v4645_v49 = vmul.f32 1.442695, %v4547_v34 }
 0x802   : > { %6113 = vpow2.f32 %v4593_v25  ;;  %v4649_v36 = vmul.f32 1.442695, %v4549_v5  ;;  %v4653_v11 = vmul.f32 1.442695, %v4551_v14  ;;  %v4657_v47 = vmul.f32 1.442695, %v4553_v50 }
 0x803   : > { %6115 = vpow2.f32 %v4597_v57  ;;  %v10172_v8 = vmul.f32 1.442695, %v4555_v17  ;;  %v10174_v26 = vmul.f32 1.442695, %v4557_v53  ;;  %v10176_v45 = vmul.f32 1.442695, %v4559_v7 }
 0x804   : > { %6117 = vpow2.f32 %v4601_v9  ;;  %v11446_v25 = vld [vmem:[#allocation13_spill] sm:$0xff]  ;;  %v11448_v52 = vld [vmem:[#allocation22_spill] sm:$0xff]  ;;  %v11450_v7 = vld [vmem:[#allocation39_spill] sm:$0xff] }
 0x805   : > { %6119 = vpow2.f32 %v4605_v24  ;;  %v11447_v24 = vld [vmem:[#allocation15_spill] sm:$0xff]  ;;  %v11451_v57 = vld [vmem:[#allocation72_spill] sm:$0xff]  ;;  %v11455_v37 = vld [vmem:[#allocation65_spill] sm:$0xff] }
 0x806   : > { %6121 = vpow2.f32 %v4609_v63  ;;  %v11452_v14 = vld [vmem:[#allocation51_spill] sm:$0xff]  ;;  %v11453_v5 = vld [vmem:[#allocation40_spill] sm:$0xff]  ;;  %v11454_v63 = vld [vmem:[#allocation41_spill] sm:$0xff] }
 0x807   : > { %6123 = vpow2.f32 %v4613_v39  ;;  %v11456_v39 = vld [vmem:[#allocation58_spill] sm:$0xff]  ;;  %v11457_v41 = vld [vmem:[#allocation25_spill] sm:$0xff]  ;;  %v11461_v48 = vld [vmem:[#allocation23_spill] sm:$0xff] }
 0x808   : > { %v10186_v31 = vpop.eup %6105  ;;  %6125 = vpow2.f32 %v4617_v55 }
 0x809   : > { %v10194_v34 = vpop.eup %6107  ;;  %6127 = vpow2.f32 %v4621_v32 }
 0x80a   : > { %v10202_v17 = vpop.eup %6109  ;;  %6129 = vpow2.f32 %v4625_v4  ;;  %v4705_v53 = vadd.f32 %v10194_v34, %v10186_v31  ;;  %v11449_v4 = vld [vmem:[#allocation18_spill] sm:$0xff] }
 0x80b   : > { %v10210_v9 = vpop.eup %6111  ;;  %6131 = vpow2.f32 %v4629_v38  ;;  %v11459_v38 = vld [vmem:[#allocation61_spill] sm:$0xff] }
 0x80c   : > { %v10218_v55 = vpop.eup %6113  ;;  %6133 = vpow2.f32 %v4633_v28  ;;  %v4706_v32 = vadd.f32 %v10202_v17, %v4705_v53 }
 0x80d   : > { %v10225_v50 = vpop.eup %6115  ;;  %6135 = vpow2.f32 %v4637_v35 }
 0x80e   : > { %v10233_v44 = vpop.eup %6117  ;;  %6137 = vpow2.f32 %v4641_v29  ;;  %v4707_v53 = vadd.f32 %v10210_v9, %v4706_v32 }
 0x80f   : > { %v10240_v12 = vpop.eup %6119  ;;  %6139 = vpow2.f32 %v4645_v49 }
 0x810   : > { %v10248_v30 = vpop.eup %6121  ;;  %6141 = vpow2.f32 %v4649_v36  ;;  %v4708_v32 = vadd.f32 %v10218_v55, %v4707_v53  ;;  %v11463_v53 = vsub.f32 %v10047_v43, %v10100_v33 }
 0x811   : > { %v10255_v6 = vpop.eup %6123  ;;  %6143 = vpow2.f32 %v4653_v11  ;;  %v11464_v11 = vsub.f32 %v10053_v2, %v10100_v33 }
 0x812   : > { %v10263_v42 = vpop.eup %6125  ;;  %6145 = vpow2.f32 %v4657_v47  ;;  %v4673_v35 = vmul.f32 1.442695, %v11463_v53  ;;  %v4709_v49 = vadd.f32 %v10225_v50, %v4708_v32  ;;  %v11465_v47 = vsub.f32 %v10059_v21, %v10100_v33 }
 0x813   : > { %v10269_v20 = vpop.eup %6127  ;;  %6147 = vpow2.f32 %v10172_v8  ;;  %v4677_v29 = vmul.f32 1.442695, %v11464_v11  ;;  %v11466_v8 = vsub.f32 %v10065_v59, %v10100_v33  ;;  %v11470_v59 = vsub.f32 %v10083_v22, %v10100_v33 }
 0x814   : > { %v10275_v28 = vpop.eup %6129  ;;  %6149 = vpow2.f32 %v10174_v26  ;;  %v4681_v36 = vmul.f32 1.442695, %v11465_v47  ;;  %v4710_v43 = vadd.f32 %v10233_v44, %v4709_v49  ;;  %v11467_v26 = vsub.f32 %v10071_v13, %v10100_v33 }
 0x815   : > { %v10282_v53 = vpop.eup %6131  ;;  %6151 = vpow2.f32 %v10176_v45  ;;  %v4685_v32 = vmul.f32 1.442695, %v11466_v8  ;;  %v11468_v49 = vsub.f32 %v10077_v15, %v10100_v33 }
 0x816   : > { %v10288_v2 = vpop.eup %6133  ;;  %6153 = vpow2.f32 %v4673_v35  ;;  %v4689_v11 = vmul.f32 1.442695, %v11467_v26  ;;  %v4711_v21 = vadd.f32 %v10240_v12, %v4710_v43  ;;  %v4697_v35 = vmul.f32 1.442695, %v11470_v59 }
 0x817   : > { %v10294_v47 = vpop.eup %6135  ;;  %6155 = vpow2.f32 %v4677_v29  ;;  %v4693_v45 = vmul.f32 1.442695, %v11468_v49  ;;  %v11471_v43 = vsub.f32 %v10089_v54, %v10100_v33  ;;  %v11474_v54 = vsub.f32 %v9915_v16, %v10102_v61 }
 0x818   : > { %v10299_v27 = vpop.eup %6137  ;;  %6157 = vpow2.f32 %v4681_v36  ;;  %v4712_v8 = vadd.f32 %v10248_v30, %v4711_v21  ;;  %v11472_v36 = vsub.f32 %v9905_v1, %v10102_v61  ;;  %v11473_v21 = vsub.f32 %v9909_v58, %v10102_v61 }
 0x819   : > { %11469 = vst [vmem:[#allocation42_spill] sm:$0xff] %v10299_v27  ;;  %v10305_v13 = vpop.eup %6139  ;;  %6159 = vpow2.f32 %v4685_v32  ;;  %v4701_v29 = vmul.f32 1.442695, %v11471_v43  ;;  %v4587_v33 = vmul.f32 1.442695, %v11474_v54  ;;  %v11475_v1 = vsub.f32 %v9923_v0, %v10102_v61 }
 0x81a   : > { %v10310_v26 = vpop.eup %6141  ;;  %6161 = vpow2.f32 %v4689_v11  ;;  %v4713_v15 = vadd.f32 %v10255_v6, %v4712_v8  ;;  %v4579_v49 = vmul.f32 1.442695, %v11472_v36  ;;  %v4583_v32 = vmul.f32 1.442695, %v11473_v21 }
 0x81b   : > { %v10316_v22 = vpop.eup %6143  ;;  %6163 = vpow2.f32 %v4693_v45  ;;  %v4591_v8 = vmul.f32 1.442695, %v11475_v1  ;;  %v11476_v45 = vsub.f32 %v9930_v3, %v10102_v61  ;;  %v11477_v58 = vsub.f32 %v9936_v23, %v10102_v61 }
 0x81c   : > { %v10324_v59 = vpop.eup %6145  ;;  %6165 = vpow2.f32 %v4697_v35  ;;  %v4714_v11 = vadd.f32 %v10263_v42, %v4713_v15  ;;  %v11478_v35 = vsub.f32 %v9942_v60, %v10102_v61  ;;  %v11479_v15 = vsub.f32 %v9948_v51, %v10102_v61 }
 0x81d   : > { %v4595_v43 = vmul.f32 1.442695, %v11476_v45  ;;  %v10333_v36 = vpop.eup %6147  ;;  %6167 = vpow2.f32 %v4701_v29  ;;  %v4599_v16 = vmul.f32 1.442695, %v11477_v58  ;;  %v11480_v29 = vsub.f32 %v9954_v40, %v10102_v61 }
 0x81e   : > { %v4603_v21 = vmul.f32 1.442695, %v11478_v35  ;;  %v4607_v0 = vmul.f32 1.442695, %v11479_v15  ;;  %v10344_v54 = vpop.eup %6149  ;;  %v4715_v3 = vadd.f32 %v10269_v20, %v4714_v11  ;;  %6169 = vpow2.f32 %v4579_v49 }
 0x81f   : > { %v4611_v1 = vmul.f32 1.442695, %v11480_v29  ;;  %v11481_v23 = vsub.f32 %v9960_v46, %v10102_v61  ;;  %v10353_v58 = vpop.eup %6151  ;;  %6171 = vpow2.f32 %v4583_v32 }
 0x820   : > { %v10361_v11 = vpop.eup %6153  ;;  %v4716_v40 = vadd.f32 %v10275_v28, %v4715_v3  ;;  %6173 = vpow2.f32 %v4587_v33 }
 0x821   : > { %v4615_v45 = vmul.f32 1.442695, %v11481_v23  ;;  %v10368_v35 = vpop.eup %6155  ;;  %6175 = vpow2.f32 %v4591_v8  ;;  %v11482_v8 = vsub.f32 %v9966_v56, %v10102_v61  ;;  %v11483_v23 = vsub.f32 %v9972_v10, %v10102_v61 }
 0x822   : > { %v10376_v3 = vpop.eup %6157  ;;  %v4717_v33 = vadd.f32 %v10282_v53, %v4716_v40  ;;  %6177 = vpow2.f32 %v4595_v43 }
 0x823   : > { %v10383_v46 = vpop.eup %6159  ;;  %6179 = vpow2.f32 %v4599_v16  ;;  %v4619_v32 = vmul.f32 1.442695, %v11482_v8  ;;  %v4623_v29 = vmul.f32 1.442695, %v11483_v23 }
 0x824   : > { %v10391_v40 = vpop.eup %6161  ;;  %v4718_v43 = vadd.f32 %v10288_v2, %v4717_v33  ;;  %6181 = vpow2.f32 %v4603_v21  ;;  %v11484_v21 = vsub.f32 %v9978_v19, %v10102_v61  ;;  %v11489_v19 = vsub.f32 %v11449_v4, %v10102_v61 }
 0x825   : > { %v10399_v49 = vpop.eup %6163  ;;  %6183 = vpow2.f32 %v4607_v0  ;;  %v11485_v0 = vsub.f32 %v9984_v18, %v10102_v61  ;;  %v11488_v18 = vsub.f32 %v11448_v52, %v10102_v61  ;;  %v11492_v4 = vsub.f32 %v11452_v14, %v10102_v61 }
 0x826   : > { %v10404_v15 = vpop.eup %6165  ;;  %v4719_v51 = vadd.f32 %v10294_v47, %v4718_v43  ;;  %6185 = vpow2.f32 %v4611_v1  ;;  %v4627_v56 = vmul.f32 1.442695, %v11484_v21  ;;  %v11486_v1 = vsub.f32 %v11446_v25, %v10102_v61 }
 0x827   : > { %v10412_v8 = vpop.eup %6167  ;;  %6187 = vpow2.f32 %v4615_v45  ;;  %v4631_v10 = vmul.f32 1.442695, %v11485_v0  ;;  %v11487_v45 = vsub.f32 %v11447_v24, %v10102_v61  ;;  %v4643_v0 = vmul.f32 1.442695, %v11488_v18 }
 0x828   : > { %v6170_v23 = vpop.eup %6169  ;;  %v4720_v16 = vadd.f32 %v10299_v27, %v4719_v51  ;;  %6189 = vpow2.f32 %v4619_v32  ;;  %v4635_v43 = vmul.f32 1.442695, %v11486_v1  ;;  %v11490_v24 = vsub.f32 %v11450_v7, %v10102_v61 }
 0x829   : > { %v6172_v21 = vpop.eup %6171  ;;  %6191 = vpow2.f32 %v4623_v29  ;;  %v4639_v33 = vmul.f32 1.442695, %v11487_v45  ;;  %v4647_v29 = vmul.f32 1.442695, %v11489_v19  ;;  %v4659_v19 = vmul.f32 1.442695, %v11492_v4 }
 0x82a   : > { %v6174_v60 = vpop.eup %6173  ;;  %v4721_v51 = vadd.f32 %v10305_v13, %v4720_v16  ;;  %6193 = vpow2.f32 %v4627_v56  ;;  %v4742_v32 = vadd.f32 %v6172_v21, %v6170_v23  ;;  %v5470_v25 = vpack.c.bf16 %v6172_v21, %v6170_v23 }
 0x82b   : > { %v6176_v1 = vpop.eup %6175  ;;  %6195 = vpow2.f32 %v4631_v10  ;;  %v4651_v45 = vmul.f32 1.442695, %v11490_v24  ;;  %v11491_v10 = vsub.f32 %v11451_v57, %v10102_v61  ;;  %v11493_v7 = vpack.c.bf16 %v10194_v34, %v10186_v31 }
 0x82c   : > { %v6178_v27 = vpop.eup %6177  ;;  %v4722_v52 = vadd.f32 %v10310_v26, %v4721_v51  ;;  %6197 = vpow2.f32 %v4635_v43  ;;  %v4743_v18 = vadd.f32 %v6174_v60, %v4742_v32  ;;  %5471 = vmatprep.subr.bf16.mxu1 %v5470_v25  ;;  %v5474_v16 = vpack.c.bf16 %v6176_v1, %v6174_v60 }
 0x82d   : > { %v6180_v56 = vpop.eup %6179  ;;  %6199 = vpow2.f32 %v4639_v33  ;;  %v4655_v23 = vmul.f32 1.442695, %v11491_v10  ;;  %5473 = vmatpush1.bf16.msra.mxu1 %v11493_v7  ;;  %v11494_v57 = vsub.f32 %v11453_v5, %v10102_v61  ;;  %v11495_v14 = vsub.f32 %v11454_v63, %v10102_v61  ;;  %v11500_v7 = vld [vmem:[#allocation75_spill] sm:$0xff] }
 0x82e   : > { %v6182_v21 = vpop.eup %6181  ;;  %v4723_v43 = vadd.f32 %v10316_v22, %v4722_v52  ;;  %6201 = vpow2.f32 %v4643_v0  ;;  %v4744_v51 = vadd.f32 %v6176_v1, %v4743_v18  ;;  %5475 = vmatprep.subr.bf16.mxu1 %v5474_v16  ;;  %v5478_v60 = vpack.c.bf16 %v6180_v56, %v6178_v27 }
 0x82f   : > { %v6184_v33 = vpop.eup %6183  ;;  %6203 = vpow2.f32 %v4647_v29  ;;  %v4663_v32 = vmul.f32 1.442695, %v11494_v57  ;;  %v4667_v25 = vmul.f32 1.442695, %v11495_v14  ;;  %v11496_v1 = vsub.f32 %v11455_v37, %v10102_v61 }
 0x830   : > { %v6186_v24 = vpop.eup %6185  ;;  %v4724_v31 = vadd.f32 %v10324_v59, %v4723_v43  ;;  %6205 = vpow2.f32 %v4651_v45  ;;  %v4745_v34 = vadd.f32 %v6178_v27, %v4744_v51  ;;  %v5482_v52 = vpack.c.bf16 %v6184_v33, %v6182_v21 }
 0x831   : > { %v6188_v0 = vpop.eup %6187  ;;  %6207 = vpow2.f32 %v4655_v23  ;;  %v4671_v29 = vmul.f32 1.442695, %v11496_v1  ;;  %v11497_v5 = vsub.f32 %v11456_v39, %v10102_v61  ;;  %v11498_v63 = vpack.c.bf16 %v10210_v9, %v10202_v17 }
 0x832   : > { %v6190_v16 = vpop.eup %6189  ;;  %v4725_v10 = vadd.f32 %v10333_v36, %v4724_v31  ;;  %6209 = vpow2.f32 %v4659_v19  ;;  %v4746_v27 = vadd.f32 %v6180_v56, %v4745_v34  ;;  %v5486_v45 = vpack.c.bf16 %v6188_v0, %v6186_v24 }
 0x833   : > { %v4675_v18 = vmul.f32 1.442695, %v11497_v5  ;;  %5477 = vmatpush1.bf16.msra.mxu1 %v11498_v63  ;;  %v6192_v23 = vpop.eup %6191  ;;  %6211 = vpow2.f32 %v4663_v32  ;;  %v11499_v37 = vsub.f32 %v11457_v41, %v10102_v61  ;;  %v11501_v39 = vsub.f32 %v11500_v7, %v10102_v61  ;;  %v11503_v32 = vld [vmem:[#allocation28_spill] sm:$0xff] }
 0x834   : > { %5479 = vmatprep.subr.bf16.mxu1 %v5478_v60  ;;  %v6194_v51 = vpop.eup %6193  ;;  %v4726_v17 = vadd.f32 %v10344_v54, %v4725_v10  ;;  %6213 = vpow2.f32 %v4667_v25  ;;  %v4747_v9 = vadd.f32 %v6182_v21, %v4746_v27  ;;  %v5490_v57 = vpack.c.bf16 %v6192_v23, %v6190_v16 }
 0x835   : > { %v4679_v4 = vmul.f32 1.442695, %v11499_v37  ;;  %v4683_v43 = vmul.f32 1.442695, %v11501_v39  ;;  %v6196_v19 = vpop.eup %6195  ;;  %6215 = vpow2.f32 %v4671_v29  ;;  %v11502_v56 = vsub.f32 %v11459_v38, %v10102_v61 }
 0x836   : > { %v11504_v41 = vsub.f32 %v11503_v32, %v10102_v61  ;;  %v11505_v31 = vpack.c.bf16 %v10225_v50, %v10218_v55  ;;  %v6198_v34 = vpop.eup %6197  ;;  %v4727_v1 = vadd.f32 %v10353_v58, %v4726_v17  ;;  %6217 = vpow2.f32 %v4675_v18 }
 0x837   : > { %v4687_v60 = vmul.f32 1.442695, %v11502_v56  ;;  %v4748_v21 = vadd.f32 %v6184_v33, %v4747_v9  ;;  %v5494_v25 = vpack.c.bf16 %v6196_v19, %v6194_v51  ;;  %v6200_v29 = vpop.eup %6199  ;;  %6219 = vpow2.f32 %v4679_v4  ;;  %v11508_v33 = vld [vmem:[#allocation17_spill] sm:$0xff] }
 0x838   : > { %v4691_v14 = vmul.f32 1.442695, %v11504_v41  ;;  %5481 = vmatpush1.bf16.msra.mxu1 %v11505_v31  ;;  %v11506_v38 = vsub.f32 %v11461_v48, %v10102_v61  ;;  %v11507_v63 = vsub.f32 %v11462_v62, %v10102_v61  ;;  %v6202_v27 = vpop.eup %6201  ;;  %v4728_v50 = vadd.f32 %v10361_v11, %v4727_v1 }
 0x839   : > { %5483 = vmatprep.subr.bf16.mxu1 %v5482_v52  ;;  %6221 = vpow2.f32 %v4683_v43  ;;  %v4749_v55 = vadd.f32 %v6186_v24, %v4748_v21  ;;  %v5498_v37 = vpack.c.bf16 %v6200_v29, %v6198_v34  ;;  %v6204_v18 = vpop.eup %6203  ;;  %v11509_v52 = vsub.f32 %v11508_v33, %v10102_v61 }
 0x83a   : > { %v4695_v5 = vmul.f32 1.442695, %v11506_v38  ;;  %v4699_v10 = vmul.f32 1.442695, %v11507_v63  ;;  %6223 = vpow2.f32 %v4687_v60  ;;  %v11510_v48 = vpack.c.bf16 %v10240_v12, %v10233_v44  ;;  %v6206_v7 = vpop.eup %6205 }
 0x83b   : > { %v4703_v4 = vmul.f32 1.442695, %v11509_v52  ;;  %v4729_v62 = vadd.f32 %v10368_v35, %v4728_v50  ;;  %6225 = vpow2.f32 %v4691_v14  ;;  %v4750_v39 = vadd.f32 %v6188_v0, %v4749_v55  ;;  %v6208_v43 = vpop.eup %6207 }
 0x83c   : > { %5485 = vmatpush1.bf16.msra.mxu1 %v11510_v48  ;;  %v5502_v17 = vpack.c.bf16 %v6204_v18, %v6202_v27  ;;  %6227 = vpow2.f32 %v4695_v5  ;;  %v6210_v24 = vpop.eup %6209  ;;  %v5506_v61 = vpack.c.bf16 %v6208_v43, %v6206_v7  ;;  %v11511_v12 = vpack.c.bf16 %v10255_v6, %v10248_v30 }
 0x83d   : > { %5487 = vmatprep.subr.bf16.mxu1 %v5486_v45  ;;  %v4730_v9 = vadd.f32 %v10376_v3, %v4729_v62  ;;  %6229 = vpow2.f32 %v4699_v10  ;;  %v4751_v56 = vadd.f32 %v6190_v16, %v4750_v39  ;;  %v6212_v60 = vpop.eup %6211  ;;  %v11512_v38 = vpack.c.bf16 %v10269_v20, %v10263_v42 }
 0x83e   : > { %6231 = vpow2.f32 %v4703_v4  ;;  %v6214_v44 = vpop.eup %6213  ;;  %v5510_v45 = vpack.c.bf16 %v6212_v60, %v6210_v24  ;;  %v11514_v62 = vpack.c.bf16 %v10294_v47, %v10288_v2  ;;  %v11518_v2 = vpack.c.bf16 %v10333_v36, %v10324_v59 }
 0x83f   : > { %v4731_v32 = vadd.f32 %v10383_v46, %v4730_v9  ;;  %v4752_v0 = vadd.f32 %v6192_v23, %v4751_v56  ;;  %v6216_v41 = vpop.eup %6215  ;;  %v11515_v9 = vld [vmem:[#allocation42_spill] sm:$0xff]  ;;  %v11521_v59 = vpack.c.bf16 %v10383_v46, %v10376_v3 }
 0x840   : > { %5489 = vmatpush1.bf16.msra.mxu1 %v11511_v12  ;;  %v6218_v14 = vpop.eup %6217  ;;  %v5514_v21 = vpack.c.bf16 %v6216_v41, %v6214_v44 }
 0x841   : > { %5491 = vmatprep.subr.bf16.mxu1 %v5490_v57  ;;  %v4732_v31 = vadd.f32 %v10391_v40, %v4731_v32  ;;  %v4753_v1 = vadd.f32 %v6194_v51, %v4752_v0  ;;  %v6220_v16 = vpop.eup %6219  ;;  %v11513_v51 = vpack.c.bf16 %v10282_v53, %v10275_v28  ;;  %v11516_v28 = vpack.c.bf16 %v10305_v13, %v11515_v9 }
 0x842   : > { %v5518_v63 = vpack.c.bf16 %v6220_v16, %v6218_v14  ;;  %v11519_v13 = vpack.c.bf16 %v10353_v58, %v10344_v54  ;;  %v11522_v54 = vpack.c.bf16 %v10399_v49, %v10391_v40 }
 0x843   : > { %v6222_v5 = vpop.eup %6221  ;;  %v4733_v6 = vadd.f32 %v10399_v49, %v4732_v31  ;;  %v4754_v30 = vadd.f32 %v6196_v19, %v4753_v1 }
 0x844   : > { %5493 = vmatpush1.bf16.msra.mxu1 %v11512_v38  ;;  %v6224_v23 = vpop.eup %6223  ;;  %v11525_v38 = vld [vmem:[#allocation66_spill] sm:$0xff] }
 0x845   : > { %5495 = vmatprep.subr.bf16.mxu1 %v5494_v25  ;;  %v6226_v57 = vpop.eup %6225  ;;  %v4734_v10 = vadd.f32 %v10404_v15, %v4733_v6  ;;  %v4755_v50 = vadd.f32 %v6198_v34, %v4754_v30  ;;  %v5522_v55 = vpack.c.bf16 %v6224_v23, %v6222_v5  ;;  %v11526_v6 = vld [vmem:[#allocation14_spill] sm:$0xff] }
 0x846   : > { %v6228_v33 = vpop.eup %6227 }
 0x847   : > { %v6230_v52 = vpop.eup %6229  ;;  %v4735_v20 = vadd.f32 %v10412_v8, %v4734_v10  ;;  %v4756_v42 = vadd.f32 %v6200_v29, %v4755_v50  ;;  %v5526_v4 = vpack.c.bf16 %v6228_v33, %v6226_v57  ;;  %v11517_v29 = vpack.c.bf16 %v10316_v22, %v10310_v26 }
 0x848   : > { %5497 = vmatpush1.bf16.msra.mxu1 %v11513_v51  ;;  %v6232_v19 = vpop.eup %6231  ;;  %v11520_v26 = vpack.c.bf16 %v10368_v35, %v10361_v11  ;;  %v11523_v11 = vpack.c.bf16 %v10412_v8, %v10404_v15  ;;  %v11524_v35 = vld [vmem:[#allocation37_spill] sm:$0xff] }
 0x849   : > { %5499 = vmatprep.subr.bf16.mxu1 %v5498_v37  ;;  %v4757_v25 = vadd.f32 %v6202_v27, %v4756_v42  ;;  %v5530_v48 = vpack.c.bf16 %v6232_v19, %v6230_v52 }
 0x84b   : > { %v4758_v34 = vadd.f32 %v6204_v18, %v4757_v25 }
 0x84c   : > { %5501 = vmatpush1.bf16.msra.mxu1 %v11514_v62 }
 0x84d   : > { %5503 = vmatprep.subr.bf16.mxu1 %v5502_v17  ;;  %v4759_v39 = vadd.f32 %v6206_v7, %v4758_v34 }
 0x84f   : > { %v4760_v53 = vadd.f32 %v6208_v43, %v4759_v39 }
 0x850   : > { %5505 = vmatpush1.bf16.msra.mxu1 %v11516_v28 }
 0x851   : > { %5507 = vmatprep.subr.bf16.mxu1 %v5506_v61  ;;  %v4761_v56 = vadd.f32 %v6210_v24, %v4760_v53  ;;  %v4736_v61 = vrot.slane %v4735_v20, 4 }
 0x853   : > { %v4762_v27 = vadd.f32 %v6212_v60, %v4761_v56  ;;  %v4737_v46 = vadd.f32 %v4736_v61, %v4735_v20 }
 0x854   : > { %5509 = vmatpush1.bf16.msra.mxu1 %v11517_v29 }
 0x855   : > { %5511 = vmatprep.subr.bf16.mxu1 %v5510_v45  ;;  %v4763_v37 = vadd.f32 %v6214_v44, %v4762_v27  ;;  %v4738_v12 = vrot.slane %v4737_v46, 2 }
 0x857   : > { %v4764_v47 = vadd.f32 %v6216_v41, %v4763_v37  ;;  %v4739_v32 = vadd.f32 %v4738_v12, %v4737_v46 }
 0x858   : > { %5513 = vmatpush1.bf16.msra.mxu1 %v11518_v2 }
 0x859   : > { %5515 = vmatprep.subr.bf16.mxu1 %v5514_v21  ;;  %v4765_v18 = vadd.f32 %v6218_v14, %v4764_v47  ;;  %v4740_v45 = vrot.slane %v4739_v32, 1 }
 0x85b   : > { %v4766_v7 = vadd.f32 %v6220_v16, %v4765_v18  ;;  %v4741_v40 = vadd.f32 %v4740_v45, %v4739_v32 }
 0x85c   : > { %5517 = vmatpush1.bf16.msra.mxu1 %v11519_v13 }
 0x85d   : > { %5519 = vmatprep.subr.bf16.mxu1 %v5518_v63  ;;  %v4767_v17 = vadd.f32 %v6222_v5, %v4766_v7  ;;  %6233 = vrcp.f32 %v4741_v40 }
 0x85f   : > { %v4768_v22 = vadd.f32 %v6224_v23, %v4767_v17 }
 0x860   : > { %5521 = vmatpush1.bf16.msra.mxu1 %v11520_v26 }
 0x861   : > { %5523 = vmatprep.subr.bf16.mxu1 %v5522_v55  ;;  %v4769_v43 = vadd.f32 %v6226_v57, %v4768_v22 }
 0x863   : > { %v4770_v36 = vadd.f32 %v6228_v33, %v4769_v43 }
 0x864   : > { %5525 = vmatpush1.bf16.msra.mxu1 %v11521_v59  ;;  %v4935_v16 = vpop.permute.xlu1 %4934 }
 0x865   : > { %5527 = vmatprep.subr.bf16.mxu1 %v5526_v4  ;;  %v4771_v24 = vadd.f32 %v6230_v52, %v4770_v36 }
 0x867   : > { %v4772_v58 = vadd.f32 %v6232_v19, %v4771_v24  ;;  %v6234_v15 = vpop.eup %6233 }
 0x868   : > { %5529 = vmatpush1.bf16.msra.mxu1 %v11522_v54 }
 0x869   : > { %5531 = vmatprep.subr.bf16.mxu1 %v5530_v48  ;;  %v4773_v60 = vrot.slane %v4772_v58, 4 }
 0x86b   : > { %v4774_v3 = vadd.f32 %v4773_v60, %v4772_v58 }
 0x86c   : > { %5533 = vmatpush1.bf16.msra.mxu1 %v11523_v11 }
 0x86d   : > { %v4775_v44 = vrot.slane %v4774_v3, 2 }
 0x86f   : > { %4919 = vmatmul.mubr.f32.vlgmr.msra.gmra.mrb[196].mxu1 %v11524_v35  ;;  %v4776_v0 = vadd.f32 %v4775_v44, %v4774_v3 }
 0x871   : > { %v4777_v49 = vrot.slane %v4776_v0, 1 }
 0x873   : > { %v4778_v41 = vadd.f32 %v4777_v49, %v4776_v0 }
 0x875   : > { %6235 = vrcp.f32 %v4778_v41 }
 0x87f   : > { %v6236_v14 = vpop.eup %6235 }
 0x942   : > { %v4920_v8 = vpop.f32.mrb[196].mxu1 }
 0x943   : > { %v4926_v31 = vmul.f32 %v6234_v15, %v4920_v8  ;;  %v4922_v1 = vpop.f32.mrb[197].mxu1 }
 0x944   : > { %v4928_v21 = vmul.f32 %v6236_v14, %v4922_v1 }
 0x945   : > { %v4929_v5 = vadd.f32 %v4926_v31, %v11525_v38 }
 0x946   : > { %v4930_v30 = vadd.f32 %v4928_v21, %v11526_v6 }
 0x947   : > { %v4937_v63 = vadd.f32 %v4935_v16, %v4929_v5 }
 0x948   : > { %v4938_v23 = vadd.f32 %v4935_v16, %v4930_v30 }
 0x94a   : > { %v4941_v57 = vcombine.low %v4937_v63, %v4938_v23 }
 0x94c   : > { %4943 = vst [vmem:[%s190_s14] sm:$0xff] %v4941_v57 }
 0x94d   : > { %6252 = shalt.err (!%p6249_p3)
}
 0x94e   : > { %s6253_s6 = scalar_lea.hbm %s10545_s27, 128  ;;  %s6257_s9 = scalar_lea.hbm %s10591_s4, 256 }
 0x94f   : > { %p6254_p4 = scmp.ne.s32.totalorder %s10545_s27, %s6253_s6  ;;  %p6258_p9 = scmp.lt.u32.totalorder %s10545_s27, %s10591_s4 }
 0x950   : > { %p6259_p10 = scmp.lt.u32.totalorder %s6257_s9, %s6253_s6  ;;  %p6261_p12 = scmp.lt.u32.totalorder %s6253_s6, %s10545_s27 }
 0x951   : > { %p6255_p7 = pnand %p6254_p4, %p6372_p5 }
 0x952   : > { %p6260_p11 = por %p6259_p10, %p6258_p9 }
 0x953   : > { %p6256_p8 = pneg %p6255_p7 }
 0x954   : > { %p6262_p13 = por %p6261_p12, %p6260_p11 }
 0x956   : > { %p6263_p0 = pnand %p6262_p13, %p6256_p8 }
 0x958   : > { %6266 = shalt.err (!%p6263_p0)
}
 0x959   : > { %5534 = dma.vmem_to_hbm [thread:$0]  (%p6372_p5), %s10547_s20, 128, %s10545_s27, %s4945_s28  }
 0x95a PF: > { %p5540_p1 = scmp.ge.s32.totalorder %s6301_s18, 2  ;;  %s4971_s12 = sand.u32 1, %s6289_s15  }
 0x95b   : > { %s4972_s13 = scalar_lea.sflag [#allocation3], %s4971_s12 }
 0x95c   : > { %p5537_p2 = pnand %p5540_p1, %p6376_p6 }
 0x95e   : > { %6284 = dma.done.wait (!%p5537_p2), %s4972_s13, 128  }
 0x95f   : > { %6286 = vsyncadd (!%p5537_p2), %s4972_s13, 4294967168  ;;  %p14_p3 = scmp.ge.s32.totalorder %s6359_s21, 4   ;;  %s11527_s15 = smov %s6293_s16 }
 0x960   : > { %s11528_s16 = smov %s6297_s17  ;;  %s11529_s17 = smov %s6370_s24 }
 0x961   : > { %s11530_s18 = smov %s6359_s21  ;;  %16 = sbr.rel (!%p14_p3) target bundleno = 3 (0x3), region = 71 }
 0x968   :  { %4977 = vsyncpa [#allocation3], 1 }
 0x969   :  { %4979 = vsyncpa [#allocation3 + $0x1], 1 }

</bundles_post_ra>
